<compile_context>
chip_gen: v6e
topology: v6e:2x2x1
jax: 0.10.0
libtpu: 0.0.40
codegen_flags: <defaults>
</compile_context>

<pallas_src>
import jax
import jax.numpy as jnp
from jax.experimental import pallas as pl
from jax.experimental.pallas import tpu as pltpu

NUM_VERTS = 6890
DIFF_DIM = 128
NUM_JOINTS = 17
DIM_REP = 32              # small stand-in for the default 512
PARAM_POSE_DIM = 24 * 6   # 144
FEAT_DIM = NUM_JOINTS * DIFF_DIM  # 2176

BLEND_K = 217             # 10 betas + 207 pose features
BLEND_K_PAD = 224         # contraction dim padded (multiple of 32 for int8 sublanes)
NCOLS = NUM_VERTS * 3     # 20670 vertex coordinates
COL_TILE = 3584           # 28 * 128 lanes per grid step
NCOLS_PAD = 6 * COL_TILE  # 21504 -> 6 even weight tiles (>=3 per TC on v7x megacore)


# ----------------------------------------------------------------------------
# Pallas kernel: verts = template + (blend_in @ dequant(int8 basis))
# ----------------------------------------------------------------------------
def _blend_kernel(x_ref, wq_ref, scale_ref, t_ref, o_ref):
    # int8 -> f32 cast on the VPU (hidden under the weight DMA; kernel is HBM-bound).
    w = wq_ref[...].astype(jnp.float32)
    acc = jnp.dot(x_ref[...], w, preferred_element_type=jnp.float32)
    # per-column dequant scale factors out of the contraction -> apply to accumulator
    o_ref[...] = t_ref[...] + acc * scale_ref[...]


def pallas_blendshapes(x, w_q, scale, template):
    """x:(M,224) f32, w_q:(224,21504) int8, scale/template:(1,21504) f32 -> (M,20670) f32.

    Output shape is the *unpadded* 20670 columns; Pallas masks the store of the
    final partial block, so no XLA slice copy is needed afterwards.
    """
    m, k = x.shape
    k2, ncols_pad = w_q.shape
    assert k == k2 and ncols_pad % COL_TILE == 0
    grid = ncols_pad // COL_TILE
    return pl.pallas_call(
        _blend_kernel,
        out_shape=jax.ShapeDtypeStruct((m, NCOLS), jnp.float32),
        grid=(grid,),
        in_specs=[
            pl.BlockSpec((m, k), lambda j: (0, 0)),
            # NOTE: pipeline_mode=pl.Buffered(3) is a documented further option for
            # deeper buffering; 6 tiles already give >=3 steps per core on v7x.
            pl.BlockSpec((k, COL_TILE), lambda j: (0, j)),
            pl.BlockSpec((1, COL_TILE), lambda j: (0, j)),
            pl.BlockSpec((1, COL_TILE), lambda j: (0, j)),
        ],
        out_specs=pl.BlockSpec((m, COL_TILE), lambda j: (0, j)),
        compiler_params=pltpu.CompilerParams(dimension_semantics=("parallel",)),
    )(x, w_q, scale, template)


# ----------------------------------------------------------------------------
# Plain-JAX glue (rotation conversions)
# ----------------------------------------------------------------------------
def rot6d_to_rotmat(x):
    x = x.reshape(-1, 3, 2)
    a1, a2 = x[..., 0], x[..., 1]
    b1 = a1 / jnp.maximum(jnp.linalg.norm(a1, axis=-1, keepdims=True), 1e-8)
    dot = jnp.sum(b1 * a2, axis=-1, keepdims=True)
    b2u = a2 - dot * b1
    b2 = b2u / jnp.maximum(jnp.linalg.norm(b2u, axis=-1, keepdims=True), 1e-8)
    b3 = jnp.cross(b1, b2)
    return jnp.stack([b1, b2, b3], axis=-1)  # (N, 3, 3)


def rotation_matrix_to_angle_axis(R):
    # TODO(synk): near angle==pi (sin~0) the axis magnitude/sign is not recovered;
    # adequate for the near-identity poses produced by the gain-0.01 heads.
    trace = R[:, 0, 0] + R[:, 1, 1] + R[:, 2, 2]
    cos = jnp.clip((trace - 1.0) * 0.5, -1.0, 1.0)
    angle = jnp.arccos(cos)
    axis = jnp.stack(
        [R[:, 2, 1] - R[:, 1, 2], R[:, 0, 2] - R[:, 2, 0], R[:, 1, 0] - R[:, 0, 1]],
        axis=-1,
    )
    sin = jnp.sin(angle)
    scale = jnp.where(jnp.abs(sin) < 1e-6, 0.5, angle / jnp.maximum(2.0 * sin, 1e-12))
    return axis * scale[:, None]


# ----------------------------------------------------------------------------
# Parameters (deterministic, synthetic — shapes from the module __init__).
# Everything constant given the params (folding, padding, x1000 scale, int8
# quantization, Jreg @ blenddirs, mesh-template feature) is precomputed here.
# ----------------------------------------------------------------------------
def xavier_uniform(key, shape, gain=1.0):
    fan_in, fan_out = shape
    a = gain * (6.0 / (fan_in + fan_out)) ** 0.5
    return jax.random.uniform(key, shape, jnp.float32, -a, a)


def init_params(key):
    ks = jax.random.split(key, 12)
    p = {}

    # TODO(synk): real backbone (DSTformer) not provided; stand-in per-joint projection.
    bb_w = 0.1 * jax.random.normal(ks[0], (3, DIM_REP), jnp.float32)
    bb_b = jnp.zeros((DIM_REP,), jnp.float32)
    # fc_ds = Linear(dim_rep, 128) + ReLU
    fc_ds_w = xavier_uniform(ks[1], (DIM_REP, DIFF_DIM))
    fc_ds_b = jnp.zeros((DIFF_DIM,), jnp.float32)
    # No nonlinearity between backbone projection and fc_ds -> collapse exactly.
    p["front_w"] = bb_w @ fc_ds_w                       # (3, 128)
    p["front_b"] = bb_b @ fc_ds_w + fc_ds_b             # (128,)

    # mesh_template buffer (smpl_mean_vertices.npy): (6890, 3), synthetic here
    mesh_template = 0.1 * jax.random.normal(ks[2], (NUM_VERTS, 3), jnp.float32)
    # fc_mesh_temp = Linear(1378,128) + GELU + Conv1d(15,17,1) + GELU
    fc_mt_w = xavier_uniform(ks[3], (1378, DIFF_DIM))
    fc_mt_b = jnp.zeros((DIFF_DIM,), jnp.float32)
    conv_w = xavier_uniform(ks[4], (15, NUM_JOINTS))    # Conv1d weight (17,15,1).T
    conv_b = jnp.zeros((NUM_JOINTS,), jnp.float32)
    # Depends only on params/buffers -> precompute its output feature once.
    mt15 = mesh_template.T.reshape(15, 1378)            # (B,3,6890)->(B,15,1378)
    h = jax.nn.gelu(mt15 @ fc_mt_w + fc_mt_b, approximate=False)                 # (15,128)
    conv_out = jax.nn.gelu(conv_w.T @ h + conv_b[:, None], approximate=False)    # (17,128)
    p["mesh_template_feat"] = conv_out.reshape(FEAT_DIM)                          # (2176,)

    # heads (xavier gain 0.01 as in the module); fused + bf16 storage (f32 accumulate)
    head_pose_w = xavier_uniform(ks[5], (FEAT_DIM, PARAM_POSE_DIM), gain=0.01)
    head_shape_w = xavier_uniform(ks[6], (FEAT_DIM, 10), gain=0.01)
    p["heads_w_bf16"] = jnp.concatenate([head_pose_w, head_shape_w], axis=1).astype(
        jnp.bfloat16
    )                                                    # (2176, 154)
    init_pose = jnp.tile(jnp.array([1.0, 0.0, 0.0, 1.0, 0.0, 0.0], jnp.float32), 24)
    init_shape = jnp.zeros((10,), jnp.float32)
    p["head_pose_bias"] = jnp.zeros((PARAM_POSE_DIM,), jnp.float32) + init_pose
    p["head_shape_bias"] = jnp.zeros((10,), jnp.float32) + init_shape

    # TODO(synk): SMPL body model (shapedirs/posedirs/LBS) file not available;
    # synthetic template + combined (10 shape + 207 pose) blend-shape basis.
    v_template = 0.2 * jax.random.normal(ks[7], (NUM_VERTS, 3), jnp.float32)
    blenddirs = 0.01 * jax.random.normal(ks[8], (BLEND_K, NCOLS), jnp.float32)
    jr = jax.random.uniform(ks[9], (NUM_JOINTS, NUM_VERTS), jnp.float32)
    J_regressor = jr / jnp.sum(jr, axis=1, keepdims=True)

    # mm scale folded into the basis/template; int8 per-column quantization of the
    # dominant HBM stream (the 224 x 20670 basis) with f32 scales.
    bd_mm = blenddirs * 1000.0                                    # (217, 20670)
    vt_mm = v_template * 1000.0
    col_absmax = jnp.max(jnp.abs(bd_mm), axis=0)                  # (20670,)
    scale = jnp.maximum(col_absmax / 127.0, 1e-12)
    w_q = jnp.clip(jnp.round(bd_mm / scale), -127.0, 127.0).astype(jnp.int8)
    p["blend_q"] = jnp.pad(
        w_q, ((0, BLEND_K_PAD - BLEND_K), (0, NCOLS_PAD - NCOLS))
    )                                                             # (224, 21504) int8
    p["blend_scale"] = jnp.pad(
        scale.reshape(1, NCOLS), ((0, 0), (0, NCOLS_PAD - NCOLS)), constant_values=1.0
    )                                                             # (1, 21504) f32
    p["template_pad"] = jnp.pad(
        vt_mm.reshape(1, NCOLS), ((0, 0), (0, NCOLS_PAD - NCOLS))
    )                                                             # (1, 21504) f32

    # H36M joint regression folded onto blend coefficients (tiny, full precision):
    #   joints = Jreg @ verts = Jreg@vt_mm + blend_in @ (Jreg applied to bd_mm)
    jreg_blend = jnp.einsum(
        "jv,kvc->kjc", J_regressor, bd_mm.reshape(BLEND_K, NUM_VERTS, 3)
    ).reshape(BLEND_K, NUM_JOINTS * 3)
    p["jreg_blend"] = jnp.pad(jreg_blend, ((0, BLEND_K_PAD - BLEND_K), (0, 0)))  # (224,51)
    p["jreg_template"] = (J_regressor @ vt_mm).reshape(NUM_JOINTS * 3)            # (51,)
    return p


# ----------------------------------------------------------------------------
# Forward pass (MeshRegressor.forward -> SMPLRegressor.forward)
# ----------------------------------------------------------------------------
@jax.jit
def mesh_regressor_forward(p, x):
    N, T, J, C = x.shape
    B_T = N * T

    # collapsed backbone stand-in + fc_ds (Linear + ReLU) — tiny, plain jnp
    feat = jnp.maximum(x.reshape(B_T * J, C) @ p["front_w"] + p["front_b"], 0.0)
    fp_flat = feat.reshape(N, T, J * DIFF_DIM)

    # TODO(synk): DiffMesh_Process (diffusion refiner) source unavailable; stand-in
    # fuses the (param-only, precomputed) mesh-template feature by broadcast-add.
    tmpl = p["mesh_template_feat"]                        # (2176,)
    feat_pose2 = fp_flat + tmpl[None, None, :]
    # TODO(synk): equals mean((feat_pose2 - fp_flat)**2) only while the stand-in is a
    # pure broadcast add; revisit if the refiner becomes input-dependent.
    loss_diff = jnp.mean(tmpl * tmpl)

    feat_bt = feat_pose2.reshape(B_T, FEAT_DIM)

    # fused pose+shape heads (bf16 weights, f32 accumulate); the temporal
    # AdaptiveAvgPool2d((None,1)) is folded through the shape head by linearity.
    heads = jnp.dot(
        feat_bt.astype(jnp.bfloat16), p["heads_w_bf16"],
        preferred_element_type=jnp.float32,
    )                                                     # (B_T, 154)
    pred_pose = heads[:, :PARAM_POSE_DIM] + p["head_pose_bias"]          # (B_T, 144)
    shape_per_frame = heads[:, PARAM_POSE_DIM:]                          # (B_T, 10)
    pred_shape_b = jnp.mean(shape_per_frame.reshape(N, T, 10), axis=1) + p["head_shape_bias"]
    pred_shape = jnp.broadcast_to(pred_shape_b[:, None, :], (N, T, 10)).reshape(B_T, 10)

    pred_rotmat = rot6d_to_rotmat(pred_pose).reshape(B_T, 24, 3, 3)

    # TODO(synk): full SMPL (LBS skinning, kinematic chain) not reproduced; synthetic
    # SMPL = v_template + blendshapes(betas ++ pose-feature) — the matmul hot path.
    pose_feat = (pred_rotmat[:, 1:] - jnp.eye(3, dtype=jnp.float32)).reshape(B_T, 207)
    blend_in = jnp.concatenate(
        [pred_shape, pose_feat, jnp.zeros((B_T, BLEND_K_PAD - BLEND_K), jnp.float32)],
        axis=1,
    )                                                     # (B_T, 224) f32, zero-padded K

    # vertices in mm (scale folded into basis); int8 basis, f32 accumulation.
    verts_flat = pallas_blendshapes(
        blend_in, p["blend_q"], p["blend_scale"], p["template_pad"]
    )                                                     # (B_T, 20670) — no slice copy
    pred_vertices = verts_flat.reshape(B_T, NUM_VERTS, 3)

    # H36M joints from blend coefficients directly (Jreg pre-applied at init); tiny.
    joints = blend_in @ p["jreg_blend"] + p["jreg_template"]
    pred_joints = joints.reshape(B_T, NUM_JOINTS, 3)

    pose_aa = rotation_matrix_to_angle_axis(pred_rotmat.reshape(-1, 3, 3)).reshape(B_T, 72)
    theta = jnp.concatenate([pose_aa, pred_shape], axis=1)   # (B_T, 82)

    return {
        "theta": theta.reshape(N, T, -1),
        "verts": pred_vertices.reshape(N, T, -1, 3),
        "kp_3d": pred_joints.reshape(N, T, -1, 3),
        "loss_diff": loss_diff,
    }


if __name__ == "__main__":
    key = jax.random.PRNGKey(0)
    N, T, J, C = 2, 8, 17, 3
    x = jax.random.normal(jax.random.fold_in(key, 999), (N, T, J, C), jnp.float32)
    params = init_params(key)

    out = mesh_regressor_forward(params, x)
    out = jax.block_until_ready(out)

    assert out["theta"].shape == (N, T, 82)
    assert out["verts"].shape == (N, T, NUM_VERTS, 3)
    assert out["kp_3d"].shape == (N, T, NUM_JOINTS, 3)
    assert out["loss_diff"].shape == ()
    assert all(bool(jnp.all(jnp.isfinite(out[k]))) for k in ("theta", "verts", "kp_3d"))
    print("KERNEL_OK")
</pallas_src>

<mosaic_0001>
module attributes {stable_mosaic.version = 11 : i64} {
  func.func @_blend_kernel(%arg0: i32, %arg1: memref<16x224xf32, #tpu.memory_space<vmem>>, %arg2: memref<224x3584xi8, #tpu.memory_space<vmem>>, %arg3: memref<1x3584xf32, #tpu.memory_space<vmem>>, %arg4: memref<1x3584xf32, #tpu.memory_space<vmem>>, %arg5: memref<16x3584xf32, #tpu.memory_space<vmem>>) attributes {dimension_semantics = [#tpu.dimension_semantics<parallel>], iteration_bounds = array<i64: 6>, scalar_prefetch = 0 : i64, scratch_operands = 0 : i64, tpu.core_type = #tpu.core_type<tc>, window_params = [{pipeline_mode = #tpu.pipeline_mode<synchronous>, transform_indices = @transform_0, window_bounds = array<i64: 16, 224>}, {transform_indices = @transform_1, window_bounds = array<i64: 224, 3584>}, {transform_indices = @transform_2, window_bounds = array<i64: 1, 3584>}, {transform_indices = @transform_3, window_bounds = array<i64: 1, 3584>}, {transform_indices = @transform_4, window_bounds = array<i64: 16, 3584>}]} {
    %c0 = arith.constant 0 : index
    %c0_0 = arith.constant 0 : index
    %0 = vector.load %arg2[%c0, %c0_0] : memref<224x3584xi8, #tpu.memory_space<vmem>>, vector<224x3584xi8>
    %1 = arith.sitofp %0 : vector<224x3584xi8> to vector<224x3584xf32>
    %c0_1 = arith.constant 0 : index
    %c0_2 = arith.constant 0 : index
    %2 = vector.load %arg1[%c0_1, %c0_2] : memref<16x224xf32, #tpu.memory_space<vmem>>, vector<16x224xf32>
    %cst = arith.constant dense<0.000000e+00> : vector<16x3584xf32>
    %3 = tpu.matmul %2, %1, %cst {dimension_numbers = #tpu.dot_dimension_numbers<[1], [0], [0], [1], [0, 0, 1, 1], [], []>} : vector<16x224xf32>, vector<224x3584xf32>, vector<16x3584xf32> -> vector<16x3584xf32>
    %c0_3 = arith.constant 0 : index
    %c0_4 = arith.constant 0 : index
    %4 = vector.load %arg4[%c0_3, %c0_4] : memref<1x3584xf32, #tpu.memory_space<vmem>>, vector<1x3584xf32>
    %c0_5 = arith.constant 0 : index
    %c0_6 = arith.constant 0 : index
    %5 = vector.load %arg3[%c0_5, %c0_6] : memref<1x3584xf32, #tpu.memory_space<vmem>>, vector<1x3584xf32>
    %6 = vector.broadcast %5 : vector<1x3584xf32> to vector<16x3584xf32>
    %7 = arith.mulf %3, %6 : vector<16x3584xf32>
    %8 = vector.broadcast %4 : vector<1x3584xf32> to vector<16x3584xf32>
    %9 = arith.addf %8, %7 : vector<16x3584xf32>
    %c0_7 = arith.constant 0 : index
    %c0_8 = arith.constant 0 : index
    %10 = vector.load %arg5[%c0_7, %c0_8] : memref<16x3584xf32, #tpu.memory_space<vmem>>, vector<16x3584xf32>
    tpu.vector_store %arg5[%c0_7, %c0_8], %9 {strides = array<i32>} : memref<16x3584xf32, #tpu.memory_space<vmem>>, vector<16x3584xf32>,
    return
  }
  func.func @transform_0(%arg0: i32) -> (i32, i32) {
    %c0_i32 = arith.constant 0 : i32
    %c0_i32_0 = arith.constant 0 : i32
    %c0_i32_1 = arith.constant 0 : i32
    return %c0_i32, %c0_i32_0 : i32, i32
  }
  func.func @transform_1(%arg0: i32) -> (i32, i32) {
    %c0_i32 = arith.constant 0 : i32
    %c0_i32_0 = arith.constant 0 : i32
    return %c0_i32, %arg0 : i32, i32
  }
  func.func @transform_2(%arg0: i32) -> (i32, i32) {
    %c0_i32 = arith.constant 0 : i32
    %c0_i32_0 = arith.constant 0 : i32
    return %c0_i32, %arg0 : i32, i32
  }
  func.func @transform_3(%arg0: i32) -> (i32, i32) {
    %c0_i32 = arith.constant 0 : i32
    %c0_i32_0 = arith.constant 0 : i32
    return %c0_i32, %arg0 : i32, i32
  }
  func.func @transform_4(%arg0: i32) -> (i32, i32) {
    %c0_i32 = arith.constant 0 : i32
    %c0_i32_0 = arith.constant 0 : i32
    return %c0_i32, %arg0 : i32, i32
  }
}

</mosaic_0001>

<bundles_post_ra>
// kernel: mul.25
= control target key start
LH: loop header
LB: loop body
LE: loop exit
PB: predicated region body
PF: predicated region fallthrough
CT: control target
= control target key end

     0   :  { %s56_s0 = inlined_call_operand.vmem [shape: f32[2,8,72], index: 0, kind: input, shape index: {}]   ;;  %s57_s1 = inlined_call_operand.vmem [shape: f32[2,8,72], index: 1, kind: input, shape index: {}]   ;;  %s58_s2 = inlined_call_operand.vmem [shape: f32[2,8,72], index: 2, kind: output, shape index: {}]  }
   0x1   :  { %v3_v0 = vld [vmem:[%s56_s0] sm:$0xff]  ;;  %v20_v2 = vld [vmem:[%s56_s0 + $0x8] sm:$0xff] }
   0x2   :  { %v4_v1 = vld [vmem:[%s57_s1] sm:$0xff]  ;;  %v21_v4 = vld [vmem:[%s57_s1 + $0x8] sm:$0xff] }
   0x3   :  { %v7_v3 = vmul.f32 %v4_v1, %v3_v0  ;;  %v16_v5 = vmul.f32 %v21_v4, %v20_v2 }
   0x5   :  { %9 = vst [vmem:[%s58_s2] sm:$0xff] %v7_v3  ;;  %22 = vst [vmem:[%s58_s2 + $0x8] sm:$0xff] %v16_v5 }

// kernel: mesh_regressor_forward.1
= control target key start
LH: loop header
LB: loop body
LE: loop exit
PB: predicated region body
PF: predicated region fallthrough
CT: control target
= control target key end

     0   :  { %s5738_s15 = smov 0   ;;  %s5740_s16 = smov 0   ;;  %s7134_s0 = inlined_call_operand.vmem [shape: f32[16,224], index: 0, kind: input, shape index: {}]   ;;  %s7135_s1 = inlined_call_operand.vmem [shape: s8[224,21504], index: 1, kind: input, shape index: {}]   ;;  %s7136_s2 = inlined_call_operand.vmem [shape: f32[1,21504], index: 2, kind: input, shape index: {}]   ;;  %s7137_s3 = inlined_call_operand.vmem [shape: f32[1,21504], index: 3, kind: input, shape index: {}]   ;;  %s7138_s4 = inlined_call_operand.vmem [shape: f32[16,20670], index: 4, kind: output, shape index: {}]  }
   0x1   :  { %s5742_s17 = smov 0  }
   0x2 LB: > { %s5754_s18 = sadd.s32 4294967295, %s5645_s17   ;;  %s5757_s19 = sadd.s32 1, %s5645_s17   ;;  %s5645_s17 = sphi %s5742_s17, %s7152_s17   ;;  %s5641_s16 = sphi %s5740_s16, %s7151_s16   ;;  %s5637_s15 = sphi %s5738_s15, %s7150_s15  }
   0x3   : > { %s39_s20 = ssub.s32 %s5645_s17, %s5757_s19  ;;  %s42_s21 = sadd.s32 1, %s5641_s16 }
   0x4   : > { %p40_p0 = scmp.eq.s32.totalorder %s39_s20, 0  ;;  %p49_p1 = scmp.ne.s32.totalorder %s5641_s16, %s5637_s15 }
   0x5   : > { %p50_p2 = scmp.eq.s32.totalorder %s5645_s17, 0  ;;  %p131_p3 = scmp.eq.s32.totalorder %s5754_s18, 5 }
   0x6   : > { %s5767_s22 = scalar_select %p40_p0, %s5641_s16, %s42_s21  }
   0x7   : > { %p51_p4 = por %p50_p2, %p49_p1  ;;  %p5769_p5 = por %p131_p3, %p49_p1 }
   0x8   : > { %p4548_p6 = scmp.ge.s32.totalorder %s5645_s17, 6 }
   0xa   : > { %156 = sbr.rel (%p4548_p6) target bundleno = 118 (0x76), region = 20 }
   0xf   : > { %159 = sbr.rel (!%p51_p4) target bundleno = 118 (0x76), region = 24  ;;  %s161_s24 = sand.u32 (%p51_p4), 1, %s5641_s16  }
  0x10   : > { %s4608_s25 = smul.u32 (%p51_p4), 224, %s5645_s17 }
  0x11   : > { %s5398_s26 = smul.u32 (%p51_p4), 1568, %s161_s24 }
  0x12   : > { %s5779_s29 = scalar_lea.vmem (%p51_p4), %s7135_s1, %s4608_s25 }
  0x13   : > { %v179_v0 = vld [vmem:[%s5779_s29] sm:$0xff] (%p51_p4)  ;;  %v181_v1 = vld [vmem:[%s5779_s29 + $0x8] sm:$0xff] (%p51_p4)  ;;  %v183_v2 = vld [vmem:[%s5779_s29 + $0x10] sm:$0xff] (%p51_p4)  ;;  %s5784_s30 = scalar_lea.vmem (%p51_p4), [#allocation2], %s5398_s26 }
  0x14   : > { %180 = vst [vmem:[%s5784_s30] sm:$0xff] %v179_v0  ;;  %182 = vst [vmem:[%s5784_s30 + $0x8] sm:$0xff] %v181_v1  ;;  %v185_v3 = vld [vmem:[%s5779_s29 + $0x18] sm:$0xff]  ;;  %v187_v4 = vld [vmem:[%s5779_s29 + $0x20] sm:$0xff] }
  0x15   : > { %184 = vst [vmem:[%s5784_s30 + $0x10] sm:$0xff] %v183_v2  ;;  %v189_v5 = vld [vmem:[%s5779_s29 + $0x28] sm:$0xff]  ;;  %186 = vst [vmem:[%s5784_s30 + $0x18] sm:$0xff] %v185_v3  ;;  %v191_v6 = vld [vmem:[%s5779_s29 + $0x30] sm:$0xff] }
  0x16   : > { %188 = vst [vmem:[%s5784_s30 + $0x20] sm:$0xff] %v187_v4  ;;  %190 = vst [vmem:[%s5784_s30 + $0x28] sm:$0xff] %v189_v5  ;;  %v193_v7 = vld [vmem:[%s5779_s29 + $0x38] sm:$0xff]  ;;  %v195_v8 = vld [vmem:[%s5779_s29 + $0x40] sm:$0xff] }
  0x17   : > { %192 = vst [vmem:[%s5784_s30 + $0x30] sm:$0xff] %v191_v6  ;;  %194 = vst [vmem:[%s5784_s30 + $0x38] sm:$0xff] %v193_v7  ;;  %v197_v9 = vld [vmem:[%s5779_s29 + $0x48] sm:$0xff]  ;;  %v199_v10 = vld [vmem:[%s5779_s29 + $0x50] sm:$0xff] }
  0x18   : > { %196 = vst [vmem:[%s5784_s30 + $0x40] sm:$0xff] %v195_v8  ;;  %v201_v11 = vld [vmem:[%s5779_s29 + $0x58] sm:$0xff]  ;;  %198 = vst [vmem:[%s5784_s30 + $0x48] sm:$0xff] %v197_v9  ;;  %v203_v12 = vld [vmem:[%s5779_s29 + $0x60] sm:$0xff] }
  0x19   : > { %200 = vst [vmem:[%s5784_s30 + $0x50] sm:$0xff] %v199_v10  ;;  %202 = vst [vmem:[%s5784_s30 + $0x58] sm:$0xff] %v201_v11  ;;  %v205_v13 = vld [vmem:[%s5779_s29 + $0x68] sm:$0xff]  ;;  %v207_v14 = vld [vmem:[%s5779_s29 + $0x70] sm:$0xff] }
  0x1a   : > { %204 = vst [vmem:[%s5784_s30 + $0x60] sm:$0xff] %v203_v12  ;;  %206 = vst [vmem:[%s5784_s30 + $0x68] sm:$0xff] %v205_v13  ;;  %v209_v15 = vld [vmem:[%s5779_s29 + $0x78] sm:$0xff]  ;;  %v211_v16 = vld [vmem:[%s5779_s29 + $0x80] sm:$0xff] }
  0x1b   : > { %208 = vst [vmem:[%s5784_s30 + $0x70] sm:$0xff] %v207_v14  ;;  %v213_v17 = vld [vmem:[%s5779_s29 + $0x88] sm:$0xff]  ;;  %210 = vst [vmem:[%s5784_s30 + $0x78] sm:$0xff] %v209_v15  ;;  %v215_v18 = vld [vmem:[%s5779_s29 + $0x90] sm:$0xff] }
  0x1c   : > { %212 = vst [vmem:[%s5784_s30 + $0x80] sm:$0xff] %v211_v16  ;;  %214 = vst [vmem:[%s5784_s30 + $0x88] sm:$0xff] %v213_v17  ;;  %v217_v19 = vld [vmem:[%s5779_s29 + $0x98] sm:$0xff]  ;;  %v219_v20 = vld [vmem:[%s5779_s29 + $0xa0] sm:$0xff] }
  0x1d   : > { %216 = vst [vmem:[%s5784_s30 + $0x90] sm:$0xff] %v215_v18  ;;  %218 = vst [vmem:[%s5784_s30 + $0x98] sm:$0xff] %v217_v19  ;;  %v221_v21 = vld [vmem:[%s5779_s29 + $0xa8] sm:$0xff]  ;;  %v223_v22 = vld [vmem:[%s5779_s29 + $0xb0] sm:$0xff] }
  0x1e   : > { %220 = vst [vmem:[%s5784_s30 + $0xa0] sm:$0xff] %v219_v20  ;;  %v225_v23 = vld [vmem:[%s5779_s29 + $0xb8] sm:$0xff]  ;;  %222 = vst [vmem:[%s5784_s30 + $0xa8] sm:$0xff] %v221_v21  ;;  %v227_v24 = vld [vmem:[%s5779_s29 + $0xc0] sm:$0xff] }
  0x1f   : > { %224 = vst [vmem:[%s5784_s30 + $0xb0] sm:$0xff] %v223_v22  ;;  %226 = vst [vmem:[%s5784_s30 + $0xb8] sm:$0xff] %v225_v23  ;;  %v229_v25 = vld [vmem:[%s5779_s29 + $0xc8] sm:$0xff]  ;;  %v231_v26 = vld [vmem:[%s5779_s29 + $0xd0] sm:$0xff] }
  0x20   : > { %228 = vst [vmem:[%s5784_s30 + $0xc0] sm:$0xff] %v227_v24  ;;  %230 = vst [vmem:[%s5784_s30 + $0xc8] sm:$0xff] %v229_v25  ;;  %v233_v27 = vld [vmem:[%s5779_s29 + $0xd8] sm:$0xff]  ;;  %v235_v28 = vld [vmem:[%s5779_s29 + $0x540] sm:$0xff] }
  0x21   : > { %232 = vst [vmem:[%s5784_s30 + $0xd0] sm:$0xff] %v231_v26  ;;  %v237_v29 = vld [vmem:[%s5779_s29 + $0x548] sm:$0xff]  ;;  %234 = vst [vmem:[%s5784_s30 + $0xd8] sm:$0xff] %v233_v27  ;;  %v239_v30 = vld [vmem:[%s5779_s29 + $0x550] sm:$0xff] }
  0x22   : > { %236 = vst [vmem:[%s5784_s30 + $0xe0] sm:$0xff] %v235_v28  ;;  %238 = vst [vmem:[%s5784_s30 + $0xe8] sm:$0xff] %v237_v29  ;;  %v241_v31 = vld [vmem:[%s5779_s29 + $0x558] sm:$0xff]  ;;  %v243_v32 = vld [vmem:[%s5779_s29 + $0x560] sm:$0xff] }
  0x23   : > { %240 = vst [vmem:[%s5784_s30 + $0xf0] sm:$0xff] %v239_v30  ;;  %242 = vst [vmem:[%s5784_s30 + $0xf8] sm:$0xff] %v241_v31  ;;  %v245_v33 = vld [vmem:[%s5779_s29 + $0x568] sm:$0xff]  ;;  %v247_v34 = vld [vmem:[%s5779_s29 + $0x570] sm:$0xff] }
  0x24   : > { %244 = vst [vmem:[%s5784_s30 + $0x100] sm:$0xff] %v243_v32  ;;  %v249_v35 = vld [vmem:[%s5779_s29 + $0x578] sm:$0xff]  ;;  %246 = vst [vmem:[%s5784_s30 + $0x108] sm:$0xff] %v245_v33  ;;  %v251_v36 = vld [vmem:[%s5779_s29 + $0x580] sm:$0xff] }
  0x25   : > { %248 = vst [vmem:[%s5784_s30 + $0x110] sm:$0xff] %v247_v34  ;;  %250 = vst [vmem:[%s5784_s30 + $0x118] sm:$0xff] %v249_v35  ;;  %v253_v37 = vld [vmem:[%s5779_s29 + $0x588] sm:$0xff]  ;;  %v255_v38 = vld [vmem:[%s5779_s29 + $0x590] sm:$0xff] }
  0x26   : > { %252 = vst [vmem:[%s5784_s30 + $0x120] sm:$0xff] %v251_v36  ;;  %254 = vst [vmem:[%s5784_s30 + $0x128] sm:$0xff] %v253_v37  ;;  %v257_v39 = vld [vmem:[%s5779_s29 + $0x598] sm:$0xff]  ;;  %v259_v40 = vld [vmem:[%s5779_s29 + $0x5a0] sm:$0xff] }
  0x27   : > { %256 = vst [vmem:[%s5784_s30 + $0x130] sm:$0xff] %v255_v38  ;;  %v261_v41 = vld [vmem:[%s5779_s29 + $0x5a8] sm:$0xff]  ;;  %258 = vst [vmem:[%s5784_s30 + $0x138] sm:$0xff] %v257_v39  ;;  %v263_v42 = vld [vmem:[%s5779_s29 + $0x5b0] sm:$0xff] }
  0x28   : > { %260 = vst [vmem:[%s5784_s30 + $0x140] sm:$0xff] %v259_v40  ;;  %262 = vst [vmem:[%s5784_s30 + $0x148] sm:$0xff] %v261_v41  ;;  %v265_v43 = vld [vmem:[%s5779_s29 + $0x5b8] sm:$0xff]  ;;  %v267_v44 = vld [vmem:[%s5779_s29 + $0x5c0] sm:$0xff] }
  0x29   : > { %264 = vst [vmem:[%s5784_s30 + $0x150] sm:$0xff] %v263_v42  ;;  %266 = vst [vmem:[%s5784_s30 + $0x158] sm:$0xff] %v265_v43  ;;  %v269_v45 = vld [vmem:[%s5779_s29 + $0x5c8] sm:$0xff]  ;;  %v271_v46 = vld [vmem:[%s5779_s29 + $0x5d0] sm:$0xff] }
  0x2a   : > { %268 = vst [vmem:[%s5784_s30 + $0x160] sm:$0xff] %v267_v44  ;;  %v273_v47 = vld [vmem:[%s5779_s29 + $0x5d8] sm:$0xff]  ;;  %270 = vst [vmem:[%s5784_s30 + $0x168] sm:$0xff] %v269_v45  ;;  %v275_v48 = vld [vmem:[%s5779_s29 + $0x5e0] sm:$0xff] }
  0x2b   : > { %272 = vst [vmem:[%s5784_s30 + $0x170] sm:$0xff] %v271_v46  ;;  %274 = vst [vmem:[%s5784_s30 + $0x178] sm:$0xff] %v273_v47  ;;  %v277_v49 = vld [vmem:[%s5779_s29 + $0x5e8] sm:$0xff]  ;;  %v279_v50 = vld [vmem:[%s5779_s29 + $0x5f0] sm:$0xff] }
  0x2c   : > { %276 = vst [vmem:[%s5784_s30 + $0x180] sm:$0xff] %v275_v48  ;;  %278 = vst [vmem:[%s5784_s30 + $0x188] sm:$0xff] %v277_v49  ;;  %v281_v51 = vld [vmem:[%s5779_s29 + $0x5f8] sm:$0xff]  ;;  %v283_v52 = vld [vmem:[%s5779_s29 + $0x600] sm:$0xff] }
  0x2d   : > { %280 = vst [vmem:[%s5784_s30 + $0x190] sm:$0xff] %v279_v50  ;;  %v285_v53 = vld [vmem:[%s5779_s29 + $0x608] sm:$0xff]  ;;  %282 = vst [vmem:[%s5784_s30 + $0x198] sm:$0xff] %v281_v51  ;;  %v287_v54 = vld [vmem:[%s5779_s29 + $0x610] sm:$0xff] }
  0x2e   : > { %284 = vst [vmem:[%s5784_s30 + $0x1a0] sm:$0xff] %v283_v52  ;;  %286 = vst [vmem:[%s5784_s30 + $0x1a8] sm:$0xff] %v285_v53  ;;  %v289_v55 = vld [vmem:[%s5779_s29 + $0x618] sm:$0xff]  ;;  %v291_v56 = vld [vmem:[%s5779_s29 + $0xa80] sm:$0xff] }
  0x2f   : > { %288 = vst [vmem:[%s5784_s30 + $0x1b0] sm:$0xff] %v287_v54  ;;  %290 = vst [vmem:[%s5784_s30 + $0x1b8] sm:$0xff] %v289_v55  ;;  %v293_v57 = vld [vmem:[%s5779_s29 + $0xa88] sm:$0xff]  ;;  %v295_v58 = vld [vmem:[%s5779_s29 + $0xa90] sm:$0xff] }
  0x30   : > { %292 = vst [vmem:[%s5784_s30 + $0x1c0] sm:$0xff] %v291_v56  ;;  %v297_v59 = vld [vmem:[%s5779_s29 + $0xa98] sm:$0xff]  ;;  %294 = vst [vmem:[%s5784_s30 + $0x1c8] sm:$0xff] %v293_v57  ;;  %v299_v60 = vld [vmem:[%s5779_s29 + $0xaa0] sm:$0xff] }
  0x31   : > { %296 = vst [vmem:[%s5784_s30 + $0x1d0] sm:$0xff] %v295_v58  ;;  %298 = vst [vmem:[%s5784_s30 + $0x1d8] sm:$0xff] %v297_v59  ;;  %v301_v61 = vld [vmem:[%s5779_s29 + $0xaa8] sm:$0xff]  ;;  %v303_v62 = vld [vmem:[%s5779_s29 + $0xab0] sm:$0xff] }
  0x32   : > { %300 = vst [vmem:[%s5784_s30 + $0x1e0] sm:$0xff] %v299_v60  ;;  %302 = vst [vmem:[%s5784_s30 + $0x1e8] sm:$0xff] %v301_v61  ;;  %v305_v63 = vld [vmem:[%s5779_s29 + $0xab8] sm:$0xff]  ;;  %v307_v0 = vld [vmem:[%s5779_s29 + $0xac0] sm:$0xff] }
  0x33   : > { %304 = vst [vmem:[%s5784_s30 + $0x1f0] sm:$0xff] %v303_v62  ;;  %v309_v1 = vld [vmem:[%s5779_s29 + $0xac8] sm:$0xff]  ;;  %306 = vst [vmem:[%s5784_s30 + $0x1f8] sm:$0xff] %v305_v63  ;;  %v311_v2 = vld [vmem:[%s5779_s29 + $0xad0] sm:$0xff] }
  0x34   : > { %308 = vst [vmem:[%s5784_s30 + $0x200] sm:$0xff] %v307_v0  ;;  %310 = vst [vmem:[%s5784_s30 + $0x208] sm:$0xff] %v309_v1  ;;  %v313_v3 = vld [vmem:[%s5779_s29 + $0xad8] sm:$0xff]  ;;  %v315_v4 = vld [vmem:[%s5779_s29 + $0xae0] sm:$0xff] }
  0x35   : > { %312 = vst [vmem:[%s5784_s30 + $0x210] sm:$0xff] %v311_v2  ;;  %314 = vst [vmem:[%s5784_s30 + $0x218] sm:$0xff] %v313_v3  ;;  %v317_v5 = vld [vmem:[%s5779_s29 + $0xae8] sm:$0xff]  ;;  %v319_v6 = vld [vmem:[%s5779_s29 + $0xaf0] sm:$0xff] }
  0x36   : > { %316 = vst [vmem:[%s5784_s30 + $0x220] sm:$0xff] %v315_v4  ;;  %v321_v7 = vld [vmem:[%s5779_s29 + $0xaf8] sm:$0xff]  ;;  %318 = vst [vmem:[%s5784_s30 + $0x228] sm:$0xff] %v317_v5  ;;  %v323_v8 = vld [vmem:[%s5779_s29 + $0xb00] sm:$0xff] }
  0x37   : > { %320 = vst [vmem:[%s5784_s30 + $0x230] sm:$0xff] %v319_v6  ;;  %322 = vst [vmem:[%s5784_s30 + $0x238] sm:$0xff] %v321_v7  ;;  %v325_v9 = vld [vmem:[%s5779_s29 + $0xb08] sm:$0xff]  ;;  %v327_v10 = vld [vmem:[%s5779_s29 + $0xb10] sm:$0xff] }
  0x38   : > { %324 = vst [vmem:[%s5784_s30 + $0x240] sm:$0xff] %v323_v8  ;;  %326 = vst [vmem:[%s5784_s30 + $0x248] sm:$0xff] %v325_v9  ;;  %v329_v11 = vld [vmem:[%s5779_s29 + $0xb18] sm:$0xff]  ;;  %v331_v12 = vld [vmem:[%s5779_s29 + $0xb20] sm:$0xff] }
  0x39   : > { %328 = vst [vmem:[%s5784_s30 + $0x250] sm:$0xff] %v327_v10  ;;  %v333_v13 = vld [vmem:[%s5779_s29 + $0xb28] sm:$0xff]  ;;  %330 = vst [vmem:[%s5784_s30 + $0x258] sm:$0xff] %v329_v11  ;;  %v335_v14 = vld [vmem:[%s5779_s29 + $0xb30] sm:$0xff] }
  0x3a   : > { %332 = vst [vmem:[%s5784_s30 + $0x260] sm:$0xff] %v331_v12  ;;  %334 = vst [vmem:[%s5784_s30 + $0x268] sm:$0xff] %v333_v13  ;;  %v337_v15 = vld [vmem:[%s5779_s29 + $0xb38] sm:$0xff]  ;;  %v339_v16 = vld [vmem:[%s5779_s29 + $0xb40] sm:$0xff] }
  0x3b   : > { %336 = vst [vmem:[%s5784_s30 + $0x270] sm:$0xff] %v335_v14  ;;  %338 = vst [vmem:[%s5784_s30 + $0x278] sm:$0xff] %v337_v15  ;;  %v341_v17 = vld [vmem:[%s5779_s29 + $0xb48] sm:$0xff]  ;;  %v343_v18 = vld [vmem:[%s5779_s29 + $0xb50] sm:$0xff] }
  0x3c   : > { %340 = vst [vmem:[%s5784_s30 + $0x280] sm:$0xff] %v339_v16  ;;  %v345_v19 = vld [vmem:[%s5779_s29 + $0xb58] sm:$0xff]  ;;  %342 = vst [vmem:[%s5784_s30 + $0x288] sm:$0xff] %v341_v17  ;;  %v347_v20 = vld [vmem:[%s5779_s29 + $0xfc0] sm:$0xff] }
  0x3d   : > { %344 = vst [vmem:[%s5784_s30 + $0x290] sm:$0xff] %v343_v18  ;;  %346 = vst [vmem:[%s5784_s30 + $0x298] sm:$0xff] %v345_v19  ;;  %v349_v21 = vld [vmem:[%s5779_s29 + $0xfc8] sm:$0xff]  ;;  %v351_v22 = vld [vmem:[%s5779_s29 + $0xfd0] sm:$0xff] }
  0x3e   : > { %348 = vst [vmem:[%s5784_s30 + $0x2a0] sm:$0xff] %v347_v20  ;;  %350 = vst [vmem:[%s5784_s30 + $0x2a8] sm:$0xff] %v349_v21  ;;  %v353_v23 = vld [vmem:[%s5779_s29 + $0xfd8] sm:$0xff]  ;;  %v355_v24 = vld [vmem:[%s5779_s29 + $0xfe0] sm:$0xff] }
  0x3f   : > { %352 = vst [vmem:[%s5784_s30 + $0x2b0] sm:$0xff] %v351_v22  ;;  %v357_v25 = vld [vmem:[%s5779_s29 + $0xfe8] sm:$0xff]  ;;  %354 = vst [vmem:[%s5784_s30 + $0x2b8] sm:$0xff] %v353_v23  ;;  %v359_v26 = vld [vmem:[%s5779_s29 + $0xff0] sm:$0xff] }
  0x40   : > { %356 = vst [vmem:[%s5784_s30 + $0x2c0] sm:$0xff] %v355_v24  ;;  %358 = vst [vmem:[%s5784_s30 + $0x2c8] sm:$0xff] %v357_v25  ;;  %v361_v27 = vld [vmem:[%s5779_s29 + $0xff8] sm:$0xff]  ;;  %v363_v28 = vld [vmem:[%s5779_s29 + $0x1000] sm:$0xff] }
  0x41   : > { %360 = vst [vmem:[%s5784_s30 + $0x2d0] sm:$0xff] %v359_v26  ;;  %362 = vst [vmem:[%s5784_s30 + $0x2d8] sm:$0xff] %v361_v27  ;;  %v365_v29 = vld [vmem:[%s5779_s29 + $0x1008] sm:$0xff]  ;;  %v367_v30 = vld [vmem:[%s5779_s29 + $0x1010] sm:$0xff] }
  0x42   : > { %364 = vst [vmem:[%s5784_s30 + $0x2e0] sm:$0xff] %v363_v28  ;;  %v369_v31 = vld [vmem:[%s5779_s29 + $0x1018] sm:$0xff]  ;;  %366 = vst [vmem:[%s5784_s30 + $0x2e8] sm:$0xff] %v365_v29  ;;  %v371_v32 = vld [vmem:[%s5779_s29 + $0x1020] sm:$0xff] }
  0x43   : > { %368 = vst [vmem:[%s5784_s30 + $0x2f0] sm:$0xff] %v367_v30  ;;  %370 = vst [vmem:[%s5784_s30 + $0x2f8] sm:$0xff] %v369_v31  ;;  %v373_v33 = vld [vmem:[%s5779_s29 + $0x1028] sm:$0xff]  ;;  %v375_v34 = vld [vmem:[%s5779_s29 + $0x1030] sm:$0xff] }
  0x44   : > { %372 = vst [vmem:[%s5784_s30 + $0x300] sm:$0xff] %v371_v32  ;;  %374 = vst [vmem:[%s5784_s30 + $0x308] sm:$0xff] %v373_v33  ;;  %v377_v35 = vld [vmem:[%s5779_s29 + $0x1038] sm:$0xff]  ;;  %v379_v36 = vld [vmem:[%s5779_s29 + $0x1040] sm:$0xff] }
  0x45   : > { %376 = vst [vmem:[%s5784_s30 + $0x310] sm:$0xff] %v375_v34  ;;  %v381_v37 = vld [vmem:[%s5779_s29 + $0x1048] sm:$0xff]  ;;  %378 = vst [vmem:[%s5784_s30 + $0x318] sm:$0xff] %v377_v35  ;;  %v383_v38 = vld [vmem:[%s5779_s29 + $0x1050] sm:$0xff] }
  0x46   : > { %380 = vst [vmem:[%s5784_s30 + $0x320] sm:$0xff] %v379_v36  ;;  %382 = vst [vmem:[%s5784_s30 + $0x328] sm:$0xff] %v381_v37  ;;  %v385_v39 = vld [vmem:[%s5779_s29 + $0x1058] sm:$0xff]  ;;  %v387_v40 = vld [vmem:[%s5779_s29 + $0x1060] sm:$0xff] }
  0x47   : > { %384 = vst [vmem:[%s5784_s30 + $0x330] sm:$0xff] %v383_v38  ;;  %386 = vst [vmem:[%s5784_s30 + $0x338] sm:$0xff] %v385_v39  ;;  %v389_v41 = vld [vmem:[%s5779_s29 + $0x1068] sm:$0xff]  ;;  %v391_v42 = vld [vmem:[%s5779_s29 + $0x1070] sm:$0xff] }
  0x48   : > { %388 = vst [vmem:[%s5784_s30 + $0x340] sm:$0xff] %v387_v40  ;;  %v393_v43 = vld [vmem:[%s5779_s29 + $0x1078] sm:$0xff]  ;;  %390 = vst [vmem:[%s5784_s30 + $0x348] sm:$0xff] %v389_v41  ;;  %v395_v44 = vld [vmem:[%s5779_s29 + $0x1080] sm:$0xff] }
  0x49   : > { %392 = vst [vmem:[%s5784_s30 + $0x350] sm:$0xff] %v391_v42  ;;  %394 = vst [vmem:[%s5784_s30 + $0x358] sm:$0xff] %v393_v43  ;;  %v397_v45 = vld [vmem:[%s5779_s29 + $0x1088] sm:$0xff]  ;;  %v399_v46 = vld [vmem:[%s5779_s29 + $0x1090] sm:$0xff] }
  0x4a   : > { %396 = vst [vmem:[%s5784_s30 + $0x360] sm:$0xff] %v395_v44  ;;  %398 = vst [vmem:[%s5784_s30 + $0x368] sm:$0xff] %v397_v45  ;;  %v401_v47 = vld [vmem:[%s5779_s29 + $0x1098] sm:$0xff]  ;;  %v403_v48 = vld [vmem:[%s5779_s29 + $0x1500] sm:$0xff] }
  0x4b   : > { %400 = vst [vmem:[%s5784_s30 + $0x370] sm:$0xff] %v399_v46  ;;  %v405_v49 = vld [vmem:[%s5779_s29 + $0x1508] sm:$0xff]  ;;  %402 = vst [vmem:[%s5784_s30 + $0x378] sm:$0xff] %v401_v47  ;;  %v407_v50 = vld [vmem:[%s5779_s29 + $0x1510] sm:$0xff] }
  0x4c   : > { %404 = vst [vmem:[%s5784_s30 + $0x380] sm:$0xff] %v403_v48  ;;  %406 = vst [vmem:[%s5784_s30 + $0x388] sm:$0xff] %v405_v49  ;;  %v409_v51 = vld [vmem:[%s5779_s29 + $0x1518] sm:$0xff]  ;;  %v411_v52 = vld [vmem:[%s5779_s29 + $0x1520] sm:$0xff] }
  0x4d   : > { %408 = vst [vmem:[%s5784_s30 + $0x390] sm:$0xff] %v407_v50  ;;  %410 = vst [vmem:[%s5784_s30 + $0x398] sm:$0xff] %v409_v51  ;;  %v413_v53 = vld [vmem:[%s5779_s29 + $0x1528] sm:$0xff]  ;;  %v415_v54 = vld [vmem:[%s5779_s29 + $0x1530] sm:$0xff] }
  0x4e   : > { %412 = vst [vmem:[%s5784_s30 + $0x3a0] sm:$0xff] %v411_v52  ;;  %v417_v55 = vld [vmem:[%s5779_s29 + $0x1538] sm:$0xff]  ;;  %414 = vst [vmem:[%s5784_s30 + $0x3a8] sm:$0xff] %v413_v53  ;;  %v419_v56 = vld [vmem:[%s5779_s29 + $0x1540] sm:$0xff] }
  0x4f   : > { %416 = vst [vmem:[%s5784_s30 + $0x3b0] sm:$0xff] %v415_v54  ;;  %418 = vst [vmem:[%s5784_s30 + $0x3b8] sm:$0xff] %v417_v55  ;;  %v421_v57 = vld [vmem:[%s5779_s29 + $0x1548] sm:$0xff]  ;;  %v423_v58 = vld [vmem:[%s5779_s29 + $0x1550] sm:$0xff] }
  0x50   : > { %420 = vst [vmem:[%s5784_s30 + $0x3c0] sm:$0xff] %v419_v56  ;;  %422 = vst [vmem:[%s5784_s30 + $0x3c8] sm:$0xff] %v421_v57  ;;  %v425_v59 = vld [vmem:[%s5779_s29 + $0x1558] sm:$0xff]  ;;  %v427_v60 = vld [vmem:[%s5779_s29 + $0x1560] sm:$0xff] }
  0x51   : > { %424 = vst [vmem:[%s5784_s30 + $0x3d0] sm:$0xff] %v423_v58  ;;  %v429_v61 = vld [vmem:[%s5779_s29 + $0x1568] sm:$0xff]  ;;  %426 = vst [vmem:[%s5784_s30 + $0x3d8] sm:$0xff] %v425_v59  ;;  %v431_v62 = vld [vmem:[%s5779_s29 + $0x1570] sm:$0xff] }
  0x52   : > { %428 = vst [vmem:[%s5784_s30 + $0x3e0] sm:$0xff] %v427_v60  ;;  %430 = vst [vmem:[%s5784_s30 + $0x3e8] sm:$0xff] %v429_v61  ;;  %v433_v63 = vld [vmem:[%s5779_s29 + $0x1578] sm:$0xff]  ;;  %v435_v0 = vld [vmem:[%s5779_s29 + $0x1580] sm:$0xff] }
  0x53   : > { %432 = vst [vmem:[%s5784_s30 + $0x3f0] sm:$0xff] %v431_v62  ;;  %434 = vst [vmem:[%s5784_s30 + $0x3f8] sm:$0xff] %v433_v63  ;;  %v437_v1 = vld [vmem:[%s5779_s29 + $0x1588] sm:$0xff]  ;;  %v439_v2 = vld [vmem:[%s5779_s29 + $0x1590] sm:$0xff] }
  0x54   : > { %436 = vst [vmem:[%s5784_s30 + $0x400] sm:$0xff] %v435_v0  ;;  %v441_v3 = vld [vmem:[%s5779_s29 + $0x1598] sm:$0xff]  ;;  %438 = vst [vmem:[%s5784_s30 + $0x408] sm:$0xff] %v437_v1  ;;  %v443_v4 = vld [vmem:[%s5779_s29 + $0x15a0] sm:$0xff] }
  0x55   : > { %440 = vst [vmem:[%s5784_s30 + $0x410] sm:$0xff] %v439_v2  ;;  %442 = vst [vmem:[%s5784_s30 + $0x418] sm:$0xff] %v441_v3  ;;  %v445_v5 = vld [vmem:[%s5779_s29 + $0x15a8] sm:$0xff]  ;;  %v447_v6 = vld [vmem:[%s5779_s29 + $0x15b0] sm:$0xff] }
  0x56   : > { %444 = vst [vmem:[%s5784_s30 + $0x420] sm:$0xff] %v443_v4  ;;  %446 = vst [vmem:[%s5784_s30 + $0x428] sm:$0xff] %v445_v5  ;;  %v449_v7 = vld [vmem:[%s5779_s29 + $0x15b8] sm:$0xff]  ;;  %v451_v8 = vld [vmem:[%s5779_s29 + $0x15c0] sm:$0xff] }
  0x57   : > { %448 = vst [vmem:[%s5784_s30 + $0x430] sm:$0xff] %v447_v6  ;;  %v453_v9 = vld [vmem:[%s5779_s29 + $0x15c8] sm:$0xff]  ;;  %450 = vst [vmem:[%s5784_s30 + $0x438] sm:$0xff] %v449_v7  ;;  %v455_v10 = vld [vmem:[%s5779_s29 + $0x15d0] sm:$0xff] }
  0x58   : > { %452 = vst [vmem:[%s5784_s30 + $0x440] sm:$0xff] %v451_v8  ;;  %454 = vst [vmem:[%s5784_s30 + $0x448] sm:$0xff] %v453_v9  ;;  %v457_v11 = vld [vmem:[%s5779_s29 + $0x15d8] sm:$0xff]  ;;  %v459_v12 = vld [vmem:[%s5779_s29 + $0x1a40] sm:$0xff] }
  0x59   : > { %456 = vst [vmem:[%s5784_s30 + $0x450] sm:$0xff] %v455_v10  ;;  %458 = vst [vmem:[%s5784_s30 + $0x458] sm:$0xff] %v457_v11  ;;  %v461_v13 = vld [vmem:[%s5779_s29 + $0x1a48] sm:$0xff]  ;;  %v463_v14 = vld [vmem:[%s5779_s29 + $0x1a50] sm:$0xff] }
  0x5a   : > { %460 = vst [vmem:[%s5784_s30 + $0x460] sm:$0xff] %v459_v12  ;;  %v465_v15 = vld [vmem:[%s5779_s29 + $0x1a58] sm:$0xff]  ;;  %462 = vst [vmem:[%s5784_s30 + $0x468] sm:$0xff] %v461_v13  ;;  %v467_v16 = vld [vmem:[%s5779_s29 + $0x1a60] sm:$0xff] }
  0x5b   : > { %464 = vst [vmem:[%s5784_s30 + $0x470] sm:$0xff] %v463_v14  ;;  %466 = vst [vmem:[%s5784_s30 + $0x478] sm:$0xff] %v465_v15  ;;  %v469_v17 = vld [vmem:[%s5779_s29 + $0x1a68] sm:$0xff]  ;;  %v471_v18 = vld [vmem:[%s5779_s29 + $0x1a70] sm:$0xff] }
  0x5c   : > { %468 = vst [vmem:[%s5784_s30 + $0x480] sm:$0xff] %v467_v16  ;;  %470 = vst [vmem:[%s5784_s30 + $0x488] sm:$0xff] %v469_v17  ;;  %v473_v19 = vld [vmem:[%s5779_s29 + $0x1a78] sm:$0xff]  ;;  %v475_v20 = vld [vmem:[%s5779_s29 + $0x1a80] sm:$0xff] }
  0x5d   : > { %472 = vst [vmem:[%s5784_s30 + $0x490] sm:$0xff] %v471_v18  ;;  %v477_v21 = vld [vmem:[%s5779_s29 + $0x1a88] sm:$0xff]  ;;  %474 = vst [vmem:[%s5784_s30 + $0x498] sm:$0xff] %v473_v19  ;;  %v479_v22 = vld [vmem:[%s5779_s29 + $0x1a90] sm:$0xff] }
  0x5e   : > { %476 = vst [vmem:[%s5784_s30 + $0x4a0] sm:$0xff] %v475_v20  ;;  %478 = vst [vmem:[%s5784_s30 + $0x4a8] sm:$0xff] %v477_v21  ;;  %v481_v23 = vld [vmem:[%s5779_s29 + $0x1a98] sm:$0xff]  ;;  %v483_v24 = vld [vmem:[%s5779_s29 + $0x1aa0] sm:$0xff] }
  0x5f   : > { %480 = vst [vmem:[%s5784_s30 + $0x4b0] sm:$0xff] %v479_v22  ;;  %482 = vst [vmem:[%s5784_s30 + $0x4b8] sm:$0xff] %v481_v23  ;;  %v485_v25 = vld [vmem:[%s5779_s29 + $0x1aa8] sm:$0xff]  ;;  %v487_v26 = vld [vmem:[%s5779_s29 + $0x1ab0] sm:$0xff] }
  0x60   : > { %484 = vst [vmem:[%s5784_s30 + $0x4c0] sm:$0xff] %v483_v24  ;;  %v489_v27 = vld [vmem:[%s5779_s29 + $0x1ab8] sm:$0xff]  ;;  %486 = vst [vmem:[%s5784_s30 + $0x4c8] sm:$0xff] %v485_v25  ;;  %v491_v28 = vld [vmem:[%s5779_s29 + $0x1ac0] sm:$0xff] }
  0x61   : > { %488 = vst [vmem:[%s5784_s30 + $0x4d0] sm:$0xff] %v487_v26  ;;  %490 = vst [vmem:[%s5784_s30 + $0x4d8] sm:$0xff] %v489_v27  ;;  %v493_v29 = vld [vmem:[%s5779_s29 + $0x1ac8] sm:$0xff]  ;;  %v495_v30 = vld [vmem:[%s5779_s29 + $0x1ad0] sm:$0xff] }
  0x62   : > { %492 = vst [vmem:[%s5784_s30 + $0x4e0] sm:$0xff] %v491_v28  ;;  %494 = vst [vmem:[%s5784_s30 + $0x4e8] sm:$0xff] %v493_v29  ;;  %v497_v31 = vld [vmem:[%s5779_s29 + $0x1ad8] sm:$0xff]  ;;  %v499_v32 = vld [vmem:[%s5779_s29 + $0x1ae0] sm:$0xff] }
  0x63   : > { %496 = vst [vmem:[%s5784_s30 + $0x4f0] sm:$0xff] %v495_v30  ;;  %v501_v33 = vld [vmem:[%s5779_s29 + $0x1ae8] sm:$0xff]  ;;  %498 = vst [vmem:[%s5784_s30 + $0x4f8] sm:$0xff] %v497_v31  ;;  %v503_v34 = vld [vmem:[%s5779_s29 + $0x1af0] sm:$0xff] }
  0x64   : > { %500 = vst [vmem:[%s5784_s30 + $0x500] sm:$0xff] %v499_v32  ;;  %502 = vst [vmem:[%s5784_s30 + $0x508] sm:$0xff] %v501_v33  ;;  %v505_v35 = vld [vmem:[%s5779_s29 + $0x1af8] sm:$0xff]  ;;  %v507_v36 = vld [vmem:[%s5779_s29 + $0x1b00] sm:$0xff] }
  0x65   : > { %504 = vst [vmem:[%s5784_s30 + $0x510] sm:$0xff] %v503_v34  ;;  %506 = vst [vmem:[%s5784_s30 + $0x518] sm:$0xff] %v505_v35  ;;  %v509_v37 = vld [vmem:[%s5779_s29 + $0x1b08] sm:$0xff]  ;;  %v511_v38 = vld [vmem:[%s5779_s29 + $0x1b10] sm:$0xff] }
  0x66   : > { %508 = vst [vmem:[%s5784_s30 + $0x520] sm:$0xff] %v507_v36  ;;  %v513_v39 = vld [vmem:[%s5779_s29 + $0x1b18] sm:$0xff]  ;;  %510 = vst [vmem:[%s5784_s30 + $0x528] sm:$0xff] %v509_v37  ;;  %v515_v40 = vld [vmem:[%s5779_s29 + $0x1f80] sm:$0xff] }
  0x67   : > { %512 = vst [vmem:[%s5784_s30 + $0x530] sm:$0xff] %v511_v38  ;;  %514 = vst [vmem:[%s5784_s30 + $0x538] sm:$0xff] %v513_v39  ;;  %v517_v41 = vld [vmem:[%s5779_s29 + $0x1f88] sm:$0xff]  ;;  %v519_v42 = vld [vmem:[%s5779_s29 + $0x1f90] sm:$0xff] }
  0x68   : > { %516 = vst [vmem:[%s5784_s30 + $0x540] sm:$0xff] %v515_v40  ;;  %518 = vst [vmem:[%s5784_s30 + $0x548] sm:$0xff] %v517_v41  ;;  %v521_v43 = vld [vmem:[%s5779_s29 + $0x1f98] sm:$0xff]  ;;  %v523_v44 = vld [vmem:[%s5779_s29 + $0x1fa0] sm:$0xff] }
  0x69   : > { %520 = vst [vmem:[%s5784_s30 + $0x550] sm:$0xff] %v519_v42  ;;  %v525_v45 = vld [vmem:[%s5779_s29 + $0x1fa8] sm:$0xff]  ;;  %522 = vst [vmem:[%s5784_s30 + $0x558] sm:$0xff] %v521_v43  ;;  %v527_v46 = vld [vmem:[%s5779_s29 + $0x1fb0] sm:$0xff] }
  0x6a   : > { %524 = vst [vmem:[%s5784_s30 + $0x560] sm:$0xff] %v523_v44  ;;  %526 = vst [vmem:[%s5784_s30 + $0x568] sm:$0xff] %v525_v45  ;;  %v529_v47 = vld [vmem:[%s5779_s29 + $0x1fb8] sm:$0xff]  ;;  %v531_v48 = vld [vmem:[%s5779_s29 + $0x1fc0] sm:$0xff] }
  0x6b   : > { %528 = vst [vmem:[%s5784_s30 + $0x570] sm:$0xff] %v527_v46  ;;  %530 = vst [vmem:[%s5784_s30 + $0x578] sm:$0xff] %v529_v47  ;;  %v533_v49 = vld [vmem:[%s5779_s29 + $0x1fc8] sm:$0xff]  ;;  %v535_v50 = vld [vmem:[%s5779_s29 + $0x1fd0] sm:$0xff] }
  0x6c   : > { %532 = vst [vmem:[%s5784_s30 + $0x580] sm:$0xff] %v531_v48  ;;  %v537_v51 = vld [vmem:[%s5779_s29 + $0x1fd8] sm:$0xff]  ;;  %534 = vst [vmem:[%s5784_s30 + $0x588] sm:$0xff] %v533_v49  ;;  %v539_v52 = vld [vmem:[%s5779_s29 + $0x1fe0] sm:$0xff] }
  0x6d   : > { %536 = vst [vmem:[%s5784_s30 + $0x590] sm:$0xff] %v535_v50  ;;  %538 = vst [vmem:[%s5784_s30 + $0x598] sm:$0xff] %v537_v51  ;;  %v541_v53 = vld [vmem:[%s5779_s29 + $0x1fe8] sm:$0xff]  ;;  %v543_v54 = vld [vmem:[%s5779_s29 + $0x1ff0] sm:$0xff] }
  0x6e   : > { %540 = vst [vmem:[%s5784_s30 + $0x5a0] sm:$0xff] %v539_v52  ;;  %542 = vst [vmem:[%s5784_s30 + $0x5a8] sm:$0xff] %v541_v53  ;;  %v545_v55 = vld [vmem:[%s5779_s29 + $0x1ff8] sm:$0xff]  ;;  %v547_v56 = vld [vmem:[%s5779_s29 + $0x2000] sm:$0xff] }
  0x6f   : > { %544 = vst [vmem:[%s5784_s30 + $0x5b0] sm:$0xff] %v543_v54  ;;  %v549_v57 = vld [vmem:[%s5779_s29 + $0x2008] sm:$0xff]  ;;  %546 = vst [vmem:[%s5784_s30 + $0x5b8] sm:$0xff] %v545_v55  ;;  %v551_v58 = vld [vmem:[%s5779_s29 + $0x2010] sm:$0xff] }
  0x70   : > { %548 = vst [vmem:[%s5784_s30 + $0x5c0] sm:$0xff] %v547_v56  ;;  %550 = vst [vmem:[%s5784_s30 + $0x5c8] sm:$0xff] %v549_v57  ;;  %v553_v59 = vld [vmem:[%s5779_s29 + $0x2018] sm:$0xff]  ;;  %v555_v60 = vld [vmem:[%s5779_s29 + $0x2020] sm:$0xff] }
  0x71   : > { %552 = vst [vmem:[%s5784_s30 + $0x5d0] sm:$0xff] %v551_v58  ;;  %554 = vst [vmem:[%s5784_s30 + $0x5d8] sm:$0xff] %v553_v59  ;;  %v557_v61 = vld [vmem:[%s5779_s29 + $0x2028] sm:$0xff]  ;;  %v559_v62 = vld [vmem:[%s5779_s29 + $0x2030] sm:$0xff] }
  0x72   : > { %556 = vst [vmem:[%s5784_s30 + $0x5e0] sm:$0xff] %v555_v60  ;;  %v561_v63 = vld [vmem:[%s5779_s29 + $0x2038] sm:$0xff]  ;;  %558 = vst [vmem:[%s5784_s30 + $0x5e8] sm:$0xff] %v557_v61  ;;  %v563_v0 = vld [vmem:[%s5779_s29 + $0x2040] sm:$0xff] }
  0x73   : > { %560 = vst [vmem:[%s5784_s30 + $0x5f0] sm:$0xff] %v559_v62  ;;  %562 = vst [vmem:[%s5784_s30 + $0x5f8] sm:$0xff] %v561_v63  ;;  %v565_v1 = vld [vmem:[%s5779_s29 + $0x2048] sm:$0xff]  ;;  %v567_v2 = vld [vmem:[%s5779_s29 + $0x2050] sm:$0xff] }
  0x74   : > { %564 = vst [vmem:[%s5784_s30 + $0x600] sm:$0xff] %v563_v0  ;;  %566 = vst [vmem:[%s5784_s30 + $0x608] sm:$0xff] %v565_v1  ;;  %v569_v3 = vld [vmem:[%s5779_s29 + $0x2058] sm:$0xff] }
  0x75   : > { %568 = vst [vmem:[%s5784_s30 + $0x610] sm:$0xff] %v567_v2  ;;  %570 = vst [vmem:[%s5784_s30 + $0x618] sm:$0xff] %v569_v3 }
  0x76 PF: > { %p4550_p7 = scmp.ge.s32.totalorder %s5645_s17, 1  ;;  %p591_p8 = scmp.lt.s32.totalorder %s5645_s17, 7 }
  0x78   : > { %p592_p9 = pnand %p4550_p7, %p591_p8 }
  0x79   : > { %s598_s5 = sand.u32 (!%p592_p9), 1, %s5637_s15   ;;  %s6365_s20 = smul.u32 (!%p592_p9), 28, %s5754_s18 }
  0x7a   : > { %595 = sbr.rel (%p592_p9) target bundleno = 875 (0x36b), region = 55 }
  0x7b   : > { %s5399_s8 = smul.u32 (!%p592_p9), 1568, %s598_s5  ;;  %p632_p10 = scmp.lt.s32.totalorder (!%p592_p9), %s6365_s20, 167 }
  0x7c   : > { %s6430_s7 = smul.u32 (!%p592_p9), 448, %s598_s5 }
  0x7d   : > { %s6189_s9 = scalar_lea.vmem (!%p592_p9), [#allocation2], %s5399_s8 }
  0x7e   : > { %s6449_s15 = scalar_lea.vmem (!%p592_p9), [#allocation3], %s6430_s7  }
  0x7f   : > { %v6181_v4 = vld [vmem:[%s7134_s0 + $0x8] sm:$0xff]  ;;  %vm2414_vm0 = vcmask 785408   ;;  %v733_v6 = vld [vmem:[%s6189_s9 + $0x2b8] sm:$0xff]  ;;  %v730_v7 = vld [vmem:[%s6189_s9 + $0x2a0] sm:$0xff]  ;;  %s633_s25 = scalar_select %p632_p10, %s6365_s20, 167 }
  0x80   : > { %4551 = vmatprep.mubr.msk.f32.mxu0 %vm2414_vm0, %v6181_v4  ;;  %4553 = vmatprep.mubr.msk.f32.mxu1 %vm2414_vm0, %v6181_v4  ;;  %v731_v5 = vld [vmem:[%s6189_s9 + $0x2a8] sm:$0xff]  ;;  %v4670_v10 = vunpack.c.h.s8.bf16 %v733_v6  ;;  %v4674_v11 = vunpack.c.l.s8.bf16 %v733_v6  ;;  %v732_v12 = vld [vmem:[%s6189_s9 + $0x2b0] sm:$0xff]  ;;  %v4616_v13 = vunpack.c.h.s8.bf16 %v730_v7  ;;  %v705_v16 = vld [vmem:[%s6189_s9 + $0x1d8] sm:$0xff]  ;;  %v4620_v17 = vunpack.c.l.s8.bf16 %v730_v7  ;;  %s4609_s14 = smul.u32 (%p5769_p5), 224, %s5754_s18 }
  0x81   : > { %v4614_v8 = vunpack.c.h.s8.bf16 %v731_v5  ;;  %v4618_v9 = vunpack.c.l.s8.bf16 %v731_v5  ;;  %v4672_v14 = vunpack.c.h.s8.bf16 %v732_v12  ;;  %v703_v15 = vld [vmem:[%s6189_s9 + $0x1c8] sm:$0xff]  ;;  %v4676_v18 = vunpack.c.l.s8.bf16 %v732_v12  ;;  %v702_v21 = vld [vmem:[%s6189_s9 + $0x1c0] sm:$0xff]  ;;  %v704_v22 = vld [vmem:[%s6189_s9 + $0x1d0] sm:$0xff]  ;;  %s6395_s28 = scalar_lea.vmem %s7136_s2, %s633_s25  ;;  %s6402_s6 = scalar_lea.vmem %s7137_s3, %s633_s25 }
  0x82   : > { %4671 = vmatprep.subr.bf16.mxu1 %v4670_v10  ;;  %v4622_v19 = vunpack.c.h.s8.bf16 %v703_v15  ;;  %v4678_v20 = vunpack.c.h.s8.bf16 %v705_v16  ;;  %v4624_v23 = vunpack.c.h.s8.bf16 %v702_v21  ;;  %v4680_v24 = vunpack.c.h.s8.bf16 %v704_v22  ;;  %v675_v27 = vld [vmem:[%s6189_s9 + $0xe8] sm:$0xff]  ;;  %v677_v28 = vld [vmem:[%s6189_s9 + $0xf8] sm:$0xff]  ;;  %v674_v33 = vld [vmem:[%s6189_s9 + $0xe0] sm:$0xff]  ;;  %s6719_s24 = scalar_lea.vmem (%p5769_p5), %s7138_s4, %s4609_s14  }
  0x83   : > { %4615 = vmatprep.subr.bf16.mxu0 %v4614_v8  ;;  %4673 = vmatpush1.bf16.msra.mxu1 %v4672_v14  ;;  %v4626_v25 = vunpack.c.l.s8.bf16 %v703_v15  ;;  %v4682_v26 = vunpack.c.l.s8.bf16 %v705_v16  ;;  %v4628_v29 = vunpack.c.l.s8.bf16 %v702_v21  ;;  %v4684_v30 = vunpack.c.l.s8.bf16 %v704_v22  ;;  %v676_v34 = vld [vmem:[%s6189_s9 + $0xf0] sm:$0xff]  ;;  %v647_v39 = vld [vmem:[%s6189_s9 + $0x8] sm:$0xff]  ;;  %v649_v40 = vld [vmem:[%s6189_s9 + $0x18] sm:$0xff] }
  0x84   : > { %4617 = vmatpush1.bf16.msra.mxu0 %v4616_v13  ;;  %4675 = vmatprep.subr.bf16.mxu1 %v4674_v11  ;;  %v4630_v31 = vunpack.c.h.s8.bf16 %v675_v27  ;;  %v4686_v32 = vunpack.c.h.s8.bf16 %v677_v28  ;;  %v4632_v35 = vunpack.c.h.s8.bf16 %v674_v33  ;;  %v4688_v36 = vunpack.c.h.s8.bf16 %v676_v34  ;;  %v646_v45 = vld [vmem:[%s6189_s9] sm:$0xff]  ;;  %v648_v46 = vld [vmem:[%s6189_s9 + $0x10] sm:$0xff]  ;;  %v815_v51 = vld [vmem:[%s6189_s9 + $0x548] sm:$0xff] }
  0x85   : > { %4619 = vmatprep.subr.bf16.mxu0 %v4618_v9  ;;  %v4634_v37 = vunpack.c.l.s8.bf16 %v675_v27  ;;  %v4690_v38 = vunpack.c.l.s8.bf16 %v677_v28  ;;  %v4636_v41 = vunpack.c.l.s8.bf16 %v674_v33  ;;  %v4692_v42 = vunpack.c.l.s8.bf16 %v676_v34  ;;  %v817_v52 = vld [vmem:[%s6189_s9 + $0x558] sm:$0xff]  ;;  %v814_v57 = vld [vmem:[%s6189_s9 + $0x540] sm:$0xff]  ;;  %v816_v58 = vld [vmem:[%s6189_s9 + $0x550] sm:$0xff] }
  0x86   : > { %v4638_v43 = vunpack.c.h.s8.bf16 %v647_v39  ;;  %v4694_v44 = vunpack.c.h.s8.bf16 %v649_v40  ;;  %v4640_v47 = vunpack.c.h.s8.bf16 %v646_v45  ;;  %v4696_v48 = vunpack.c.h.s8.bf16 %v648_v46  ;;  %v787_v63 = vld [vmem:[%s6189_s9 + $0x468] sm:$0xff]  ;;  %v789_v0 = vld [vmem:[%s6189_s9 + $0x478] sm:$0xff]  ;;  %v786_v6 = vld [vmem:[%s6189_s9 + $0x460] sm:$0xff] }
  0x87   : > { %4677 = vmatpush1.bf16.msra.mxu1 %v4676_v18  ;;  %v4642_v49 = vunpack.c.l.s8.bf16 %v647_v39  ;;  %v4698_v50 = vunpack.c.l.s8.bf16 %v649_v40  ;;  %v4644_v53 = vunpack.c.l.s8.bf16 %v646_v45  ;;  %v4700_v54 = vunpack.c.l.s8.bf16 %v648_v46  ;;  %v788_v7 = vld [vmem:[%s6189_s9 + $0x470] sm:$0xff]  ;;  %v759_v12 = vld [vmem:[%s6189_s9 + $0x388] sm:$0xff]  ;;  %v761_v13 = vld [vmem:[%s6189_s9 + $0x398] sm:$0xff] }
  0x88   : > { %4621 = vmatpush1.bf16.msra.mxu0 %v4620_v17  ;;  %4679 = vmatprep.subr.bf16.mxu1 %v4678_v20  ;;  %v4646_v55 = vunpack.c.h.s8.bf16 %v815_v51  ;;  %v4702_v56 = vunpack.c.h.s8.bf16 %v817_v52  ;;  %v4648_v59 = vunpack.c.h.s8.bf16 %v814_v57  ;;  %v4704_v60 = vunpack.c.h.s8.bf16 %v816_v58  ;;  %v758_v18 = vld [vmem:[%s6189_s9 + $0x380] sm:$0xff]  ;;  %v6235_v39 = vld [vmem:[%s7134_s0 + $0x18] sm:$0xff]  ;;  %v708_v46 = vld [vmem:[%s6189_s9 + $0x1f0] sm:$0xff] }
  0x89   : > { %4623 = vmatprep.subr.bf16.mxu0 %v4622_v19  ;;  %v4650_v61 = vunpack.c.l.s8.bf16 %v815_v51  ;;  %v4706_v62 = vunpack.c.l.s8.bf16 %v817_v52  ;;  %v4652_v1 = vunpack.c.l.s8.bf16 %v814_v57  ;;  %v4708_v2 = vunpack.c.l.s8.bf16 %v816_v58  ;;  %v760_v19 = vld [vmem:[%s6189_s9 + $0x390] sm:$0xff]  ;;  %v706_v45 = vld [vmem:[%s6189_s9 + $0x1e0] sm:$0xff]  ;;  %v679_v51 = vld [vmem:[%s6189_s9 + $0x108] sm:$0xff] }
  0x8a   : > { %v4654_v3 = vunpack.c.h.s8.bf16 %v787_v63  ;;  %v4710_v5 = vunpack.c.h.s8.bf16 %v789_v0  ;;  %v4656_v8 = vunpack.c.h.s8.bf16 %v786_v6  ;;  %v4712_v9 = vunpack.c.h.s8.bf16 %v788_v7  ;;  %v681_v52 = vld [vmem:[%s6189_s9 + $0x118] sm:$0xff]  ;;  %v678_v57 = vld [vmem:[%s6189_s9 + $0x100] sm:$0xff]  ;;  %v680_v58 = vld [vmem:[%s6189_s9 + $0x110] sm:$0xff] }
  0x8b   : > { %4681 = vmatpush1.bf16.msra.mxu1 %v4680_v24  ;;  %v4658_v10 = vunpack.c.l.s8.bf16 %v787_v63  ;;  %v4714_v11 = vunpack.c.l.s8.bf16 %v789_v0  ;;  %v4660_v14 = vunpack.c.l.s8.bf16 %v786_v6  ;;  %v4716_v15 = vunpack.c.l.s8.bf16 %v788_v7  ;;  %v735_v24 = vld [vmem:[%s6189_s9 + $0x2c8] sm:$0xff]  ;;  %v653_v0 = vld [vmem:[%s6189_s9 + $0x38] sm:$0xff]  ;;  %v650_v6 = vld [vmem:[%s6189_s9 + $0x20] sm:$0xff] }
  0x8c   : > { %4625 = vmatpush1.bf16.msra.mxu0 %v4624_v23  ;;  %4683 = vmatprep.subr.bf16.mxu1 %v4682_v26  ;;  %v4662_v16 = vunpack.c.h.s8.bf16 %v759_v12  ;;  %v4718_v17 = vunpack.c.h.s8.bf16 %v761_v13  ;;  %v4664_v20 = vunpack.c.h.s8.bf16 %v758_v18  ;;  %v4720_v21 = vunpack.c.h.s8.bf16 %v760_v19  ;;  %v651_v63 = vld [vmem:[%s6189_s9 + $0x28] sm:$0xff]  ;;  %v652_v7 = vld [vmem:[%s6189_s9 + $0x30] sm:$0xff] }
  0x8d   : > { %4627 = vmatprep.subr.bf16.mxu0 %v4626_v25  ;;  %v4666_v22 = vunpack.c.l.s8.bf16 %v759_v12  ;;  %v4722_v23 = vunpack.c.l.s8.bf16 %v761_v13  ;;  %v737_v25 = vld [vmem:[%s6189_s9 + $0x2d8] sm:$0xff]  ;;  %v4668_v26 = vunpack.c.l.s8.bf16 %v758_v18  ;;  %v4724_v27 = vunpack.c.l.s8.bf16 %v760_v19  ;;  %v819_v12 = vld [vmem:[%s6189_s9 + $0x568] sm:$0xff]  ;;  %v818_v18 = vld [vmem:[%s6189_s9 + $0x560] sm:$0xff] }
  0x8e   : > { %v4726_v28 = vunpack.c.h.s8.bf16 %v735_v24  ;;  %v821_v13 = vld [vmem:[%s6189_s9 + $0x578] sm:$0xff]  ;;  %v820_v19 = vld [vmem:[%s6189_s9 + $0x570] sm:$0xff] }
  0x8f   : > { %4685 = vmatpush1.bf16.msra.mxu1 %v4684_v30  ;;  %v734_v30 = vld [vmem:[%s6189_s9 + $0x2c0] sm:$0xff] }
  0x90   : > { %4629 = vmatpush1.bf16.msra.mxu0 %v4628_v29  ;;  %4687 = vmatprep.subr.bf16.mxu1 %v4686_v32  ;;  %v4782_v29 = vunpack.c.h.s8.bf16 %v737_v25  ;;  %v6226_v32 = vld [vmem:[%s7134_s0] sm:$0xff]  ;;  %v4728_v33 = vunpack.c.h.s8.bf16 %v734_v30  ;;  %v4732_v40 = vunpack.c.l.s8.bf16 %v734_v30 }
  0x91   : > { %4631 = vmatprep.subr.bf16.mxu0 %v4630_v31  ;;  %v736_v31 = vld [vmem:[%s6189_s9 + $0x2d0] sm:$0xff]  ;;  %v790_v30 = vld [vmem:[%s6189_s9 + $0x480] sm:$0xff] }
  0x92   : > { %v4784_v34 = vunpack.c.h.s8.bf16 %v736_v31 }
  0x93   : > { %4689 = vmatpush1.bf16.msra.mxu1 %v4688_v36  ;;  %v4786_v36 = vunpack.c.l.s8.bf16 %v737_v25  ;;  %v793_v25 = vld [vmem:[%s6189_s9 + $0x498] sm:$0xff] }
  0x94   : > { %4633 = vmatpush1.bf16.msra.mxu0 %v4632_v35  ;;  %4691 = vmatprep.subr.bf16.mxu1 %v4690_v38  ;;  %v4730_v35 = vunpack.c.l.s8.bf16 %v735_v24  ;;  %v709_v38 = vld [vmem:[%s6189_s9 + $0x1f8] sm:$0xff]  ;;  %v791_v24 = vld [vmem:[%s6189_s9 + $0x488] sm:$0xff] }
  0x95   : > { %4635 = vmatprep.subr.bf16.mxu0 %v4634_v37  ;;  %v707_v37 = vld [vmem:[%s6189_s9 + $0x1e8] sm:$0xff] }
  0x97   : > { %4693 = vmatpush1.bf16.msra.mxu1 %v4692_v42  ;;  %v6240_v42 = vld [vmem:[%s7134_s0 + $0x10] sm:$0xff] }
  0x98   : > { %4637 = vmatpush1.bf16.msra.mxu0 %v4636_v41  ;;  %4695 = vmatprep.subr.bf16.mxu1 %v4694_v44  ;;  %v4788_v41 = vunpack.c.l.s8.bf16 %v736_v31  ;;  %v4790_v44 = vunpack.c.h.s8.bf16 %v709_v38  ;;  %v792_v31 = vld [vmem:[%s6189_s9 + $0x490] sm:$0xff] }
  0x99   : > { %4639 = vmatprep.subr.bf16.mxu0 %v4638_v43  ;;  %v4734_v43 = vunpack.c.h.s8.bf16 %v707_v37 }
  0x9b   : > { %4697 = vmatpush1.bf16.msra.mxu1 %v4696_v48  ;;  %v4792_v48 = vunpack.c.h.s8.bf16 %v708_v46 }
  0x9c   : > { %4641 = vmatpush1.bf16.msra.mxu0 %v4640_v47  ;;  %4699 = vmatprep.subr.bf16.mxu1 %v4698_v50  ;;  %v4736_v47 = vunpack.c.h.s8.bf16 %v706_v45  ;;  %v4794_v50 = vunpack.c.l.s8.bf16 %v709_v38  ;;  %v765_v38 = vld [vmem:[%s6189_s9 + $0x3b8] sm:$0xff] }
  0x9d   : > { %4643 = vmatprep.subr.bf16.mxu0 %v4642_v49  ;;  %v4738_v49 = vunpack.c.l.s8.bf16 %v707_v37  ;;  %v763_v37 = vld [vmem:[%s6189_s9 + $0x3a8] sm:$0xff] }
  0x9f   : > { %4701 = vmatpush1.bf16.msra.mxu1 %v4700_v54  ;;  %v4796_v54 = vunpack.c.l.s8.bf16 %v708_v46  ;;  %v764_v46 = vld [vmem:[%s6189_s9 + $0x3b0] sm:$0xff] }
  0xa0   : > { %4645 = vmatpush1.bf16.msra.mxu0 %v4644_v53  ;;  %4703 = vmatprep.subr.bf16.mxu1 %v4702_v56  ;;  %v4740_v53 = vunpack.c.l.s8.bf16 %v706_v45  ;;  %v4798_v56 = vunpack.c.h.s8.bf16 %v681_v52  ;;  %v762_v45 = vld [vmem:[%s6189_s9 + $0x3a0] sm:$0xff] }
  0xa1   : > { %4647 = vmatprep.subr.bf16.mxu0 %v4646_v55  ;;  %v4742_v55 = vunpack.c.h.s8.bf16 %v679_v51 }
  0xa3   : > { %4705 = vmatpush2.bf16.msra.mxu1 %v4704_v60  ;;  %v4800_v60 = vunpack.c.h.s8.bf16 %v680_v58 }
  0xa4   : > { %4649 = vmatpush2.bf16.msra.mxu0 %v4648_v59  ;;  %4707 = vmatprep.subr.bf16.mxu1 %v4706_v62  ;;  %v4744_v59 = vunpack.c.h.s8.bf16 %v678_v57  ;;  %v4802_v62 = vunpack.c.l.s8.bf16 %v681_v52  ;;  %v741_v52 = vld [vmem:[%s6189_s9 + $0x2f8] sm:$0xff] }
  0xa5   : > { %4651 = vmatprep.subr.bf16.mxu0 %v4650_v61  ;;  %v4746_v61 = vunpack.c.l.s8.bf16 %v679_v51  ;;  %v739_v51 = vld [vmem:[%s6189_s9 + $0x2e8] sm:$0xff] }
  0xa7   : > { %4709 = vmatpush2.bf16.msra.mxu1 %v4708_v2  ;;  %v4804_v2 = vunpack.c.l.s8.bf16 %v680_v58  ;;  %v740_v58 = vld [vmem:[%s6189_s9 + $0x2f0] sm:$0xff] }
  0xa8   : > { %4653 = vmatpush2.bf16.msra.mxu0 %v4652_v1  ;;  %4711 = vmatprep.subr.bf16.mxu1 %v4710_v5  ;;  %v4748_v1 = vunpack.c.l.s8.bf16 %v678_v57  ;;  %v4806_v5 = vunpack.c.h.s8.bf16 %v653_v0  ;;  %v738_v57 = vld [vmem:[%s6189_s9 + $0x2e0] sm:$0xff] }
  0xa9   : > { %4655 = vmatprep.subr.bf16.mxu0 %v4654_v3  ;;  %v4750_v3 = vunpack.c.h.s8.bf16 %v651_v63 }
  0xab   : > { %4713 = vmatpush2.bf16.msra.mxu1 %v4712_v9  ;;  %v4808_v9 = vunpack.c.h.s8.bf16 %v652_v7 }
  0xac   : > { %4657 = vmatpush2.bf16.msra.mxu0 %v4656_v8  ;;  %4715 = vmatprep.subr.bf16.mxu1 %v4714_v11  ;;  %v4752_v8 = vunpack.c.h.s8.bf16 %v650_v6  ;;  %v4810_v11 = vunpack.c.l.s8.bf16 %v653_v0  ;;  %v713_v0 = vld [vmem:[%s6189_s9 + $0x218] sm:$0xff] }
  0xad   : > { %4659 = vmatprep.subr.bf16.mxu0 %v4658_v10  ;;  %v4754_v10 = vunpack.c.l.s8.bf16 %v651_v63  ;;  %v711_v63 = vld [vmem:[%s6189_s9 + $0x208] sm:$0xff] }
  0xaf   : > { %4717 = vmatpush2.bf16.msra.mxu1 %v4716_v15  ;;  %v4812_v15 = vunpack.c.l.s8.bf16 %v652_v7  ;;  %v712_v7 = vld [vmem:[%s6189_s9 + $0x210] sm:$0xff] }
  0xb0   : > { %4661 = vmatpush2.bf16.msra.mxu0 %v4660_v14  ;;  %4719 = vmatprep.subr.bf16.mxu1 %v4718_v17  ;;  %v4756_v14 = vunpack.c.l.s8.bf16 %v650_v6  ;;  %v4814_v17 = vunpack.c.h.s8.bf16 %v821_v13  ;;  %v710_v6 = vld [vmem:[%s6189_s9 + $0x200] sm:$0xff] }
  0xb1   : > { %4663 = vmatprep.subr.bf16.mxu0 %v4662_v16  ;;  %v4758_v16 = vunpack.c.h.s8.bf16 %v819_v12 }
  0xb3   : > { %4721 = vmatpush2.bf16.msra.mxu1 %v4720_v21  ;;  %v4816_v21 = vunpack.c.h.s8.bf16 %v820_v19 }
  0xb4   : > { %4665 = vmatpush2.bf16.msra.mxu0 %v4664_v20  ;;  %4723 = vmatprep.subr.bf16.mxu1 %v4722_v23  ;;  %v4760_v20 = vunpack.c.h.s8.bf16 %v818_v18  ;;  %v4818_v23 = vunpack.c.l.s8.bf16 %v821_v13  ;;  %v685_v13 = vld [vmem:[%s6189_s9 + $0x138] sm:$0xff] }
  0xb5   : > { %4667 = vmatprep.subr.bf16.mxu0 %v4666_v22  ;;  %v4762_v22 = vunpack.c.l.s8.bf16 %v819_v12  ;;  %v683_v12 = vld [vmem:[%s6189_s9 + $0x128] sm:$0xff] }
  0xb7   : > { %4725 = vmatpush2.bf16.msra.mxu1 %v4724_v27  ;;  %v4820_v27 = vunpack.c.l.s8.bf16 %v820_v19  ;;  %v684_v19 = vld [vmem:[%s6189_s9 + $0x130] sm:$0xff] }
  0xb8   : > { %4669 = vmatpush2.bf16.msra.mxu0 %v4668_v26  ;;  %4783 = vmatprep.subr.bf16.mxu1 %v4782_v29  ;;  %v4764_v26 = vunpack.c.l.s8.bf16 %v818_v18  ;;  %v4822_v29 = vunpack.c.h.s8.bf16 %v793_v25  ;;  %v682_v18 = vld [vmem:[%s6189_s9 + $0x120] sm:$0xff] }
  0xb9   : > { %4727 = vmatprep.subr.bf16.mxu0 %v4726_v28  ;;  %v4766_v28 = vunpack.c.h.s8.bf16 %v791_v24 }
  0xba   : > { %2563 = vmatmul.mubr.f32.vlgmr.msra.gmra.mxu1 %v6226_v32 }
  0xbb   : > { %2486 = vmatmul.mubr.f32.vlgmr.msra.gmra.mxu0 %v6226_v32  ;;  %4785 = vmatpush1.bf16.msra.mxu1 %v4784_v34  ;;  %v4824_v34 = vunpack.c.h.s8.bf16 %v792_v31 }
  0xbc   : > { %4729 = vmatpush1.bf16.msra.mxu0 %v4728_v33  ;;  %4787 = vmatprep.subr.bf16.mxu1 %v4786_v36  ;;  %v4768_v33 = vunpack.c.h.s8.bf16 %v790_v30  ;;  %v4826_v36 = vunpack.c.l.s8.bf16 %v793_v25  ;;  %v657_v25 = vld [vmem:[%s6189_s9 + $0x58] sm:$0xff] }
  0xbd   : > { %4731 = vmatprep.subr.bf16.mxu0 %v4730_v35  ;;  %4552 = vmatprep.mubr.msk.f32.mxu0 %vm2414_vm0, %v6235_v39  ;;  %v4770_v35 = vunpack.c.l.s8.bf16 %v791_v24  ;;  %v655_v24 = vld [vmem:[%s6189_s9 + $0x48] sm:$0xff] }
  0xbe   : > { %4554 = vmatprep.mubr.msk.f32.mxu1 %vm2414_vm0, %v6235_v39 }
  0xbf   : > { %2492 = vmatmul.mubr.f32.gmra.mxu0 %v6240_v42  ;;  %2569 = vmatmul.mubr.f32.gmra.mxu1 %v6240_v42 }
  0xc0   : > { %4733 = vmatpush1.bf16.msra.mxu0 %v4732_v40  ;;  %4789 = vmatpush1.bf16.msra.mxu1 %v4788_v41  ;;  %v4772_v40 = vunpack.c.l.s8.bf16 %v790_v30  ;;  %v4828_v41 = vunpack.c.l.s8.bf16 %v792_v31  ;;  %v654_v30 = vld [vmem:[%s6189_s9 + $0x40] sm:$0xff]  ;;  %v656_v31 = vld [vmem:[%s6189_s9 + $0x50] sm:$0xff] }
  0xc1   : > { %4735 = vmatprep.subr.bf16.mxu0 %v4734_v43  ;;  %4791 = vmatprep.subr.bf16.mxu1 %v4790_v44  ;;  %v4774_v43 = vunpack.c.h.s8.bf16 %v763_v37  ;;  %v4830_v44 = vunpack.c.h.s8.bf16 %v765_v38 }
  0xc2   : > { %4555 = vmatprep.mubr.msk.f32.mxu0 %vm2414_vm0, %v6181_v4  ;;  %4557 = vmatprep.mubr.msk.f32.mxu1 %vm2414_vm0, %v6181_v4 }
  0xc4   : > { %4737 = vmatpush1.bf16.msra.mxu0 %v4736_v47  ;;  %4793 = vmatpush1.bf16.msra.mxu1 %v4792_v48  ;;  %v4776_v47 = vunpack.c.h.s8.bf16 %v762_v45  ;;  %v4832_v48 = vunpack.c.h.s8.bf16 %v764_v46 }
  0xc5   : > { %4739 = vmatprep.subr.bf16.mxu0 %v4738_v49  ;;  %4795 = vmatprep.subr.bf16.mxu1 %v4794_v50  ;;  %v4778_v49 = vunpack.c.l.s8.bf16 %v763_v37  ;;  %v4834_v50 = vunpack.c.l.s8.bf16 %v765_v38  ;;  %v823_v37 = vld [vmem:[%s6189_s9 + $0x588] sm:$0xff]  ;;  %v825_v38 = vld [vmem:[%s6189_s9 + $0x598] sm:$0xff] }
  0xc8   : > { %4741 = vmatpush1.bf16.msra.mxu0 %v4740_v53  ;;  %4797 = vmatpush1.bf16.msra.mxu1 %v4796_v54  ;;  %v4780_v53 = vunpack.c.l.s8.bf16 %v762_v45  ;;  %v4836_v54 = vunpack.c.l.s8.bf16 %v764_v46  ;;  %v822_v45 = vld [vmem:[%s6189_s9 + $0x580] sm:$0xff]  ;;  %v824_v46 = vld [vmem:[%s6189_s9 + $0x590] sm:$0xff] }
  0xc9   : > { %4743 = vmatprep.subr.bf16.mxu0 %v4742_v55  ;;  %4799 = vmatprep.subr.bf16.mxu1 %v4798_v56  ;;  %v4838_v55 = vunpack.c.h.s8.bf16 %v739_v51  ;;  %v4894_v56 = vunpack.c.h.s8.bf16 %v741_v52 }
  0xcc   : > { %4745 = vmatpush1.bf16.msra.mxu0 %v4744_v59  ;;  %4801 = vmatpush1.bf16.msra.mxu1 %v4800_v60  ;;  %v4840_v59 = vunpack.c.h.s8.bf16 %v738_v57  ;;  %v4896_v60 = vunpack.c.h.s8.bf16 %v740_v58 }
  0xcd   : > { %4747 = vmatprep.subr.bf16.mxu0 %v4746_v61  ;;  %4803 = vmatprep.subr.bf16.mxu1 %v4802_v62  ;;  %v4842_v61 = vunpack.c.l.s8.bf16 %v739_v51  ;;  %v4898_v62 = vunpack.c.l.s8.bf16 %v741_v52  ;;  %v795_v51 = vld [vmem:[%s6189_s9 + $0x4a8] sm:$0xff]  ;;  %v797_v52 = vld [vmem:[%s6189_s9 + $0x4b8] sm:$0xff] }
  0xd0   : > { %4749 = vmatpush1.bf16.msra.mxu0 %v4748_v1  ;;  %4805 = vmatpush1.bf16.msra.mxu1 %v4804_v2  ;;  %v4844_v1 = vunpack.c.l.s8.bf16 %v738_v57  ;;  %v4900_v2 = vunpack.c.l.s8.bf16 %v740_v58  ;;  %v794_v57 = vld [vmem:[%s6189_s9 + $0x4a0] sm:$0xff]  ;;  %v796_v58 = vld [vmem:[%s6189_s9 + $0x4b0] sm:$0xff] }
  0xd1   : > { %4751 = vmatprep.subr.bf16.mxu0 %v4750_v3  ;;  %4807 = vmatprep.subr.bf16.mxu1 %v4806_v5  ;;  %v4846_v3 = vunpack.c.h.s8.bf16 %v711_v63  ;;  %v4902_v5 = vunpack.c.h.s8.bf16 %v713_v0 }
  0xd4   : > { %4753 = vmatpush1.bf16.msra.mxu0 %v4752_v8  ;;  %4809 = vmatpush1.bf16.msra.mxu1 %v4808_v9  ;;  %v4848_v8 = vunpack.c.h.s8.bf16 %v710_v6  ;;  %v4904_v9 = vunpack.c.h.s8.bf16 %v712_v7 }
  0xd5   : > { %4755 = vmatprep.subr.bf16.mxu0 %v4754_v10  ;;  %4811 = vmatprep.subr.bf16.mxu1 %v4810_v11  ;;  %v4850_v10 = vunpack.c.l.s8.bf16 %v711_v63  ;;  %v4906_v11 = vunpack.c.l.s8.bf16 %v713_v0  ;;  %v767_v63 = vld [vmem:[%s6189_s9 + $0x3c8] sm:$0xff]  ;;  %v769_v0 = vld [vmem:[%s6189_s9 + $0x3d8] sm:$0xff] }
  0xd8   : > { %4757 = vmatpush1.bf16.msra.mxu0 %v4756_v14  ;;  %4813 = vmatpush1.bf16.msra.mxu1 %v4812_v15  ;;  %v4852_v14 = vunpack.c.l.s8.bf16 %v710_v6  ;;  %v4908_v15 = vunpack.c.l.s8.bf16 %v712_v7  ;;  %v766_v6 = vld [vmem:[%s6189_s9 + $0x3c0] sm:$0xff]  ;;  %v768_v7 = vld [vmem:[%s6189_s9 + $0x3d0] sm:$0xff] }
  0xd9   : > { %4759 = vmatprep.subr.bf16.mxu0 %v4758_v16  ;;  %4815 = vmatprep.subr.bf16.mxu1 %v4814_v17  ;;  %v4854_v16 = vunpack.c.h.s8.bf16 %v683_v12  ;;  %v4910_v17 = vunpack.c.h.s8.bf16 %v685_v13 }
  0xdc   : > { %4761 = vmatpush2.bf16.msra.mxu0 %v4760_v20  ;;  %4817 = vmatpush2.bf16.msra.mxu1 %v4816_v21  ;;  %v4856_v20 = vunpack.c.h.s8.bf16 %v682_v18  ;;  %v4912_v21 = vunpack.c.h.s8.bf16 %v684_v19 }
  0xdd   : > { %4763 = vmatprep.subr.bf16.mxu0 %v4762_v22  ;;  %4819 = vmatprep.subr.bf16.mxu1 %v4818_v23  ;;  %v4858_v22 = vunpack.c.l.s8.bf16 %v683_v12  ;;  %v4914_v23 = vunpack.c.l.s8.bf16 %v685_v13  ;;  %v743_v12 = vld [vmem:[%s6189_s9 + $0x308] sm:$0xff]  ;;  %v745_v13 = vld [vmem:[%s6189_s9 + $0x318] sm:$0xff] }
  0xe0   : > { %4765 = vmatpush2.bf16.msra.mxu0 %v4764_v26  ;;  %4821 = vmatpush2.bf16.msra.mxu1 %v4820_v27  ;;  %v4860_v26 = vunpack.c.l.s8.bf16 %v682_v18  ;;  %v4916_v27 = vunpack.c.l.s8.bf16 %v684_v19  ;;  %v742_v18 = vld [vmem:[%s6189_s9 + $0x300] sm:$0xff]  ;;  %v744_v19 = vld [vmem:[%s6189_s9 + $0x310] sm:$0xff] }
  0xe1   : > { %4767 = vmatprep.subr.bf16.mxu0 %v4766_v28  ;;  %4823 = vmatprep.subr.bf16.mxu1 %v4822_v29  ;;  %v4862_v28 = vunpack.c.h.s8.bf16 %v655_v24  ;;  %v4918_v29 = vunpack.c.h.s8.bf16 %v657_v25 }
  0xe4   : > { %4769 = vmatpush2.bf16.msra.mxu0 %v4768_v33  ;;  %4825 = vmatpush2.bf16.msra.mxu1 %v4824_v34  ;;  %v4864_v33 = vunpack.c.h.s8.bf16 %v654_v30  ;;  %v4920_v34 = vunpack.c.h.s8.bf16 %v656_v31 }
  0xe5   : > { %4771 = vmatprep.subr.bf16.mxu0 %v4770_v35  ;;  %4827 = vmatprep.subr.bf16.mxu1 %v4826_v36  ;;  %v4866_v35 = vunpack.c.l.s8.bf16 %v655_v24  ;;  %v4922_v36 = vunpack.c.l.s8.bf16 %v657_v25  ;;  %v715_v24 = vld [vmem:[%s6189_s9 + $0x228] sm:$0xff]  ;;  %v717_v25 = vld [vmem:[%s6189_s9 + $0x238] sm:$0xff] }
  0xe8   : > { %4773 = vmatpush2.bf16.msra.mxu0 %v4772_v40  ;;  %4829 = vmatpush2.bf16.msra.mxu1 %v4828_v41  ;;  %v4868_v40 = vunpack.c.l.s8.bf16 %v654_v30  ;;  %v4924_v41 = vunpack.c.l.s8.bf16 %v656_v31  ;;  %v714_v30 = vld [vmem:[%s6189_s9 + $0x220] sm:$0xff]  ;;  %v716_v31 = vld [vmem:[%s6189_s9 + $0x230] sm:$0xff] }
  0xe9   : > { %4775 = vmatprep.subr.bf16.mxu0 %v4774_v43  ;;  %4831 = vmatprep.subr.bf16.mxu1 %v4830_v44  ;;  %v4870_v43 = vunpack.c.h.s8.bf16 %v823_v37  ;;  %v4926_v44 = vunpack.c.h.s8.bf16 %v825_v38 }
  0xec   : > { %4777 = vmatpush2.bf16.msra.mxu0 %v4776_v47  ;;  %4833 = vmatpush2.bf16.msra.mxu1 %v4832_v48  ;;  %v4872_v47 = vunpack.c.h.s8.bf16 %v822_v45  ;;  %v4928_v48 = vunpack.c.h.s8.bf16 %v824_v46 }
  0xed   : > { %4779 = vmatprep.subr.bf16.mxu0 %v4778_v49  ;;  %4835 = vmatprep.subr.bf16.mxu1 %v4834_v50  ;;  %v4874_v49 = vunpack.c.l.s8.bf16 %v823_v37  ;;  %v4930_v50 = vunpack.c.l.s8.bf16 %v825_v38  ;;  %v687_v37 = vld [vmem:[%s6189_s9 + $0x148] sm:$0xff]  ;;  %v689_v38 = vld [vmem:[%s6189_s9 + $0x158] sm:$0xff] }
  0xf0   : > { %4781 = vmatpush2.bf16.msra.mxu0 %v4780_v53  ;;  %4837 = vmatpush2.bf16.msra.mxu1 %v4836_v54  ;;  %v4876_v53 = vunpack.c.l.s8.bf16 %v822_v45  ;;  %v4932_v54 = vunpack.c.l.s8.bf16 %v824_v46  ;;  %v686_v45 = vld [vmem:[%s6189_s9 + $0x140] sm:$0xff]  ;;  %v688_v46 = vld [vmem:[%s6189_s9 + $0x150] sm:$0xff] }
  0xf1   : > { %4839 = vmatprep.subr.bf16.mxu0 %v4838_v55  ;;  %4895 = vmatprep.subr.bf16.mxu1 %v4894_v56  ;;  %v4878_v55 = vunpack.c.h.s8.bf16 %v795_v51  ;;  %v4934_v56 = vunpack.c.h.s8.bf16 %v797_v52 }
  0xf3   : > { %2640 = vmatmul.mubr.f32.vlgmr.msra.gmra.mxu0 %v6226_v32  ;;  %2717 = vmatmul.mubr.f32.vlgmr.msra.gmra.mxu1 %v6226_v32 }
  0xf4   : > { %4841 = vmatpush1.bf16.msra.mxu0 %v4840_v59  ;;  %4897 = vmatpush1.bf16.msra.mxu1 %v4896_v60  ;;  %v4880_v59 = vunpack.c.h.s8.bf16 %v794_v57  ;;  %v4936_v60 = vunpack.c.h.s8.bf16 %v796_v58 }
  0xf5   : > { %4843 = vmatprep.subr.bf16.mxu0 %v4842_v61  ;;  %4899 = vmatprep.subr.bf16.mxu1 %v4898_v62  ;;  %v4882_v61 = vunpack.c.l.s8.bf16 %v795_v51  ;;  %v4938_v62 = vunpack.c.l.s8.bf16 %v797_v52  ;;  %v661_v51 = vld [vmem:[%s6189_s9 + $0x78] sm:$0xff]  ;;  %v4972_v52 = vunpack.c.l.s8.bf16 %v686_v45 }
  0xf6   : > { %4556 = vmatprep.mubr.msk.f32.mxu0 %vm2414_vm0, %v6235_v39  ;;  %4558 = vmatprep.mubr.msk.f32.mxu1 %vm2414_vm0, %v6235_v39 }
  0xf7   : > { %2646 = vmatmul.mubr.f32.gmra.mxu0 %v6240_v42  ;;  %2723 = vmatmul.mubr.f32.gmra.mxu1 %v6240_v42 }
  0xf8   : > { %4845 = vmatpush1.bf16.msra.mxu0 %v4844_v1  ;;  %4901 = vmatpush1.bf16.msra.mxu1 %v4900_v2  ;;  %v4884_v1 = vunpack.c.l.s8.bf16 %v794_v57  ;;  %v4940_v2 = vunpack.c.l.s8.bf16 %v796_v58  ;;  %v660_v57 = vld [vmem:[%s6189_s9 + $0x70] sm:$0xff] }
  0xf9   : > { %4847 = vmatprep.subr.bf16.mxu0 %v4846_v3  ;;  %4903 = vmatprep.subr.bf16.mxu1 %v4902_v5  ;;  %v4886_v3 = vunpack.c.h.s8.bf16 %v767_v63  ;;  %v4942_v5 = vunpack.c.h.s8.bf16 %v769_v0 }
  0xfa   : > { %4559 = vmatprep.mubr.msk.f32.mxu0 %vm2414_vm0, %v6181_v4  ;;  %4561 = vmatprep.mubr.msk.f32.mxu1 %vm2414_vm0, %v6181_v4 }
  0xfc   : > { %4849 = vmatpush1.bf16.msra.mxu0 %v4848_v8  ;;  %4905 = vmatpush1.bf16.msra.mxu1 %v4904_v9  ;;  %v4888_v8 = vunpack.c.h.s8.bf16 %v766_v6  ;;  %v4944_v9 = vunpack.c.h.s8.bf16 %v768_v7 }
  0xfd   : > { %4851 = vmatprep.subr.bf16.mxu0 %v4850_v10  ;;  %4907 = vmatprep.subr.bf16.mxu1 %v4906_v11  ;;  %v4890_v10 = vunpack.c.l.s8.bf16 %v767_v63  ;;  %v4946_v11 = vunpack.c.l.s8.bf16 %v769_v0  ;;  %v829_v63 = vld [vmem:[%s6189_s9 + $0x5b8] sm:$0xff] }
 0x100   : > { %4853 = vmatpush1.bf16.msra.mxu0 %v4852_v14  ;;  %4909 = vmatpush1.bf16.msra.mxu1 %v4908_v15  ;;  %v4892_v14 = vunpack.c.l.s8.bf16 %v766_v6  ;;  %v4948_v15 = vunpack.c.l.s8.bf16 %v768_v7  ;;  %v828_v6 = vld [vmem:[%s6189_s9 + $0x5b0] sm:$0xff] }
 0x101   : > { %4855 = vmatprep.subr.bf16.mxu0 %v4854_v16  ;;  %4911 = vmatprep.subr.bf16.mxu1 %v4910_v17  ;;  %v4950_v16 = vunpack.c.h.s8.bf16 %v743_v12  ;;  %v5006_v17 = vunpack.c.h.s8.bf16 %v745_v13 }
 0x104   : > { %4857 = vmatpush1.bf16.msra.mxu0 %v4856_v20  ;;  %4913 = vmatpush1.bf16.msra.mxu1 %v4912_v21  ;;  %v4952_v20 = vunpack.c.h.s8.bf16 %v742_v18  ;;  %v5008_v21 = vunpack.c.h.s8.bf16 %v744_v19 }
 0x105   : > { %4859 = vmatprep.subr.bf16.mxu0 %v4858_v22  ;;  %4915 = vmatprep.subr.bf16.mxu1 %v4914_v23  ;;  %v4954_v22 = vunpack.c.l.s8.bf16 %v743_v12  ;;  %v5010_v23 = vunpack.c.l.s8.bf16 %v745_v13  ;;  %v801_v12 = vld [vmem:[%s6189_s9 + $0x4d8] sm:$0xff] }
 0x108   : > { %4861 = vmatpush1.bf16.msra.mxu0 %v4860_v26  ;;  %4917 = vmatpush1.bf16.msra.mxu1 %v4916_v27  ;;  %v4956_v26 = vunpack.c.l.s8.bf16 %v742_v18  ;;  %v5012_v27 = vunpack.c.l.s8.bf16 %v744_v19  ;;  %v800_v18 = vld [vmem:[%s6189_s9 + $0x4d0] sm:$0xff] }
 0x109   : > { %4863 = vmatprep.subr.bf16.mxu0 %v4862_v28  ;;  %4919 = vmatprep.subr.bf16.mxu1 %v4918_v29  ;;  %v4958_v28 = vunpack.c.h.s8.bf16 %v715_v24  ;;  %v5014_v29 = vunpack.c.h.s8.bf16 %v717_v25 }
 0x10c   : > { %4865 = vmatpush1.bf16.msra.mxu0 %v4864_v33  ;;  %4921 = vmatpush1.bf16.msra.mxu1 %v4920_v34  ;;  %v4960_v33 = vunpack.c.h.s8.bf16 %v714_v30  ;;  %v5016_v34 = vunpack.c.h.s8.bf16 %v716_v31 }
 0x10d   : > { %4867 = vmatprep.subr.bf16.mxu0 %v4866_v35  ;;  %4923 = vmatprep.subr.bf16.mxu1 %v4922_v36  ;;  %v4962_v35 = vunpack.c.l.s8.bf16 %v715_v24  ;;  %v5018_v36 = vunpack.c.l.s8.bf16 %v717_v25  ;;  %v773_v24 = vld [vmem:[%s6189_s9 + $0x3f8] sm:$0xff] }
 0x110   : > { %4869 = vmatpush1.bf16.msra.mxu0 %v4868_v40  ;;  %4925 = vmatpush1.bf16.msra.mxu1 %v4924_v41  ;;  %v4964_v40 = vunpack.c.l.s8.bf16 %v714_v30  ;;  %v5020_v41 = vunpack.c.l.s8.bf16 %v716_v31  ;;  %v772_v30 = vld [vmem:[%s6189_s9 + $0x3f0] sm:$0xff] }
 0x111   : > { %4871 = vmatprep.subr.bf16.mxu0 %v4870_v43  ;;  %4927 = vmatprep.subr.bf16.mxu1 %v4926_v44  ;;  %v4966_v43 = vunpack.c.h.s8.bf16 %v687_v37  ;;  %v5022_v44 = vunpack.c.h.s8.bf16 %v689_v38 }
 0x114   : > { %4873 = vmatpush2.bf16.msra.mxu0 %v4872_v47  ;;  %4929 = vmatpush2.bf16.msra.mxu1 %v4928_v48  ;;  %v4968_v47 = vunpack.c.h.s8.bf16 %v686_v45  ;;  %v5024_v48 = vunpack.c.h.s8.bf16 %v688_v46  ;;  %v748_v45 = vld [vmem:[%s6189_s9 + $0x330] sm:$0xff] }
 0x115   : > { %4875 = vmatprep.subr.bf16.mxu0 %v4874_v49  ;;  %4931 = vmatprep.subr.bf16.mxu1 %v4930_v50  ;;  %v5026_v49 = vunpack.c.l.s8.bf16 %v689_v38  ;;  %v659_v50 = vld [vmem:[%s6189_s9 + $0x68] sm:$0xff] }
 0x118   : > { %4877 = vmatpush2.bf16.msra.mxu0 %v4876_v53  ;;  %4933 = vmatpush2.bf16.msra.mxu1 %v4932_v54  ;;  %v5028_v53 = vunpack.c.l.s8.bf16 %v688_v46  ;;  %v4974_v54 = vunpack.c.h.s8.bf16 %v659_v50 }
 0x119   : > { %4879 = vmatprep.subr.bf16.mxu0 %v4878_v55  ;;  %4935 = vmatprep.subr.bf16.mxu1 %v4934_v56  ;;  %v5030_v55 = vunpack.c.h.s8.bf16 %v661_v51  ;;  %v658_v56 = vld [vmem:[%s6189_s9 + $0x60] sm:$0xff] }
 0x11a   : > { %v4976_v58 = vunpack.c.h.s8.bf16 %v658_v56  ;;  %v4980_v0 = vunpack.c.l.s8.bf16 %v658_v56  ;;  %v720_v56 = vld [vmem:[%s6189_s9 + $0x250] sm:$0xff] }
 0x11c   : > { %4881 = vmatpush2.bf16.msra.mxu0 %v4880_v59  ;;  %4937 = vmatpush2.bf16.msra.mxu1 %v4936_v60  ;;  %v5032_v59 = vunpack.c.h.s8.bf16 %v660_v57  ;;  %v4978_v60 = vunpack.c.l.s8.bf16 %v659_v50  ;;  %v721_v50 = vld [vmem:[%s6189_s9 + $0x258] sm:$0xff] }
 0x11d   : > { %4883 = vmatprep.subr.bf16.mxu0 %v4882_v61  ;;  %4939 = vmatprep.subr.bf16.mxu1 %v4938_v62  ;;  %v5034_v61 = vunpack.c.l.s8.bf16 %v661_v51  ;;  %v827_v62 = vld [vmem:[%s6189_s9 + $0x5a8] sm:$0xff] }
 0x120   : > { %4885 = vmatpush2.bf16.msra.mxu0 %v4884_v1  ;;  %4941 = vmatpush2.bf16.msra.mxu1 %v4940_v2  ;;  %v5036_v1 = vunpack.c.l.s8.bf16 %v660_v57  ;;  %v4982_v2 = vunpack.c.h.s8.bf16 %v827_v62  ;;  %v5128_v57 = vunpack.c.h.s8.bf16 %v720_v56 }
 0x121   : > { %4887 = vmatprep.subr.bf16.mxu0 %v4886_v3  ;;  %4943 = vmatprep.subr.bf16.mxu1 %v4942_v5  ;;  %v5038_v3 = vunpack.c.h.s8.bf16 %v829_v63  ;;  %v826_v5 = vld [vmem:[%s6189_s9 + $0x5a0] sm:$0xff] }
 0x122   : > { %v4984_v7 = vunpack.c.h.s8.bf16 %v826_v5  ;;  %v4988_v13 = vunpack.c.l.s8.bf16 %v826_v5 }
 0x124   : > { %4889 = vmatpush2.bf16.msra.mxu0 %v4888_v8  ;;  %4945 = vmatpush2.bf16.msra.mxu1 %v4944_v9  ;;  %v5040_v8 = vunpack.c.h.s8.bf16 %v828_v6  ;;  %v4986_v9 = vunpack.c.l.s8.bf16 %v827_v62  ;;  %v5132_v62 = vunpack.c.l.s8.bf16 %v720_v56 }
 0x125   : > { %4891 = vmatprep.subr.bf16.mxu0 %v4890_v10  ;;  %4947 = vmatprep.subr.bf16.mxu1 %v4946_v11  ;;  %v5042_v10 = vunpack.c.l.s8.bf16 %v829_v63  ;;  %v799_v11 = vld [vmem:[%s6189_s9 + $0x4c8] sm:$0xff]  ;;  %v3511_v63 = vlaneseq }
 0x128   : > { %4893 = vmatpush2.bf16.msra.mxu0 %v4892_v14  ;;  %4949 = vmatpush2.bf16.msra.mxu1 %v4948_v15  ;;  %v5044_v14 = vunpack.c.l.s8.bf16 %v828_v6  ;;  %v4990_v15 = vunpack.c.h.s8.bf16 %v799_v11 }
 0x129   : > { %4951 = vmatprep.subr.bf16.mxu0 %v4950_v16  ;;  %5007 = vmatprep.subr.bf16.mxu1 %v5006_v17  ;;  %v5046_v16 = vunpack.c.h.s8.bf16 %v801_v12  ;;  %v798_v17 = vld [vmem:[%s6189_s9 + $0x4c0] sm:$0xff] }
 0x12a   : > { %v4992_v19 = vunpack.c.h.s8.bf16 %v798_v17  ;;  %v4996_v25 = vunpack.c.l.s8.bf16 %v798_v17 }
 0x12b   : > { %2794 = vmatmul.mubr.f32.vlgmr.msra.gmra.mxu0 %v6226_v32  ;;  %2871 = vmatmul.mubr.f32.vlgmr.msra.gmra.mxu1 %v6226_v32 }
 0x12c   : > { %4953 = vmatpush1.bf16.msra.mxu0 %v4952_v20  ;;  %5009 = vmatpush1.bf16.msra.mxu1 %v5008_v21  ;;  %v5048_v20 = vunpack.c.h.s8.bf16 %v800_v18  ;;  %v4994_v21 = vunpack.c.l.s8.bf16 %v799_v11  ;;  %v665_v11 = vld [vmem:[%s6189_s9 + $0x98] sm:$0xff] }
 0x12d   : > { %4955 = vmatprep.subr.bf16.mxu0 %v4954_v22  ;;  %5011 = vmatprep.subr.bf16.mxu1 %v5010_v23  ;;  %v5050_v22 = vunpack.c.l.s8.bf16 %v801_v12  ;;  %v771_v23 = vld [vmem:[%s6189_s9 + $0x3e8] sm:$0xff] }
 0x12e   : > { %4560 = vmatprep.mubr.msk.f32.mxu0 %vm2414_vm0, %v6235_v39  ;;  %4562 = vmatprep.mubr.msk.f32.mxu1 %vm2414_vm0, %v6235_v39 }
 0x12f   : > { %2800 = vmatmul.mubr.f32.gmra.mxu0 %v6240_v42  ;;  %2877 = vmatmul.mubr.f32.gmra.mxu1 %v6240_v42 }
 0x130   : > { %4957 = vmatpush1.bf16.msra.mxu0 %v4956_v26  ;;  %5013 = vmatpush1.bf16.msra.mxu1 %v5012_v27  ;;  %v5052_v26 = vunpack.c.l.s8.bf16 %v800_v18  ;;  %v4998_v27 = vunpack.c.h.s8.bf16 %v771_v23  ;;  %v5142_v18 = vunpack.c.h.s8.bf16 %v665_v11 }
 0x131   : > { %4959 = vmatprep.subr.bf16.mxu0 %v4958_v28  ;;  %5015 = vmatprep.subr.bf16.mxu1 %v5014_v29  ;;  %v5054_v28 = vunpack.c.h.s8.bf16 %v773_v24  ;;  %v770_v29 = vld [vmem:[%s6189_s9 + $0x3e0] sm:$0xff] }
 0x132   : > { %4563 = vmatprep.mubr.msk.f32.mxu0 %vm2414_vm0, %v6181_v4  ;;  %4565 = vmatprep.mubr.msk.f32.mxu1 %vm2414_vm0, %v6181_v4  ;;  %v4970_v4 = vunpack.c.l.s8.bf16 %v687_v37  ;;  %v5000_v31 = vunpack.c.h.s8.bf16 %v770_v29  ;;  %v749_v37 = vld [vmem:[%s6189_s9 + $0x338] sm:$0xff]  ;;  %v5004_v38 = vunpack.c.l.s8.bf16 %v770_v29  ;;  %v5146_v29 = vunpack.c.l.s8.bf16 %v665_v11 }
 0x134   : > { %4961 = vmatpush1.bf16.msra.mxu0 %v4960_v33  ;;  %5017 = vmatpush1.bf16.msra.mxu1 %v5016_v34  ;;  %v5056_v33 = vunpack.c.h.s8.bf16 %v772_v30  ;;  %v5002_v34 = vunpack.c.l.s8.bf16 %v771_v23  ;;  %v6422_v23 = vld [vmem:[%s6402_s6] sm:$0xff] }
 0x135   : > { %4963 = vmatprep.subr.bf16.mxu0 %v4962_v35  ;;  %5019 = vmatprep.subr.bf16.mxu1 %v5018_v36  ;;  %v5058_v35 = vunpack.c.l.s8.bf16 %v773_v24  ;;  %v747_v36 = vld [vmem:[%s6189_s9 + $0x328] sm:$0xff] }
 0x138   : > { %4965 = vmatpush1.bf16.msra.mxu0 %v4964_v40  ;;  %5021 = vmatpush1.bf16.msra.mxu1 %v5020_v41  ;;  %v5060_v40 = vunpack.c.l.s8.bf16 %v772_v30  ;;  %v5062_v41 = vunpack.c.h.s8.bf16 %v747_v36 }
 0x139   : > { %4967 = vmatprep.subr.bf16.mxu0 %v4966_v43  ;;  %5023 = vmatprep.subr.bf16.mxu1 %v5022_v44  ;;  %v5118_v43 = vunpack.c.h.s8.bf16 %v749_v37  ;;  %v746_v44 = vld [vmem:[%s6189_s9 + $0x320] sm:$0xff] }
 0x13a   : > { %v5064_v46 = vunpack.c.h.s8.bf16 %v746_v44  ;;  %v5068_v51 = vunpack.c.l.s8.bf16 %v746_v44 }
 0x13c   : > { %4969 = vmatpush1.bf16.msra.mxu0 %v4968_v47  ;;  %5025 = vmatpush1.bf16.msra.mxu1 %v5024_v48  ;;  %v5120_v47 = vunpack.c.h.s8.bf16 %v748_v45  ;;  %v5066_v48 = vunpack.c.l.s8.bf16 %v747_v36  ;;  %v833_v36 = vld [vmem:[%s6189_s9 + $0x5d8] sm:$0xff] }
 0x13d   : > { %4971 = vmatprep.subr.bf16.mxu0 %v4970_v4  ;;  %5027 = vmatprep.subr.bf16.mxu1 %v5026_v49  ;;  %v5122_v4 = vunpack.c.l.s8.bf16 %v749_v37  ;;  %v719_v49 = vld [vmem:[%s6189_s9 + $0x248] sm:$0xff] }
 0x140   : > { %4973 = vmatpush1.bf16.msra.mxu0 %v4972_v52  ;;  %5029 = vmatpush1.bf16.msra.mxu1 %v5028_v53  ;;  %v5124_v52 = vunpack.c.l.s8.bf16 %v748_v45  ;;  %v5070_v53 = vunpack.c.h.s8.bf16 %v719_v49 }
 0x141   : > { %4975 = vmatprep.subr.bf16.mxu0 %v4974_v54  ;;  %5031 = vmatprep.subr.bf16.mxu1 %v5030_v55  ;;  %v5126_v54 = vunpack.c.h.s8.bf16 %v721_v50  ;;  %v718_v55 = vld [vmem:[%s6189_s9 + $0x240] sm:$0xff] }
 0x144   : > { %4977 = vmatpush1.bf16.msra.mxu0 %v4976_v58  ;;  %5033 = vmatpush1.bf16.msra.mxu1 %v5032_v59  ;;  %v5074_v58 = vunpack.c.l.s8.bf16 %v719_v49  ;;  %v5130_v59 = vunpack.c.l.s8.bf16 %v721_v50  ;;  %v5150_v50 = vunpack.c.h.s8.bf16 %v833_v36 }
 0x145   : > { %4979 = vmatprep.subr.bf16.mxu0 %v4978_v60  ;;  %5035 = vmatprep.subr.bf16.mxu1 %v5034_v61  ;;  %v691_v60 = vld [vmem:[%s6189_s9 + $0x168] sm:$0xff]  ;;  %v693_v61 = vld [vmem:[%s6189_s9 + $0x178] sm:$0xff] }
 0x148   : > { %4981 = vmatpush1.bf16.msra.mxu0 %v4980_v0  ;;  %5037 = vmatpush1.bf16.msra.mxu1 %v5036_v1  ;;  %v5078_v0 = vunpack.c.h.s8.bf16 %v691_v60  ;;  %v5134_v1 = vunpack.c.h.s8.bf16 %v693_v61 }
 0x149   : > { %4983 = vmatprep.subr.bf16.mxu0 %v4982_v2  ;;  %5039 = vmatprep.subr.bf16.mxu1 %v5038_v3  ;;  %v690_v2 = vld [vmem:[%s6189_s9 + $0x160] sm:$0xff]  ;;  %v692_v3 = vld [vmem:[%s6189_s9 + $0x170] sm:$0xff] }
 0x14a   : > { %v5080_v5 = vunpack.c.h.s8.bf16 %v690_v2  ;;  %v5136_v6 = vunpack.c.h.s8.bf16 %v692_v3  ;;  %v5084_v12 = vunpack.c.l.s8.bf16 %v690_v2  ;;  %v803_v2 = vld [vmem:[%s6189_s9 + $0x4e8] sm:$0xff] }
 0x14c   : > { %4985 = vmatpush2.bf16.msra.mxu0 %v4984_v7  ;;  %5041 = vmatpush2.bf16.msra.mxu1 %v5040_v8  ;;  %v6390_v7 = vshrl.u32 %v3511_v63, 7  ;;  %v5082_v8 = vunpack.c.l.s8.bf16 %v691_v60 }
 0x14d   : > { %4987 = vmatprep.subr.bf16.mxu0 %v4986_v9  ;;  %5043 = vmatprep.subr.bf16.mxu1 %v5042_v10  ;;  %v5138_v9 = vunpack.c.l.s8.bf16 %v693_v61  ;;  %v663_v10 = vld [vmem:[%s6189_s9 + $0x88] sm:$0xff] }
 0x14e   : > { %v5086_v17 = vunpack.c.h.s8.bf16 %v663_v10 }
 0x150   : > { %4989 = vmatpush2.bf16.msra.mxu0 %v4988_v13  ;;  %5045 = vmatpush2.bf16.msra.mxu1 %v5044_v14  ;;  %v5140_v13 = vunpack.c.l.s8.bf16 %v692_v3  ;;  %v6405_v14 = vsub.s32 0, %v6390_v7  ;;  %v805_v3 = vld [vmem:[%s6189_s9 + $0x4f8] sm:$0xff] }
 0x151   : > { %4991 = vmatprep.subr.bf16.mxu0 %v4990_v15  ;;  %5047 = vmatprep.subr.bf16.mxu1 %v5046_v16  ;;  %v6408_v15 = vsub.s32 2, %v6390_v7  ;;  %v6411_v16 = vld [vmem:[%s6395_s28] sm:$0xff] }
 0x152   : > { %v3514_v24 = vrot.slane %v6411_v16, %v6405_v14  ;;  %v3714_v30 = vrot.slane %v6422_v23, %v6405_v14 }
 0x154   : > { %4993 = vmatpush2.bf16.msra.mxu0 %v4992_v19  ;;  %5049 = vmatpush2.bf16.msra.mxu1 %v5048_v20  ;;  %v662_v19 = vld [vmem:[%s6189_s9 + $0x80] sm:$0xff]  ;;  %v664_v20 = vld [vmem:[%s6189_s9 + $0x90] sm:$0xff] }
 0x155   : > { %4995 = vmatprep.subr.bf16.mxu0 %v4994_v21  ;;  %5051 = vmatprep.subr.bf16.mxu1 %v5050_v22  ;;  %v6416_v21 = vsub.s32 1, %v6390_v7  ;;  %v6419_v22 = vsub.s32 3, %v6390_v7  ;;  %v5092_v45 = vunpack.c.l.s8.bf16 %v662_v19 }
 0x158   : > { %4997 = vmatpush2.bf16.msra.mxu0 %v4996_v25  ;;  %5053 = vmatpush2.bf16.msra.mxu1 %v5052_v26  ;;  %v3522_v25 = vrot.slane %v6411_v16, %v6408_v15  ;;  %v5088_v26 = vunpack.c.h.s8.bf16 %v662_v19  ;;  %v802_v19 = vld [vmem:[%s6189_s9 + $0x4e0] sm:$0xff] }
 0x159   : > { %4999 = vmatprep.subr.bf16.mxu0 %v4998_v27  ;;  %5055 = vmatprep.subr.bf16.mxu1 %v5054_v28  ;;  %v5144_v27 = vunpack.c.h.s8.bf16 %v664_v20  ;;  %v5090_v28 = vunpack.c.l.s8.bf16 %v663_v10 }
 0x15c   : > { %5001 = vmatpush2.bf16.msra.mxu0 %v5000_v31  ;;  %5057 = vmatpush2.bf16.msra.mxu1 %v5056_v33  ;;  %v3722_v31 = vrot.slane %v6422_v23, %v6408_v15  ;;  %v3518_v33 = vrot.slane %v6411_v16, %v6416_v21 }
 0x15d   : > { %5003 = vmatprep.subr.bf16.mxu0 %v5002_v34  ;;  %5059 = vmatprep.subr.bf16.mxu1 %v5058_v35  ;;  %v3526_v34 = vrot.slane %v6411_v16, %v6419_v22  ;;  %v831_v35 = vld [vmem:[%s6189_s9 + $0x5c8] sm:$0xff] }
 0x15e   : > { %v5094_v49 = vunpack.c.h.s8.bf16 %v831_v35 }
 0x160   : > { %5005 = vmatpush2.bf16.msra.mxu0 %v5004_v38  ;;  %5061 = vmatpush2.bf16.msra.mxu1 %v5060_v40  ;;  %v3718_v40 = vrot.slane %v6422_v23, %v6416_v21 }
 0x161   : > { %5063 = vmatprep.subr.bf16.mxu0 %v5062_v41  ;;  %5119 = vmatprep.subr.bf16.mxu1 %v5118_v43  ;;  %v3726_v41 = vrot.slane %v6422_v23, %v6419_v22 }
 0x163   : > { %2948 = vmatmul.mubr.f32.vlgmr.msra.gmra.mxu0 %v6226_v32  ;;  %3025 = vmatmul.mubr.f32.vlgmr.msra.gmra.mxu1 %v6226_v32  ;;  %v5072_v32 = vunpack.c.h.s8.bf16 %v718_v55 }
 0x164   : > { %5065 = vmatpush1.bf16.msra.mxu0 %v5064_v46  ;;  %5121 = vmatpush1.bf16.msra.mxu1 %v5120_v47  ;;  %v5148_v46 = vunpack.c.l.s8.bf16 %v664_v20  ;;  %v830_v47 = vld [vmem:[%s6189_s9 + $0x5c0] sm:$0xff]  ;;  %v804_v20 = vld [vmem:[%s6189_s9 + $0x4f0] sm:$0xff] }
 0x165   : > { %5067 = vmatprep.subr.bf16.mxu0 %v5066_v48  ;;  %5123 = vmatprep.subr.bf16.mxu1 %v5122_v4  ;;  %v5096_v56 = vunpack.c.h.s8.bf16 %v830_v47  ;;  %v5100_v10 = vunpack.c.l.s8.bf16 %v830_v47 }
 0x166   : > { %4564 = vmatprep.mubr.msk.f32.mxu0 %vm2414_vm0, %v6235_v39  ;;  %4566 = vmatprep.mubr.msk.f32.mxu1 %vm2414_vm0, %v6235_v39  ;;  %v6379_v39 = vld [vmem:[%s7134_s0 + $0x8] sm:$0xff] }
 0x167   : > { %2954 = vmatmul.mubr.f32.gmra.mxu0 %v6240_v42  ;;  %3031 = vmatmul.mubr.f32.gmra.mxu1 %v6240_v42  ;;  %v5076_v42 = vunpack.c.l.s8.bf16 %v718_v55 }
 0x168   : > { %5069 = vmatpush1.bf16.msra.mxu0 %v5068_v51  ;;  %5125 = vmatpush1.bf16.msra.mxu1 %v5124_v52  ;;  %v832_v51 = vld [vmem:[%s6189_s9 + $0x5d0] sm:$0xff] }
 0x169   : > { %5071 = vmatprep.subr.bf16.mxu0 %v5070_v53  ;;  %5127 = vmatprep.subr.bf16.mxu1 %v5126_v54  ;;  %v5152_v60 = vunpack.c.h.s8.bf16 %v832_v51  ;;  %v5156_v11 = vunpack.c.l.s8.bf16 %v832_v51 }
 0x16a   : > { %4567 = vmatprep.mubr.msk.f32.mxu0 %vm2414_vm0, %v6379_v39  ;;  %4569 = vmatprep.mubr.msk.f32.mxu1 %vm2414_vm0, %v6379_v39 }
 0x16c   : > { %5073 = vmatpush1.bf16.msra.mxu0 %v5072_v32  ;;  %5129 = vmatpush1.bf16.msra.mxu1 %v5128_v57 }
 0x16d   : > { %5075 = vmatprep.subr.bf16.mxu0 %v5074_v58  ;;  %5131 = vmatprep.subr.bf16.mxu1 %v5130_v59 }
 0x170   : > { %5077 = vmatpush1.bf16.msra.mxu0 %v5076_v42  ;;  %5133 = vmatpush1.bf16.msra.mxu1 %v5132_v62  ;;  %v5098_v42 = vunpack.c.l.s8.bf16 %v831_v35  ;;  %v5154_v62 = vunpack.c.l.s8.bf16 %v833_v36  ;;  %v774_v35 = vld [vmem:[%s6189_s9 + $0x400] sm:$0xff]  ;;  %v776_v36 = vld [vmem:[%s6189_s9 + $0x410] sm:$0xff] }
 0x171   : > { %5079 = vmatprep.subr.bf16.mxu0 %v5078_v0  ;;  %5135 = vmatprep.subr.bf16.mxu1 %v5134_v1 }
 0x174   : > { %5081 = vmatpush1.bf16.msra.mxu0 %v5080_v5  ;;  %5137 = vmatpush1.bf16.msra.mxu1 %v5136_v6 }
 0x175   : > { %5083 = vmatprep.subr.bf16.mxu0 %v5082_v8  ;;  %5139 = vmatprep.subr.bf16.mxu1 %v5138_v9 }
 0x178   : > { %5085 = vmatpush1.bf16.msra.mxu0 %v5084_v12  ;;  %5141 = vmatpush1.bf16.msra.mxu1 %v5140_v13 }
 0x179   : > { %5087 = vmatprep.subr.bf16.mxu0 %v5086_v17  ;;  %5143 = vmatprep.subr.bf16.mxu1 %v5142_v18  ;;  %v5102_v17 = vunpack.c.h.s8.bf16 %v803_v2  ;;  %v5158_v18 = vunpack.c.h.s8.bf16 %v805_v3 }
 0x17a   : > { %v2564_v38 = vpop.f32.mrf.mxu1 }
 0x17b   : > { %v2487_v37 = vpop.f32.mrf.mxu0  ;;  %v3653_v44 = vmul.f32 %v3522_v25, %v2564_v38  ;;  %v5168_v38 = vunpack.c.h.s8.bf16 %v776_v36 }
 0x17c   : > { %v3651_v43 = vmul.f32 %v3514_v24, %v2487_v37  ;;  %5089 = vmatpush1.bf16.msra.mxu0 %v5088_v26  ;;  %5145 = vmatpush1.bf16.msra.mxu1 %v5144_v27  ;;  %v2566_v4 = vpop.f32.mrf.mxu1  ;;  %v5106_v26 = vunpack.c.l.s8.bf16 %v803_v2  ;;  %v5162_v27 = vunpack.c.l.s8.bf16 %v805_v3  ;;  %v5112_v37 = vunpack.c.h.s8.bf16 %v774_v35  ;;  %v695_v3 = vld [vmem:[%s6189_s9 + $0x188] sm:$0xff] }
 0x17d   : > { %v2489_v48 = vpop.f32.mrf.mxu0  ;;  %5091 = vmatprep.subr.bf16.mxu0 %v5090_v28  ;;  %5147 = vmatprep.subr.bf16.mxu1 %v5146_v29  ;;  %v3853_v53 = vadd.f32 %v3722_v31, %v3653_v44  ;;  %v3654_v55 = vmul.f32 %v3526_v34, %v2566_v4  ;;  %v775_v28 = vld [vmem:[%s6189_s9 + $0x408] sm:$0xff]  ;;  %v777_v29 = vld [vmem:[%s6189_s9 + $0x418] sm:$0xff]  ;;  %v750_v4 = vld [vmem:[%s6189_s9 + $0x340] sm:$0xff] }
 0x17e   : > { %v3851_v52 = vadd.f32 %v3714_v30, %v3651_v43  ;;  %v3652_v54 = vmul.f32 %v3518_v33, %v2489_v48  ;;  %v751_v43 = vld [vmem:[%s6189_s9 + $0x348] sm:$0xff]  ;;  %v753_v44 = vld [vmem:[%s6189_s9 + $0x358] sm:$0xff] }
 0x17f   : > { %v2493_v32 = vpop.f32.mrf.mxu0  ;;  %v2570_v57 = vpop.f32.mrf.mxu1  ;;  %3909 = vst [vmem:[%s6449_s15 + $0x10] sm:$0xff] %v3853_v53  ;;  %v3854_v59 = vadd.f32 %v3726_v41, %v3654_v55  ;;  %v5174_v47 = vunpack.c.h.s8.bf16 %v751_v43  ;;  %v5230_v48 = vunpack.c.h.s8.bf16 %v753_v44  ;;  %v5234_v53 = vunpack.c.l.s8.bf16 %v753_v44  ;;  %v725_v55 = vld [vmem:[%s6189_s9 + $0x278] sm:$0xff] }
 0x180   : > { %3907 = vst [vmem:[%s6449_s15] sm:$0xff] %v3851_v52  ;;  %v3852_v58 = vadd.f32 %v3718_v40, %v3652_v54  ;;  %5093 = vmatpush1.bf16.msra.mxu0 %v5092_v45  ;;  %5149 = vmatpush1.bf16.msra.mxu1 %v5148_v46  ;;  %v3679_v61 = vmul.f32 %v3514_v24, %v2493_v32  ;;  %v5104_v24 = vunpack.c.h.s8.bf16 %v802_v19  ;;  %v5116_v45 = vunpack.c.l.s8.bf16 %v774_v35  ;;  %v723_v54 = vld [vmem:[%s6189_s9 + $0x268] sm:$0xff] }
 0x181   : > { %5095 = vmatprep.subr.bf16.mxu0 %v5094_v49  ;;  %5151 = vmatprep.subr.bf16.mxu1 %v5150_v50  ;;  %v3681_v63 = vmul.f32 %v3522_v25, %v2570_v57  ;;  %v2495_v0 = vpop.f32.mrf.mxu0  ;;  %v2572_v1 = vpop.f32.mrf.mxu1  ;;  %3910 = vst [vmem:[%s6449_s15 + $0x18] sm:$0xff] %v3854_v59  ;;  %v5160_v25 = vunpack.c.h.s8.bf16 %v804_v20  ;;  %v5172_v46 = vunpack.c.l.s8.bf16 %v776_v36  ;;  %v752_v49 = vld [vmem:[%s6189_s9 + $0x350] sm:$0xff]  ;;  %v5176_v50 = vunpack.c.h.s8.bf16 %v750_v4 }
 0x182   : > { %3908 = vst [vmem:[%s6449_s15 + $0x8] sm:$0xff] %v3852_v58  ;;  %v3879_v5 = vadd.f32 %v3714_v30, %v3679_v61  ;;  %v3680_v6 = vmul.f32 %v3518_v33, %v2495_v0  ;;  %v3682_v8 = vmul.f32 %v3526_v34, %v2572_v1  ;;  %v5108_v30 = vunpack.c.l.s8.bf16 %v802_v19  ;;  %v724_v61 = vld [vmem:[%s6189_s9 + $0x270] sm:$0xff] }
 0x183   : > { %v3881_v9 = vadd.f32 %v3722_v31, %v3681_v63  ;;  %v5164_v31 = vunpack.c.l.s8.bf16 %v804_v20  ;;  %v5110_v33 = vunpack.c.h.s8.bf16 %v775_v28  ;;  %v5166_v34 = vunpack.c.h.s8.bf16 %v777_v29  ;;  %v667_v20 = vld [vmem:[%s6189_s9 + $0xa8] sm:$0xff] }
 0x184   : > { %5097 = vmatpush2.bf16.msra.mxu0 %v5096_v56  ;;  %5153 = vmatpush2.bf16.msra.mxu1 %v5152_v60  ;;  %3935 = vst [vmem:[%s6449_s15 + $0xe0] sm:$0xff] %v3879_v5  ;;  %v3880_v12 = vadd.f32 %v3718_v40, %v3680_v6  ;;  %v3882_v13 = vadd.f32 %v3726_v41, %v3682_v8  ;;  %v5114_v40 = vunpack.c.l.s8.bf16 %v775_v28  ;;  %v5170_v41 = vunpack.c.l.s8.bf16 %v777_v29  ;;  %v6476_v56 = vld [vmem:[%s7134_s0] sm:$0xff]  ;;  %v697_v5 = vld [vmem:[%s6189_s9 + $0x198] sm:$0xff] }
 0x185   : > { %5099 = vmatprep.subr.bf16.mxu0 %v5098_v42  ;;  %5155 = vmatprep.subr.bf16.mxu1 %v5154_v62  ;;  %3937 = vst [vmem:[%s6449_s15 + $0xf0] sm:$0xff] %v3881_v9  ;;  %v5232_v51 = vunpack.c.h.s8.bf16 %v752_v49  ;;  %v5178_v52 = vunpack.c.l.s8.bf16 %v751_v43  ;;  %v5180_v32 = vunpack.c.l.s8.bf16 %v750_v4  ;;  %v5236_v57 = vunpack.c.l.s8.bf16 %v752_v49  ;;  %v722_v60 = vld [vmem:[%s6189_s9 + $0x260] sm:$0xff]  ;;  %v6485_v42 = vld [vmem:[%s7134_s0 + $0x18] sm:$0xff]  ;;  %v6494_v62 = vld [vmem:[%s7134_s0 + $0x10] sm:$0xff] }
 0x186   : > { %3936 = vst [vmem:[%s6449_s15 + $0xe8] sm:$0xff] %v3880_v12  ;;  %3938 = vst [vmem:[%s6449_s15 + $0xf8] sm:$0xff] %v3882_v13  ;;  %v5182_v58 = vunpack.c.h.s8.bf16 %v723_v54  ;;  %v5238_v59 = vunpack.c.h.s8.bf16 %v725_v55  ;;  %v5184_v63 = vunpack.c.h.s8.bf16 %v722_v60  ;;  %v5240_v0 = vunpack.c.h.s8.bf16 %v724_v61  ;;  %v696_v12 = vld [vmem:[%s6189_s9 + $0x190] sm:$0xff] }
 0x187   : > { %v5186_v1 = vunpack.c.l.s8.bf16 %v723_v54  ;;  %v5242_v2 = vunpack.c.l.s8.bf16 %v725_v55  ;;  %v5188_v6 = vunpack.c.l.s8.bf16 %v722_v60  ;;  %v5244_v8 = vunpack.c.l.s8.bf16 %v724_v61  ;;  %v836_v60 = vld [vmem:[%s6189_s9 + $0x5f0] sm:$0xff] }
 0x188   : > { %5101 = vmatpush2.bf16.msra.mxu0 %v5100_v10  ;;  %5157 = vmatpush2.bf16.msra.mxu1 %v5156_v11  ;;  %v5190_v9 = vunpack.c.h.s8.bf16 %v695_v3  ;;  %v5246_v10 = vunpack.c.h.s8.bf16 %v697_v5  ;;  %v694_v11 = vld [vmem:[%s6189_s9 + $0x180] sm:$0xff]  ;;  %v5250_v19 = vunpack.c.l.s8.bf16 %v697_v5  ;;  %v6512_v28 = vsub.s32 6, %v6390_v7 }
 0x189   : > { %5103 = vmatprep.subr.bf16.mxu0 %v5102_v17  ;;  %5159 = vmatprep.subr.bf16.mxu1 %v5158_v18  ;;  %v5192_v13 = vunpack.c.h.s8.bf16 %v694_v11  ;;  %v5248_v17 = vunpack.c.h.s8.bf16 %v696_v12  ;;  %v5194_v18 = vunpack.c.l.s8.bf16 %v695_v3  ;;  %v5198_v29 = vunpack.c.h.s8.bf16 %v667_v20 }
 0x18a   : > { %v6520_v35 = vsub.s32 7, %v6390_v7 }
 0x18c   : > { %5105 = vmatpush2.bf16.msra.mxu0 %v5104_v24  ;;  %5161 = vmatpush2.bf16.msra.mxu1 %v5160_v25  ;;  %v669_v24 = vld [vmem:[%s6189_s9 + $0xb8] sm:$0xff]  ;;  %v5196_v25 = vunpack.c.l.s8.bf16 %v694_v11 }
 0x18d   : > { %5107 = vmatprep.subr.bf16.mxu0 %v5106_v26  ;;  %5163 = vmatprep.subr.bf16.mxu1 %v5162_v27  ;;  %v5252_v26 = vunpack.c.l.s8.bf16 %v696_v12  ;;  %v6509_v27 = vsub.s32 4, %v6390_v7  ;;  %v5258_v43 = vunpack.c.l.s8.bf16 %v669_v24 }
 0x18f   : > { %v3530_v36 = vrot.slane %v6411_v16, %v6509_v27  ;;  %v3730_v44 = vrot.slane %v6422_v23, %v6509_v27 }
 0x190   : > { %5109 = vmatpush2.bf16.msra.mxu0 %v5108_v30  ;;  %5165 = vmatpush2.bf16.msra.mxu1 %v5164_v31  ;;  %v5254_v30 = vunpack.c.h.s8.bf16 %v669_v24  ;;  %v666_v31 = vld [vmem:[%s6189_s9 + $0xa0] sm:$0xff] }
 0x191   : > { %5111 = vmatprep.subr.bf16.mxu0 %v5110_v33  ;;  %5167 = vmatprep.subr.bf16.mxu1 %v5166_v34  ;;  %v668_v33 = vld [vmem:[%s6189_s9 + $0xb0] sm:$0xff]  ;;  %v6517_v34 = vsub.s32 5, %v6390_v7  ;;  %v3738_v7 = vrot.slane %v6422_v23, %v6512_v28  ;;  %v5204_v54 = vunpack.c.l.s8.bf16 %v666_v31 }
 0x192   : > { %v5260_v55 = vunpack.c.l.s8.bf16 %v668_v33 }
 0x194   : > { %5113 = vmatpush2.bf16.msra.mxu0 %v5112_v37  ;;  %5169 = vmatpush2.bf16.msra.mxu1 %v5168_v38  ;;  %v3538_v37 = vrot.slane %v6411_v16, %v6512_v28  ;;  %v5200_v38 = vunpack.c.h.s8.bf16 %v666_v31 }
 0x195   : > { %5115 = vmatprep.subr.bf16.mxu0 %v5114_v40  ;;  %5171 = vmatprep.subr.bf16.mxu1 %v5170_v41  ;;  %v5256_v40 = vunpack.c.h.s8.bf16 %v668_v33  ;;  %v5202_v41 = vunpack.c.l.s8.bf16 %v667_v20 }
 0x198   : > { %5117 = vmatpush2.bf16.msra.mxu0 %v5116_v45  ;;  %5173 = vmatpush2.bf16.msra.mxu1 %v5172_v46  ;;  %v3534_v45 = vrot.slane %v6411_v16, %v6517_v34  ;;  %v3542_v46 = vrot.slane %v6411_v16, %v6520_v35 }
 0x199   : > { %5175 = vmatprep.subr.bf16.mxu0 %v5174_v47  ;;  %5231 = vmatprep.subr.bf16.mxu1 %v5230_v48  ;;  %v835_v47 = vld [vmem:[%s6189_s9 + $0x5e8] sm:$0xff]  ;;  %v837_v48 = vld [vmem:[%s6189_s9 + $0x5f8] sm:$0xff] }
 0x19a   : > { %v5266_v11 = vunpack.c.l.s8.bf16 %v837_v48 }
 0x19b   : > { %3102 = vmatmul.mubr.f32.vlgmr.msra.gmra.mxu0 %v6476_v56  ;;  %3179 = vmatmul.mubr.f32.vlgmr.msra.gmra.mxu1 %v6476_v56 }
 0x19c   : > { %5177 = vmatpush1.bf16.msra.mxu0 %v5176_v50  ;;  %5233 = vmatpush1.bf16.msra.mxu1 %v5232_v51  ;;  %v3734_v50 = vrot.slane %v6422_v23, %v6517_v34  ;;  %v3742_v51 = vrot.slane %v6422_v23, %v6520_v35 }
 0x19d   : > { %5179 = vmatprep.subr.bf16.mxu0 %v5178_v52  ;;  %5235 = vmatprep.subr.bf16.mxu1 %v5234_v53 }
 0x19e   : > { %4568 = vmatprep.mubr.msk.f32.mxu0 %vm2414_vm0, %v6485_v42  ;;  %4570 = vmatprep.mubr.msk.f32.mxu1 %vm2414_vm0, %v6485_v42 }
 0x19f   : > { %3108 = vmatmul.mubr.f32.gmra.mxu0 %v6494_v62  ;;  %3185 = vmatmul.mubr.f32.gmra.mxu1 %v6494_v62 }
 0x1a0   : > { %5181 = vmatpush1.bf16.msra.mxu0 %v5180_v32  ;;  %5237 = vmatpush1.bf16.msra.mxu1 %v5236_v57  ;;  %v834_v32 = vld [vmem:[%s6189_s9 + $0x5e0] sm:$0xff] }
 0x1a1   : > { %5183 = vmatprep.subr.bf16.mxu0 %v5182_v58  ;;  %5239 = vmatprep.subr.bf16.mxu1 %v5238_v59  ;;  %v5206_v58 = vunpack.c.h.s8.bf16 %v835_v47  ;;  %v5262_v59 = vunpack.c.h.s8.bf16 %v837_v48 }
 0x1a2   : > { %4571 = vmatprep.mubr.msk.f32.mxu0 %vm2414_vm0, %v6379_v39  ;;  %4573 = vmatprep.mubr.msk.f32.mxu1 %vm2414_vm0, %v6379_v39 }
 0x1a4   : > { %5185 = vmatpush1.bf16.msra.mxu0 %v5184_v63  ;;  %5241 = vmatpush1.bf16.msra.mxu1 %v5240_v0 }
 0x1a5   : > { %5187 = vmatprep.subr.bf16.mxu0 %v5186_v1  ;;  %5243 = vmatprep.subr.bf16.mxu1 %v5242_v2  ;;  %v5208_v1 = vunpack.c.h.s8.bf16 %v834_v32 }
 0x1a8   : > { %5189 = vmatpush1.bf16.msra.mxu0 %v5188_v6  ;;  %5245 = vmatpush1.bf16.msra.mxu1 %v5244_v8  ;;  %v5264_v8 = vunpack.c.h.s8.bf16 %v836_v60 }
 0x1a9   : > { %5191 = vmatprep.subr.bf16.mxu0 %v5190_v9  ;;  %5247 = vmatprep.subr.bf16.mxu1 %v5246_v10  ;;  %v5210_v10 = vunpack.c.l.s8.bf16 %v835_v47 }
 0x1ac   : > { %5193 = vmatpush1.bf16.msra.mxu0 %v5192_v13  ;;  %5249 = vmatpush1.bf16.msra.mxu1 %v5248_v17 }
 0x1ad   : > { %5195 = vmatprep.subr.bf16.mxu0 %v5194_v18  ;;  %5251 = vmatprep.subr.bf16.mxu1 %v5250_v19  ;;  %v807_v18 = vld [vmem:[%s6189_s9 + $0x508] sm:$0xff]  ;;  %v809_v19 = vld [vmem:[%s6189_s9 + $0x518] sm:$0xff] }
 0x1b0   : > { %5197 = vmatpush1.bf16.msra.mxu0 %v5196_v25  ;;  %5253 = vmatpush1.bf16.msra.mxu1 %v5252_v26 }
 0x1b1   : > { %5199 = vmatprep.subr.bf16.mxu0 %v5198_v29  ;;  %5255 = vmatprep.subr.bf16.mxu1 %v5254_v30  ;;  %v5212_v29 = vunpack.c.l.s8.bf16 %v834_v32  ;;  %v5268_v30 = vunpack.c.l.s8.bf16 %v836_v60  ;;  %v755_v32 = vld [vmem:[%s6189_s9 + $0x368] sm:$0xff] }
 0x1b3   : > { %v2641_v4 = vpop.f32.mrf.mxu0  ;;  %v2718_v49 = vpop.f32.mrf.mxu1 }
 0x1b4   : > { %v3655_v52 = vmul.f32 %v3530_v36, %v2641_v4  ;;  %v3657_v53 = vmul.f32 %v3538_v37, %v2718_v49  ;;  %5201 = vmatpush1.bf16.msra.mxu0 %v5200_v38  ;;  %5257 = vmatpush1.bf16.msra.mxu1 %v5256_v40  ;;  %v806_v38 = vld [vmem:[%s6189_s9 + $0x500] sm:$0xff]  ;;  %v808_v40 = vld [vmem:[%s6189_s9 + $0x510] sm:$0xff] }
 0x1b5   : > { %v2643_v16 = vpop.f32.mrf.mxu0  ;;  %v2720_v57 = vpop.f32.mrf.mxu1  ;;  %5203 = vmatprep.subr.bf16.mxu0 %v5202_v41  ;;  %5259 = vmatprep.subr.bf16.mxu1 %v5258_v43  ;;  %v5216_v41 = vunpack.c.h.s8.bf16 %v806_v38  ;;  %v5272_v43 = vunpack.c.h.s8.bf16 %v808_v40  ;;  %v5220_v47 = vunpack.c.l.s8.bf16 %v806_v38  ;;  %v5276_v48 = vunpack.c.l.s8.bf16 %v808_v40  ;;  %v671_v40 = vld [vmem:[%s6189_s9 + $0xc8] sm:$0xff] }
 0x1b6   : > { %v3855_v61 = vadd.f32 %v3730_v44, %v3655_v52  ;;  %v3857_v63 = vadd.f32 %v3738_v7, %v3657_v53  ;;  %v3656_v0 = vmul.f32 %v3534_v45, %v2643_v16  ;;  %v3658_v23 = vmul.f32 %v3542_v46, %v2720_v57  ;;  %v757_v16 = vld [vmem:[%s6189_s9 + $0x378] sm:$0xff] }
 0x1b7   : > { %v2647_v2 = vpop.f32.mrf.mxu0  ;;  %v2724_v3 = vpop.f32.mrf.mxu1  ;;  %v5342_v60 = vunpack.c.h.s8.bf16 %v757_v16 }
 0x1b8   : > { %3911 = vst [vmem:[%s6449_s15 + $0x20] sm:$0xff] %v3855_v61  ;;  %3913 = vst [vmem:[%s6449_s15 + $0x30] sm:$0xff] %v3857_v63  ;;  %v3856_v5 = vadd.f32 %v3734_v50, %v3656_v0  ;;  %v3858_v6 = vadd.f32 %v3742_v51, %v3658_v23  ;;  %5205 = vmatpush1.bf16.msra.mxu0 %v5204_v54  ;;  %5261 = vmatpush1.bf16.msra.mxu1 %v5260_v55  ;;  %v754_v61 = vld [vmem:[%s6189_s9 + $0x360] sm:$0xff]  ;;  %v756_v63 = vld [vmem:[%s6189_s9 + $0x370] sm:$0xff] }
 0x1b9   : > { %v3683_v9 = vmul.f32 %v3530_v36, %v2647_v2  ;;  %5207 = vmatprep.subr.bf16.mxu0 %v5206_v58  ;;  %5263 = vmatprep.subr.bf16.mxu1 %v5262_v59  ;;  %v3685_v12 = vmul.f32 %v3538_v37, %v2724_v3  ;;  %v2649_v13 = vpop.f32.mrf.mxu0  ;;  %v2726_v17 = vpop.f32.mrf.mxu1  ;;  %v5214_v36 = vunpack.c.h.s8.bf16 %v807_v18  ;;  %v5270_v37 = vunpack.c.h.s8.bf16 %v809_v19  ;;  %v727_v3 = vld [vmem:[%s6189_s9 + $0x288] sm:$0xff] }
 0x1ba   : > { %3912 = vst [vmem:[%s6449_s15 + $0x28] sm:$0xff] %v3856_v5  ;;  %3914 = vst [vmem:[%s6449_s15 + $0x38] sm:$0xff] %v3858_v6  ;;  %v3684_v24 = vmul.f32 %v3534_v45, %v2649_v13  ;;  %v3686_v25 = vmul.f32 %v3542_v46, %v2726_v17  ;;  %v779_v45 = vld [vmem:[%s6189_s9 + $0x428] sm:$0xff]  ;;  %v781_v46 = vld [vmem:[%s6189_s9 + $0x438] sm:$0xff]  ;;  %v5286_v59 = vunpack.c.h.s8.bf16 %v755_v32  ;;  %v5288_v0 = vunpack.c.h.s8.bf16 %v754_v61 }
 0x1bb   : > { %v3883_v20 = vadd.f32 %v3730_v44, %v3683_v9  ;;  %v3885_v26 = vadd.f32 %v3738_v7, %v3685_v12  ;;  %v5218_v44 = vunpack.c.l.s8.bf16 %v807_v18  ;;  %v5274_v7 = vunpack.c.l.s8.bf16 %v809_v19  ;;  %v729_v5 = vld [vmem:[%s6189_s9 + $0x298] sm:$0xff]  ;;  %v728_v12 = vld [vmem:[%s6189_s9 + $0x290] sm:$0xff] }
 0x1bc   : > { %5209 = vmatpush2.bf16.msra.mxu0 %v5208_v1  ;;  %5265 = vmatpush2.bf16.msra.mxu1 %v5264_v8  ;;  %v3884_v31 = vadd.f32 %v3734_v50, %v3684_v24  ;;  %v3886_v33 = vadd.f32 %v3742_v51, %v3686_v25  ;;  %v5222_v4 = vunpack.c.h.s8.bf16 %v779_v45  ;;  %v5278_v49 = vunpack.c.h.s8.bf16 %v781_v46  ;;  %v778_v50 = vld [vmem:[%s6189_s9 + $0x420] sm:$0xff]  ;;  %v780_v51 = vld [vmem:[%s6189_s9 + $0x430] sm:$0xff]  ;;  %v701_v24 = vld [vmem:[%s6189_s9 + $0x1b8] sm:$0xff] }
 0x1bd   : > { %3939 = vst [vmem:[%s6449_s15 + $0x100] sm:$0xff] %v3883_v20  ;;  %5211 = vmatprep.subr.bf16.mxu0 %v5210_v10  ;;  %5267 = vmatprep.subr.bf16.mxu1 %v5266_v11  ;;  %3941 = vst [vmem:[%s6449_s15 + $0x110] sm:$0xff] %v3885_v26  ;;  %v5224_v52 = vunpack.c.h.s8.bf16 %v778_v50  ;;  %v5280_v53 = vunpack.c.h.s8.bf16 %v780_v51  ;;  %v5226_v54 = vunpack.c.l.s8.bf16 %v779_v45  ;;  %v5282_v55 = vunpack.c.l.s8.bf16 %v781_v46  ;;  %v726_v11 = vld [vmem:[%s6189_s9 + $0x280] sm:$0xff]  ;;  %v699_v20 = vld [vmem:[%s6189_s9 + $0x1a8] sm:$0xff] }
 0x1be   : > { %3940 = vst [vmem:[%s6449_s15 + $0x108] sm:$0xff] %v3884_v31  ;;  %3942 = vst [vmem:[%s6449_s15 + $0x118] sm:$0xff] %v3886_v33  ;;  %v5228_v57 = vunpack.c.l.s8.bf16 %v778_v50  ;;  %v5284_v58 = vunpack.c.l.s8.bf16 %v780_v51  ;;  %v5344_v23 = vunpack.c.h.s8.bf16 %v756_v63  ;;  %v5290_v1 = vunpack.c.l.s8.bf16 %v755_v32  ;;  %v698_v31 = vld [vmem:[%s6189_s9 + $0x1a0] sm:$0xff]  ;;  %v700_v33 = vld [vmem:[%s6189_s9 + $0x1b0] sm:$0xff] }
 0x1bf   : > { %v5346_v2 = vunpack.c.l.s8.bf16 %v757_v16  ;;  %v5292_v6 = vunpack.c.l.s8.bf16 %v754_v61  ;;  %v5348_v8 = vunpack.c.l.s8.bf16 %v756_v63  ;;  %v5294_v9 = vunpack.c.h.s8.bf16 %v727_v3 }
 0x1c0   : > { %5213 = vmatpush2.bf16.msra.mxu0 %v5212_v29  ;;  %5269 = vmatpush2.bf16.msra.mxu1 %v5268_v30  ;;  %v5350_v10 = vunpack.c.h.s8.bf16 %v729_v5  ;;  %v5296_v13 = vunpack.c.h.s8.bf16 %v726_v11  ;;  %v5352_v17 = vunpack.c.h.s8.bf16 %v728_v12  ;;  %v5298_v18 = vunpack.c.l.s8.bf16 %v727_v3 }
 0x1c1   : > { %5215 = vmatprep.subr.bf16.mxu0 %v5214_v36  ;;  %5271 = vmatprep.subr.bf16.mxu1 %v5270_v37  ;;  %v5354_v19 = vunpack.c.l.s8.bf16 %v729_v5  ;;  %v5300_v25 = vunpack.c.l.s8.bf16 %v726_v11  ;;  %v5356_v26 = vunpack.c.l.s8.bf16 %v728_v12  ;;  %v5302_v29 = vunpack.c.h.s8.bf16 %v699_v20  ;;  %v838_v5 = vld [vmem:[%s6189_s9 + $0x600] sm:$0xff]  ;;  %v840_v11 = vld [vmem:[%s6189_s9 + $0x610] sm:$0xff] }
 0x1c2   : > { %v5358_v30 = vunpack.c.h.s8.bf16 %v701_v24  ;;  %v5304_v36 = vunpack.c.h.s8.bf16 %v698_v31  ;;  %v5360_v37 = vunpack.c.h.s8.bf16 %v700_v33  ;;  %v5362_v38 = vunpack.c.l.s8.bf16 %v701_v24 }
 0x1c3   : > { %v5310_v45 = vunpack.c.h.s8.bf16 %v671_v40 }
 0x1c4   : > { %5217 = vmatpush2.bf16.msra.mxu0 %v5216_v41  ;;  %5273 = vmatpush2.bf16.msra.mxu1 %v5272_v43  ;;  %v673_v41 = vld [vmem:[%s6189_s9 + $0xd8] sm:$0xff]  ;;  %v5308_v43 = vunpack.c.l.s8.bf16 %v698_v31 }
 0x1c5   : > { %5219 = vmatprep.subr.bf16.mxu0 %v5218_v44  ;;  %5275 = vmatprep.subr.bf16.mxu1 %v5274_v7  ;;  %v5364_v44 = vunpack.c.l.s8.bf16 %v700_v33  ;;  %v6585_v7 = vld [vmem:[%s6395_s28 + $0x8] sm:$0xff]  ;;  %v5366_v46 = vunpack.c.h.s8.bf16 %v673_v41 }
 0x1c6   : > { %v3554_v50 = vrot.slane %v6585_v7, %v6408_v15  ;;  %v3550_v16 = vrot.slane %v6585_v7, %v6416_v21 }
 0x1c8   : > { %5221 = vmatpush2.bf16.msra.mxu0 %v5220_v47  ;;  %5277 = vmatpush2.bf16.msra.mxu1 %v5276_v48  ;;  %v670_v47 = vld [vmem:[%s6189_s9 + $0xc0] sm:$0xff]  ;;  %v672_v48 = vld [vmem:[%s6189_s9 + $0xd0] sm:$0xff] }
 0x1c9   : > { %5223 = vmatprep.subr.bf16.mxu0 %v5222_v4  ;;  %5279 = vmatprep.subr.bf16.mxu1 %v5278_v49  ;;  %v6590_v4 = vld [vmem:[%s6402_s6 + $0x8] sm:$0xff]  ;;  %v3546_v49 = vrot.slane %v6585_v7, %v6405_v14  ;;  %v5312_v51 = vunpack.c.h.s8.bf16 %v670_v47  ;;  %v5372_v3 = vunpack.c.l.s8.bf16 %v672_v48 }
 0x1ca   : > { %v3754_v32 = vrot.slane %v6590_v4, %v6408_v15  ;;  %v3750_v63 = vrot.slane %v6590_v4, %v6416_v21 }
 0x1cc   : > { %5225 = vmatpush2.bf16.msra.mxu0 %v5224_v52  ;;  %5281 = vmatpush2.bf16.msra.mxu1 %v5280_v53  ;;  %v5368_v52 = vunpack.c.h.s8.bf16 %v672_v48  ;;  %v5314_v53 = vunpack.c.l.s8.bf16 %v671_v40  ;;  %v813_v40 = vld [vmem:[%s6189_s9 + $0x538] sm:$0xff] }
 0x1cd   : > { %5227 = vmatprep.subr.bf16.mxu0 %v5226_v54  ;;  %5283 = vmatprep.subr.bf16.mxu1 %v5282_v55  ;;  %v5370_v54 = vunpack.c.l.s8.bf16 %v673_v41  ;;  %v3746_v55 = vrot.slane %v6590_v4, %v6405_v14 }
 0x1d0   : > { %5229 = vmatpush2.bf16.msra.mxu0 %v5228_v57  ;;  %5285 = vmatpush2.bf16.msra.mxu1 %v5284_v58  ;;  %v3558_v57 = vrot.slane %v6585_v7, %v6419_v22  ;;  %v839_v58 = vld [vmem:[%s6189_s9 + $0x608] sm:$0xff] }
 0x1d1   : > { %5287 = vmatprep.subr.bf16.mxu0 %v5286_v59  ;;  %5343 = vmatprep.subr.bf16.mxu1 %v5342_v60  ;;  %v841_v59 = vld [vmem:[%s6189_s9 + $0x618] sm:$0xff]  ;;  %v5322_v31 = vunpack.c.l.s8.bf16 %v839_v58 }
 0x1d2   : > { %v5378_v33 = vunpack.c.l.s8.bf16 %v841_v59 }
 0x1d3   : > { %3256 = vmatmul.mubr.f32.vlgmr.msra.gmra.mxu0 %v6476_v56  ;;  %3333 = vmatmul.mubr.f32.vlgmr.msra.gmra.mxu1 %v6476_v56 }
 0x1d4   : > { %5289 = vmatpush1.bf16.msra.mxu0 %v5288_v0  ;;  %5345 = vmatpush1.bf16.msra.mxu1 %v5344_v23  ;;  %v3758_v0 = vrot.slane %v6590_v4, %v6419_v22 }
 0x1d5   : > { %5291 = vmatprep.subr.bf16.mxu0 %v5290_v1  ;;  %5347 = vmatprep.subr.bf16.mxu1 %v5346_v2  ;;  %v5316_v2 = vunpack.c.l.s8.bf16 %v670_v47  ;;  %v5380_v47 = vunpack.c.l.s8.bf16 %v840_v11 }
 0x1d6   : > { %4572 = vmatprep.mubr.msk.f32.mxu0 %vm2414_vm0, %v6485_v42  ;;  %4574 = vmatprep.mubr.msk.f32.mxu1 %vm2414_vm0, %v6485_v42 }
 0x1d7   : > { %3262 = vmatmul.mubr.f32.gmra.mxu0 %v6494_v62  ;;  %3339 = vmatmul.mubr.f32.gmra.mxu1 %v6494_v62 }
 0x1d8   : > { %5293 = vmatpush1.bf16.msra.mxu0 %v5292_v6  ;;  %5349 = vmatpush1.bf16.msra.mxu1 %v5348_v8 }
 0x1d9   : > { %5295 = vmatprep.subr.bf16.mxu0 %v5294_v9  ;;  %5351 = vmatprep.subr.bf16.mxu1 %v5350_v10  ;;  %v5318_v9 = vunpack.c.h.s8.bf16 %v839_v58  ;;  %v5374_v10 = vunpack.c.h.s8.bf16 %v841_v59  ;;  %v785_v58 = vld [vmem:[%s6189_s9 + $0x458] sm:$0xff] }
 0x1da   : > { %4575 = vmatprep.mubr.msk.f32.mxu0 %vm2414_vm0, %v6379_v39  ;;  %4577 = vmatprep.mubr.msk.f32.mxu1 %vm2414_vm0, %v6379_v39  ;;  %v5306_v39 = vunpack.c.l.s8.bf16 %v699_v20 }
 0x1dc   : > { %5297 = vmatpush1.bf16.msra.mxu0 %v5296_v13  ;;  %5353 = vmatpush1.bf16.msra.mxu1 %v5352_v17 }
 0x1dd   : > { %5299 = vmatprep.subr.bf16.mxu0 %v5298_v18  ;;  %5355 = vmatprep.subr.bf16.mxu1 %v5354_v19  ;;  %v5320_v19 = vunpack.c.h.s8.bf16 %v838_v5 }
 0x1e0   : > { %5301 = vmatpush1.bf16.msra.mxu0 %v5300_v25  ;;  %5357 = vmatpush1.bf16.msra.mxu1 %v5356_v26 }
 0x1e1   : > { %5303 = vmatprep.subr.bf16.mxu0 %v5302_v29  ;;  %5359 = vmatprep.subr.bf16.mxu1 %v5358_v30  ;;  %v5376_v29 = vunpack.c.h.s8.bf16 %v840_v11  ;;  %v3762_v11 = vrot.slane %v6590_v4, %v6509_v27 }
 0x1e4   : > { %5305 = vmatpush1.bf16.msra.mxu0 %v5304_v36  ;;  %5361 = vmatpush1.bf16.msra.mxu1 %v5360_v37 }
 0x1e5   : > { %5307 = vmatprep.subr.bf16.mxu0 %v5306_v39  ;;  %5363 = vmatprep.subr.bf16.mxu1 %v5362_v38  ;;  %v811_v38 = vld [vmem:[%s6189_s9 + $0x528] sm:$0xff] }
 0x1e8   : > { %5309 = vmatpush1.bf16.msra.mxu0 %v5308_v43  ;;  %5365 = vmatpush1.bf16.msra.mxu1 %v5364_v44 }
 0x1e9   : > { %5311 = vmatprep.subr.bf16.mxu0 %v5310_v45  ;;  %5367 = vmatprep.subr.bf16.mxu1 %v5366_v46  ;;  %v5324_v46 = vunpack.c.l.s8.bf16 %v838_v5  ;;  %v5394_v5 = vunpack.c.l.s8.bf16 %v785_v58 }
 0x1eb   : > { %v2795_v60 = vpop.f32.mrf.mxu0  ;;  %v2872_v61 = vpop.f32.mrf.mxu1 }
 0x1ec   : > { %v3659_v23 = vmul.f32 %v3546_v49, %v2795_v60  ;;  %v3661_v1 = vmul.f32 %v3554_v50, %v2872_v61  ;;  %5313 = vmatpush1.bf16.msra.mxu0 %v5312_v51  ;;  %5369 = vmatpush1.bf16.msra.mxu1 %v5368_v52  ;;  %v5382_v51 = vunpack.c.h.s8.bf16 %v813_v40  ;;  %v810_v52 = vld [vmem:[%s6189_s9 + $0x520] sm:$0xff] }
 0x1ed   : > { %v2797_v6 = vpop.f32.mrf.mxu0  ;;  %v2874_v8 = vpop.f32.mrf.mxu1  ;;  %5315 = vmatprep.subr.bf16.mxu0 %v5314_v53  ;;  %5371 = vmatprep.subr.bf16.mxu1 %v5370_v54  ;;  %v812_v53 = vld [vmem:[%s6189_s9 + $0x530] sm:$0xff]  ;;  %v5328_v54 = vunpack.c.h.s8.bf16 %v810_v52  ;;  %v5332_v59 = vunpack.c.l.s8.bf16 %v810_v52 }
 0x1ee   : > { %v3859_v12 = vadd.f32 %v3746_v55, %v3659_v23  ;;  %v3861_v13 = vadd.f32 %v3754_v32, %v3661_v1  ;;  %v3660_v17 = vmul.f32 %v3550_v16, %v2797_v6  ;;  %v3662_v18 = vmul.f32 %v3558_v57, %v2874_v8  ;;  %v784_v23 = vld [vmem:[%s6189_s9 + $0x450] sm:$0xff] }
 0x1ef   : > { %v2801_v20 = vpop.f32.mrf.mxu0  ;;  %v2878_v24 = vpop.f32.mrf.mxu1  ;;  %v5388_v60 = vunpack.c.l.s8.bf16 %v812_v53  ;;  %v5396_v8 = vunpack.c.l.s8.bf16 %v784_v23 }
 0x1f0   : > { %3915 = vst [vmem:[%s6449_s15 + $0x40] sm:$0xff] %v3859_v12  ;;  %3917 = vst [vmem:[%s6449_s15 + $0x50] sm:$0xff] %v3861_v13  ;;  %v3860_v25 = vadd.f32 %v3750_v63, %v3660_v17  ;;  %v3862_v26 = vadd.f32 %v3758_v0, %v3662_v18  ;;  %5317 = vmatpush1.bf16.msra.mxu0 %v5316_v2  ;;  %5373 = vmatpush1.bf16.msra.mxu1 %v5372_v3  ;;  %v5392_v2 = vunpack.c.h.s8.bf16 %v784_v23 }
 0x1f1   : > { %v3687_v30 = vmul.f32 %v3546_v49, %v2801_v20  ;;  %5319 = vmatprep.subr.bf16.mxu0 %v5318_v9  ;;  %5375 = vmatprep.subr.bf16.mxu1 %v5374_v10  ;;  %v3689_v36 = vmul.f32 %v3554_v50, %v2878_v24  ;;  %v2803_v37 = vpop.f32.mrf.mxu0  ;;  %v2880_v39 = vpop.f32.mrf.mxu1  ;;  %v5326_v50 = vunpack.c.h.s8.bf16 %v811_v38  ;;  %v3562_v9 = vrot.slane %v6585_v7, %v6509_v27 }
 0x1f2   : > { %3916 = vst [vmem:[%s6449_s15 + $0x48] sm:$0xff] %v3860_v25  ;;  %3918 = vst [vmem:[%s6449_s15 + $0x58] sm:$0xff] %v3862_v26  ;;  %v3688_v43 = vmul.f32 %v3550_v16, %v2803_v37  ;;  %v3690_v44 = vmul.f32 %v3558_v57, %v2880_v39  ;;  %v5386_v16 = vunpack.c.l.s8.bf16 %v813_v40  ;;  %v783_v57 = vld [vmem:[%s6189_s9 + $0x448] sm:$0xff]  ;;  %v3570_v10 = vrot.slane %v6585_v7, %v6512_v28 }
 0x1f3   : > { %v3887_v41 = vadd.f32 %v3746_v55, %v3687_v30  ;;  %v3889_v45 = vadd.f32 %v3754_v32, %v3689_v36  ;;  %v5384_v55 = vunpack.c.h.s8.bf16 %v812_v53  ;;  %v5330_v32 = vunpack.c.l.s8.bf16 %v811_v38 }
 0x1f4   : > { %5321 = vmatpush2.bf16.msra.mxu0 %v5320_v19  ;;  %5377 = vmatpush2.bf16.msra.mxu1 %v5376_v29  ;;  %v3888_v48 = vadd.f32 %v3750_v63, %v3688_v43  ;;  %v3890_v49 = vadd.f32 %v3758_v0, %v3690_v44  ;;  %v5334_v61 = vunpack.c.h.s8.bf16 %v783_v57  ;;  %v5390_v63 = vunpack.c.h.s8.bf16 %v785_v58  ;;  %v782_v0 = vld [vmem:[%s6189_s9 + $0x440] sm:$0xff]  ;;  %s3971_s9 = ssub.s32 (%p5769_p5), 162, %s6365_s20 }
 0x1f5   : > { %3943 = vst [vmem:[%s6449_s15 + $0x120] sm:$0xff] %v3887_v41  ;;  %5323 = vmatprep.subr.bf16.mxu0 %v5322_v31  ;;  %5379 = vmatprep.subr.bf16.mxu1 %v5378_v33  ;;  %3945 = vst [vmem:[%s6449_s15 + $0x130] sm:$0xff] %v3889_v45  ;;  %v5336_v1 = vunpack.c.h.s8.bf16 %v782_v0  ;;  %v5338_v3 = vunpack.c.l.s8.bf16 %v783_v57  ;;  %v5340_v6 = vunpack.c.l.s8.bf16 %v782_v0  ;;  %v3566_v12 = vrot.slane %v6585_v7, %v6517_v34  ;;  %p3972_p11 = scmp.lt.s32.totalorder (%p5769_p5), %s3971_s9, 28 }
 0x1f6   : > { %3944 = vst [vmem:[%s6449_s15 + $0x128] sm:$0xff] %v3888_v48  ;;  %3946 = vst [vmem:[%s6449_s15 + $0x138] sm:$0xff] %v3890_v49  ;;  %v3766_v19 = vrot.slane %v6590_v4, %v6517_v34  ;;  %v3774_v20 = vrot.slane %v6590_v4, %v6520_v35  ;;  %v3505_v48 = vld [vmem:[%s6395_s28 + $0x10] sm:$0xff] }
 0x1f7   : > { %v3501_v49 = vld [vmem:[%s6402_s6 + $0x10] sm:$0xff] }
 0x1f8   : > { %5325 = vmatpush2.bf16.msra.mxu0 %v5324_v46  ;;  %5381 = vmatpush2.bf16.msra.mxu1 %v5380_v47  ;;  %v3778_v52 = vrot.slane %v3501_v49, %v6405_v14  ;;  %v3786_v53 = vrot.slane %v3501_v49, %v6408_v15 }
 0x1f9   : > { %5327 = vmatprep.subr.bf16.mxu0 %v5326_v50  ;;  %5383 = vmatprep.subr.bf16.mxu1 %v5382_v51  ;;  %v3578_v50 = vrot.slane %v3505_v48, %v6405_v14  ;;  %v3586_v51 = vrot.slane %v3505_v48, %v6408_v15 }
 0x1fc   : > { %5329 = vmatpush2.bf16.msra.mxu0 %v5328_v54  ;;  %5385 = vmatpush2.bf16.msra.mxu1 %v5384_v55  ;;  %v3582_v54 = vrot.slane %v3505_v48, %v6416_v21  ;;  %v3590_v55 = vrot.slane %v3505_v48, %v6419_v22 }
 0x1fd   : > { %5331 = vmatprep.subr.bf16.mxu0 %v5330_v32  ;;  %5387 = vmatprep.subr.bf16.mxu1 %v5386_v16 }
 0x200   : > { %5333 = vmatpush2.bf16.msra.mxu0 %v5332_v59  ;;  %5389 = vmatpush2.bf16.msra.mxu1 %v5388_v60  ;;  %v3782_v59 = vrot.slane %v3501_v49, %v6416_v21  ;;  %v3790_v60 = vrot.slane %v3501_v49, %v6419_v22 }
 0x201   : > { %5335 = vmatprep.subr.bf16.mxu0 %v5334_v61  ;;  %5391 = vmatprep.subr.bf16.mxu1 %v5390_v63 }
 0x204   : > { %5337 = vmatpush2.bf16.msra.mxu0 %v5336_v1  ;;  %5393 = vmatpush2.bf16.msra.mxu1 %v5392_v2 }
 0x205   : > { %5339 = vmatprep.subr.bf16.mxu0 %v5338_v3  ;;  %5395 = vmatprep.subr.bf16.mxu1 %v5394_v5 }
 0x208   : > { %5341 = vmatpush2.bf16.msra.mxu0 %v5340_v6  ;;  %5397 = vmatpush2.bf16.msra.mxu1 %v5396_v8 }
 0x20b   : > { %3410 = vmatmul.mubr.f32.vlgmr.msra.gmra.mxu0 %v6476_v56  ;;  %3487 = vmatmul.mubr.f32.vlgmr.msra.gmra.mxu1 %v6476_v56  ;;  %v3770_v56 = vrot.slane %v6590_v4, %v6512_v28 }
 0x20c   : > { %4576 = vmatprep.mubr.msk.f32.mxu0 %vm2414_vm0, %v6485_v42  ;;  %4578 = vmatprep.mubr.msk.f32.mxu1 %vm2414_vm0, %v6485_v42  ;;  %v3574_v42 = vrot.slane %v6585_v7, %v6520_v35 }
 0x20f   : > { %3416 = vmatmul.mubr.f32.gmra.mxu0 %v6494_v62  ;;  %3493 = vmatmul.mubr.f32.gmra.mxu1 %v6494_v62 }
 0x223   : > { %v2949_v62 = vpop.f32.mrf.mxu0  ;;  %v3026_v13 = vpop.f32.mrf.mxu1 }
 0x224   : > { %v3663_v17 = vmul.f32 %v3562_v9, %v2949_v62  ;;  %v3665_v18 = vmul.f32 %v3570_v10, %v3026_v13 }
 0x225   : > { %v2951_v24 = vpop.f32.mrf.mxu0  ;;  %v3028_v25 = vpop.f32.mrf.mxu1 }
 0x226   : > { %v3863_v26 = vadd.f32 %v3762_v11, %v3663_v17  ;;  %v3865_v29 = vadd.f32 %v3770_v56, %v3665_v18  ;;  %v3664_v30 = vmul.f32 %v3566_v12, %v2951_v24  ;;  %v3666_v31 = vmul.f32 %v3574_v42, %v3028_v25 }
 0x227   : > { %v2955_v7 = vpop.f32.mrf.mxu0  ;;  %v3032_v33 = vpop.f32.mrf.mxu1  ;;  %v3794_v24 = vrot.slane %v3501_v49, %v6509_v27  ;;  %v3802_v25 = vrot.slane %v3501_v49, %v6512_v28 }
 0x228   : > { %3919 = vst [vmem:[%s6449_s15 + $0x60] sm:$0xff] %v3863_v26  ;;  %3921 = vst [vmem:[%s6449_s15 + $0x70] sm:$0xff] %v3865_v29  ;;  %v3864_v36 = vadd.f32 %v3766_v19, %v3664_v30  ;;  %v3866_v37 = vadd.f32 %v3774_v20, %v3666_v31  ;;  %v3691_v39 = vmul.f32 %v3562_v9, %v2955_v7 }
 0x229   : > { %v3693_v4 = vmul.f32 %v3570_v10, %v3032_v33  ;;  %v2957_v38 = vpop.f32.mrf.mxu0  ;;  %v3034_v40 = vpop.f32.mrf.mxu1  ;;  %v3598_v26 = vrot.slane %v3505_v48, %v6517_v34  ;;  %v3606_v29 = vrot.slane %v3505_v48, %v6520_v35 }
 0x22a   : > { %3920 = vst [vmem:[%s6449_s15 + $0x68] sm:$0xff] %v3864_v36  ;;  %3922 = vst [vmem:[%s6449_s15 + $0x78] sm:$0xff] %v3866_v37  ;;  %v3891_v41 = vadd.f32 %v3762_v11, %v3691_v39  ;;  %v3692_v44 = vmul.f32 %v3566_v12, %v2957_v38  ;;  %v3694_v45 = vmul.f32 %v3574_v42, %v3034_v40 }
 0x22b   : > { %v3893_v43 = vadd.f32 %v3770_v56, %v3693_v4  ;;  %v3798_v36 = vrot.slane %v3501_v49, %v6517_v34  ;;  %v3806_v37 = vrot.slane %v3501_v49, %v6520_v35 }
 0x22c   : > { %3947 = vst [vmem:[%s6449_s15 + $0x140] sm:$0xff] %v3891_v41  ;;  %v3892_v46 = vadd.f32 %v3766_v19, %v3692_v44  ;;  %v3894_v47 = vadd.f32 %v3774_v20, %v3694_v45  ;;  %v3594_v19 = vrot.slane %v3505_v48, %v6509_v27  ;;  %v3602_v20 = vrot.slane %v3505_v48, %v6512_v28 }
 0x22d   : > { %3949 = vst [vmem:[%s6449_s15 + $0x150] sm:$0xff] %v3893_v43 }
 0x22e   : > { %3948 = vst [vmem:[%s6449_s15 + $0x148] sm:$0xff] %v3892_v46  ;;  %3950 = vst [vmem:[%s6449_s15 + $0x158] sm:$0xff] %v3894_v47 }
 0x25b   : > { %v3103_v32 = vpop.f32.mrf.mxu0  ;;  %v3180_v16 = vpop.f32.mrf.mxu1 }
 0x25c   : > { %v3667_v57 = vmul.f32 %v3578_v50, %v3103_v32  ;;  %v3669_v58 = vmul.f32 %v3586_v51, %v3180_v16 }
 0x25d   : > { %v3105_v61 = vpop.f32.mrf.mxu0  ;;  %v3182_v63 = vpop.f32.mrf.mxu1 }
 0x25e   : > { %v3867_v0 = vadd.f32 %v3778_v52, %v3667_v57  ;;  %v3869_v23 = vadd.f32 %v3786_v53, %v3669_v58  ;;  %v3668_v1 = vmul.f32 %v3582_v54, %v3105_v61  ;;  %v3670_v2 = vmul.f32 %v3590_v55, %v3182_v63 }
 0x25f   : > { %v3109_v3 = vpop.f32.mrf.mxu0  ;;  %v3186_v5 = vpop.f32.mrf.mxu1 }
 0x260   : > { %3923 = vst [vmem:[%s6449_s15 + $0x80] sm:$0xff] %v3867_v0  ;;  %3925 = vst [vmem:[%s6449_s15 + $0x90] sm:$0xff] %v3869_v23  ;;  %v3868_v6 = vadd.f32 %v3782_v59, %v3668_v1  ;;  %v3870_v8 = vadd.f32 %v3790_v60, %v3670_v2  ;;  %v3695_v9 = vmul.f32 %v3578_v50, %v3109_v3 }
 0x261   : > { %v3697_v10 = vmul.f32 %v3586_v51, %v3186_v5  ;;  %v3111_v11 = vpop.f32.mrf.mxu0  ;;  %v3188_v56 = vpop.f32.mrf.mxu1 }
 0x262   : > { %3924 = vst [vmem:[%s6449_s15 + $0x88] sm:$0xff] %v3868_v6  ;;  %3926 = vst [vmem:[%s6449_s15 + $0x98] sm:$0xff] %v3870_v8  ;;  %v3895_v12 = vadd.f32 %v3778_v52, %v3695_v9  ;;  %v3696_v62 = vmul.f32 %v3582_v54, %v3111_v11  ;;  %v3698_v13 = vmul.f32 %v3590_v55, %v3188_v56  ;;  %v3506_v54 = vld [vmem:[%s6395_s28 + $0x18] sm:$0xf] }
 0x263   : > { %v3897_v42 = vadd.f32 %v3786_v53, %v3697_v10  ;;  %v3502_v55 = vld [vmem:[%s6402_s6 + $0x18] sm:$0xf]  ;;  %v3610_v32 = vrot.slane %v3506_v54, %v6405_v14  ;;  %v3618_v16 = vrot.slane %v3506_v54, %v6408_v15 }
 0x264   : > { %3951 = vst [vmem:[%s6449_s15 + $0x160] sm:$0xff] %v3895_v12  ;;  %v3896_v17 = vadd.f32 %v3782_v59, %v3696_v62  ;;  %v3898_v18 = vadd.f32 %v3790_v60, %v3698_v13  ;;  %v3810_v57 = vrot.slane %v3502_v55, %v6405_v14  ;;  %v3818_v58 = vrot.slane %v3502_v55, %v6408_v15 }
 0x265   : > { %3953 = vst [vmem:[%s6449_s15 + $0x170] sm:$0xff] %v3897_v42  ;;  %v3614_v59 = vrot.slane %v3506_v54, %v6416_v21  ;;  %v3622_v60 = vrot.slane %v3506_v54, %v6419_v22  ;;  %v3814_v1 = vrot.slane %v3502_v55, %v6416_v21  ;;  %v3822_v2 = vrot.slane %v3502_v55, %v6419_v22 }
 0x266   : > { %3952 = vst [vmem:[%s6449_s15 + $0x168] sm:$0xff] %v3896_v17  ;;  %3954 = vst [vmem:[%s6449_s15 + $0x178] sm:$0xff] %v3898_v18 }
 0x293   : > { %v3257_v30 = vpop.f32.mrf.mxu0  ;;  %v3334_v31 = vpop.f32.mrf.mxu1 }
 0x294   : > { %v3671_v7 = vmul.f32 %v3594_v19, %v3257_v30  ;;  %v3673_v33 = vmul.f32 %v3602_v20, %v3334_v31 }
 0x295   : > { %v3259_v39 = vpop.f32.mrf.mxu0  ;;  %v3336_v4 = vpop.f32.mrf.mxu1 }
 0x296   : > { %v3871_v27 = vadd.f32 %v3794_v24, %v3671_v7  ;;  %v3873_v28 = vadd.f32 %v3802_v25, %v3673_v33  ;;  %v3672_v38 = vmul.f32 %v3598_v26, %v3259_v39  ;;  %v3674_v40 = vmul.f32 %v3606_v29, %v3336_v4 }
 0x297   : > { %v3263_v41 = vpop.f32.mrf.mxu0  ;;  %v3340_v43 = vpop.f32.mrf.mxu1 }
 0x298   : > { %3927 = vst [vmem:[%s6449_s15 + $0xa0] sm:$0xff] %v3871_v27  ;;  %3929 = vst [vmem:[%s6449_s15 + $0xb0] sm:$0xff] %v3873_v28  ;;  %v3872_v44 = vadd.f32 %v3798_v36, %v3672_v38  ;;  %v3874_v45 = vadd.f32 %v3806_v37, %v3674_v40  ;;  %v3699_v34 = vmul.f32 %v3594_v19, %v3263_v41 }
 0x299   : > { %v3701_v35 = vmul.f32 %v3602_v20, %v3340_v43  ;;  %v3265_v46 = vpop.f32.mrf.mxu0  ;;  %v3342_v47 = vpop.f32.mrf.mxu1 }
 0x29a   : > { %3928 = vst [vmem:[%s6449_s15 + $0xa8] sm:$0xff] %v3872_v44  ;;  %3930 = vst [vmem:[%s6449_s15 + $0xb8] sm:$0xff] %v3874_v45  ;;  %v3899_v48 = vadd.f32 %v3794_v24, %v3699_v34  ;;  %v3700_v50 = vmul.f32 %v3598_v26, %v3265_v46  ;;  %v3702_v51 = vmul.f32 %v3606_v29, %v3342_v47 }
 0x29b   : > { %v3901_v49 = vadd.f32 %v3802_v25, %v3701_v35 }
 0x29c   : > { %3955 = vst [vmem:[%s6449_s15 + $0x180] sm:$0xff] %v3899_v48  ;;  %v3900_v52 = vadd.f32 %v3798_v36, %v3700_v50  ;;  %v3902_v53 = vadd.f32 %v3806_v37, %v3702_v51 }
 0x29d   : > { %3957 = vst [vmem:[%s6449_s15 + $0x190] sm:$0xff] %v3901_v49 }
 0x29e   : > { %3956 = vst [vmem:[%s6449_s15 + $0x188] sm:$0xff] %v3900_v52  ;;  %3958 = vst [vmem:[%s6449_s15 + $0x198] sm:$0xff] %v3902_v53 }
 0x2cb   : > { %v3411_v61 = vpop.f32.mrf.mxu0  ;;  %v3488_v63 = vpop.f32.mrf.mxu1 }
 0x2cc   : > { %v3675_v0 = vmul.f32 %v3610_v32, %v3411_v61  ;;  %v3677_v23 = vmul.f32 %v3618_v16, %v3488_v63 }
 0x2cd   : > { %v3413_v3 = vpop.f32.mrf.mxu0  ;;  %v3490_v5 = vpop.f32.mrf.mxu1 }
 0x2ce   : > { %v3875_v14 = vadd.f32 %v3810_v57, %v3675_v0  ;;  %v3877_v15 = vadd.f32 %v3818_v58, %v3677_v23  ;;  %v3676_v6 = vmul.f32 %v3614_v59, %v3413_v3  ;;  %v3678_v8 = vmul.f32 %v3622_v60, %v3490_v5 }
 0x2cf   : > { %v3417_v9 = vpop.f32.mrf.mxu0  ;;  %v3494_v10 = vpop.f32.mrf.mxu1 }
 0x2d0   : > { %3931 = vst [vmem:[%s6449_s15 + $0xc0] sm:$0xff] %v3875_v14  ;;  %3933 = vst [vmem:[%s6449_s15 + $0xd0] sm:$0xff] %v3877_v15  ;;  %v3876_v11 = vadd.f32 %v3814_v1, %v3676_v6  ;;  %v3878_v56 = vadd.f32 %v3822_v2, %v3678_v8  ;;  %v3703_v21 = vmul.f32 %v3610_v32, %v3417_v9 }
 0x2d1   : > { %v3705_v22 = vmul.f32 %v3618_v16, %v3494_v10  ;;  %v3419_v12 = vpop.f32.mrf.mxu0  ;;  %v3496_v42 = vpop.f32.mrf.mxu1 }
 0x2d2   : > { %3932 = vst [vmem:[%s6449_s15 + $0xc8] sm:$0xff] %v3876_v11  ;;  %3934 = vst [vmem:[%s6449_s15 + $0xd8] sm:$0xff] %v3878_v56  ;;  %v3903_v62 = vadd.f32 %v3810_v57, %v3703_v21  ;;  %v3704_v17 = vmul.f32 %v3614_v59, %v3419_v12  ;;  %v3706_v18 = vmul.f32 %v3622_v60, %v3496_v42  ;;  %3969 = sbr.rel (!%p5769_p5) target bundleno = 875 (0x36b), region = 63 }
 0x2d3   : > { %v3905_v13 = vadd.f32 %v3818_v58, %v3705_v22 }
 0x2d4   : > { %3959 = vst [vmem:[%s6449_s15 + $0x1a0] sm:$0xff] %v3903_v62  ;;  %v3904_v19 = vadd.f32 %v3814_v1, %v3704_v17  ;;  %v3906_v20 = vadd.f32 %v3822_v2, %v3706_v18 }
 0x2d5   : > { %3961 = vst [vmem:[%s6449_s15 + $0x1b0] sm:$0xff] %v3905_v13 }
 0x2d6   : > { %3960 = vst [vmem:[%s6449_s15 + $0x1a8] sm:$0xff] %v3904_v19  ;;  %3962 = vst [vmem:[%s6449_s15 + $0x1b8] sm:$0xff] %v3906_v20 }
 0x2d7   : > { %s7154_s9 = smov (!%p3972_p11, %s3971_s9), 28 }
 0x2d8   : > { %s4579_s25 = sshll.u32 %s7154_s9, 8  ;;  %s6721_s26 = sshll.u32 %s7154_s9, 3 }
 0x2d9   : > { %p4583_p12 = scmp.eq.s32.totalorder %s4579_s25, 0 }
 0x2da   : > { %p3982_p13 = scmp.lt.u32.totalorder (!%p4583_p12), %s6721_s26, 8 }
 0x2db   : > { %3981 = sbr.rel (%p4583_p12) target bundleno = 875 (0x36b), region = 67 }
 0x2e0   : > { %3985 = sbr.rel (%p3982_p13) target bundleno = 865 (0x361), region = 71  ;;  %s6725_s23 = sand.u32 (!%p3982_p13), 7, %s6721_s26  }
 0x2e1   : > { %p4004_p0 = scmp.eq.s32.totalorder (!%p3982_p13), %s6725_s23, 0  ;;  %p4584_p1 = scmp.ne.s32.totalorder (!%p3982_p13), %s6725_s23, 0 }
 0x2e5   : > { %4007 = sbr.rel (%p4584_p1) target bundleno = 800 (0x320), region = 86  ;;  %s4008_s18 = sshrl.u32 (!%p4584_p1), %s6721_s26, 3 }
 0x2e6   : > { %s6732_s20 = sshrl.u32 (!%p4584_p1), %s4008_s18, 5 }
 0x2e7   : > { %p4585_p2 = scmp.le.s32.totalorder (!%p4584_p1), %s6732_s20, 0 }
 0x2ea   : > { %4462 = sbr.rel (%p4585_p2) target bundleno = 784 (0x310), region = 178  ;;  %s7140_s27 = smov (!%p4585_p2), %s6719_s24 }
 0x2eb   : > { %s7141_s28 = smov (!%p4585_p2), %s6449_s15  ;;  %s6741_s29 = smov (!%p4585_p2), 0  }
 0x2ec   : > { %s6743_s30 = smov (!%p4585_p2), 0  }
 0x2ef LB: >> { %v4021_v24 = vld [vmem:[%s5653_s28] sm:$0xff]  ;;  %v4023_v25 = vld [vmem:[%s5653_s28 + $0x8] sm:$0xff]  ;;  %v4025_v26 = vld [vmem:[%s5653_s28 + $0x10] sm:$0xff]  ;;  %s4149_s6 = sadd.s32 1, %s5657_s29  ;;  %s4015_s30 = sadd.s32 1, %s5661_s30   ;;  %s5661_s30 = sphi %s6743_s30, %s4015_s30   ;;  %s5657_s29 = sphi %s6741_s29, %s7144_s29   ;;  %s5653_s28 = sphi %s7141_s28, %s7143_s28   ;;  %s5649_s27 = sphi %s7140_s27, %s7142_s27  }
 0x2f0   : >> { %4022 = vst [vmem:[%s5649_s27] sm:$0xff] %v4021_v24  ;;  %4024 = vst [vmem:[%s5649_s27 + $0x8] sm:$0xff] %v4023_v25  ;;  %v4027_v29 = vld [vmem:[%s5653_s28 + $0x18] sm:$0xff]  ;;  %v4029_v30 = vld [vmem:[%s5653_s28 + $0x20] sm:$0xff]  ;;  %p4150_p3 = scmp.ge.s32.totalorder %s4149_s6, %s6732_s20  ;;  %p4014_p4 = scmp.ge.s32.totalorder %s4015_s30, %s6732_s20 }
 0x2f1   : >> { %4026 = vst [vmem:[%s5649_s27 + $0x10] sm:$0xff] %v4025_v26  ;;  %v4031_v31 = vld [vmem:[%s5653_s28 + $0x28] sm:$0xff]  ;;  %4028 = vst [vmem:[%s5649_s27 + $0x18] sm:$0xff] %v4027_v29  ;;  %v4033_v7 = vld [vmem:[%s5653_s28 + $0x30] sm:$0xff] }
 0x2f2   : >> { %4030 = vst [vmem:[%s5649_s27 + $0x20] sm:$0xff] %v4029_v30  ;;  %4032 = vst [vmem:[%s5649_s27 + $0x28] sm:$0xff] %v4031_v31  ;;  %v4035_v33 = vld [vmem:[%s5653_s28 + $0x38] sm:$0xff]  ;;  %v4037_v36 = vld [vmem:[%s5653_s28 + $0x40] sm:$0xff]  ;;  %s7156_s6 = smov (%p4150_p3, %s4149_s6), 0 }
 0x2f3   : >> { %4034 = vst [vmem:[%s5649_s27 + $0x30] sm:$0xff] %v4033_v7  ;;  %4036 = vst [vmem:[%s5649_s27 + $0x38] sm:$0xff] %v4035_v33  ;;  %v4039_v37 = vld [vmem:[%s5653_s28 + $0x48] sm:$0xff]  ;;  %v4041_v39 = vld [vmem:[%s5653_s28 + $0x50] sm:$0xff]  ;;  %s4586_s7 = sshll.u32 %s7156_s6, 8  ;;  %s7144_s29 = smov %s7156_s6 }
 0x2f4   : >> { %4038 = vst [vmem:[%s5649_s27 + $0x40] sm:$0xff] %v4037_v36  ;;  %v4043_v4 = vld [vmem:[%s5653_s28 + $0x58] sm:$0xff]  ;;  %4040 = vst [vmem:[%s5649_s27 + $0x48] sm:$0xff] %v4039_v37  ;;  %v4045_v27 = vld [vmem:[%s5653_s28 + $0x60] sm:$0xff]  ;;  %s6799_s5 = scalar_lea.vmem %s6449_s15, %s4586_s7 [#allocation3]   ;;  %s6802_s8 = scalar_lea.vmem %s6719_s24, %s4586_s7  }
 0x2f5   : >> { %4042 = vst [vmem:[%s5649_s27 + $0x50] sm:$0xff] %v4041_v39  ;;  %4044 = vst [vmem:[%s5649_s27 + $0x58] sm:$0xff] %v4043_v4  ;;  %v4047_v28 = vld [vmem:[%s5653_s28 + $0x68] sm:$0xff]  ;;  %v4049_v38 = vld [vmem:[%s5653_s28 + $0x70] sm:$0xff] }
 0x2f6   : >> { %4046 = vst [vmem:[%s5649_s27 + $0x60] sm:$0xff] %v4045_v27  ;;  %4048 = vst [vmem:[%s5649_s27 + $0x68] sm:$0xff] %v4047_v28  ;;  %v4051_v40 = vld [vmem:[%s5653_s28 + $0x78] sm:$0xff]  ;;  %v4053_v41 = vld [vmem:[%s5653_s28 + $0x80] sm:$0xff] }
 0x2f7   : >> { %4050 = vst [vmem:[%s5649_s27 + $0x70] sm:$0xff] %v4049_v38  ;;  %v4055_v43 = vld [vmem:[%s5653_s28 + $0x88] sm:$0xff]  ;;  %4052 = vst [vmem:[%s5649_s27 + $0x78] sm:$0xff] %v4051_v40  ;;  %v4057_v44 = vld [vmem:[%s5653_s28 + $0x90] sm:$0xff] }
 0x2f8   : >> { %4054 = vst [vmem:[%s5649_s27 + $0x80] sm:$0xff] %v4053_v41  ;;  %4056 = vst [vmem:[%s5649_s27 + $0x88] sm:$0xff] %v4055_v43  ;;  %v4059_v45 = vld [vmem:[%s5653_s28 + $0x98] sm:$0xff]  ;;  %v4061_v34 = vld [vmem:[%s5653_s28 + $0xa0] sm:$0xff] }
 0x2f9   : >> { %4058 = vst [vmem:[%s5649_s27 + $0x90] sm:$0xff] %v4057_v44  ;;  %4060 = vst [vmem:[%s5649_s27 + $0x98] sm:$0xff] %v4059_v45  ;;  %v4063_v35 = vld [vmem:[%s5653_s28 + $0xa8] sm:$0xff]  ;;  %v4065_v46 = vld [vmem:[%s5653_s28 + $0xb0] sm:$0xff] }
 0x2fa   : >> { %4062 = vst [vmem:[%s5649_s27 + $0xa0] sm:$0xff] %v4061_v34  ;;  %v4067_v47 = vld [vmem:[%s5653_s28 + $0xb8] sm:$0xff]  ;;  %4064 = vst [vmem:[%s5649_s27 + $0xa8] sm:$0xff] %v4063_v35  ;;  %v4069_v48 = vld [vmem:[%s5653_s28 + $0xc0] sm:$0xff] }
 0x2fb   : >> { %4066 = vst [vmem:[%s5649_s27 + $0xb0] sm:$0xff] %v4065_v46  ;;  %4068 = vst [vmem:[%s5649_s27 + $0xb8] sm:$0xff] %v4067_v47  ;;  %v4071_v49 = vld [vmem:[%s5653_s28 + $0xc8] sm:$0xff]  ;;  %v4073_v50 = vld [vmem:[%s5653_s28 + $0xd0] sm:$0xff] }
 0x2fc   : >> { %4070 = vst [vmem:[%s5649_s27 + $0xc0] sm:$0xff] %v4069_v48  ;;  %4072 = vst [vmem:[%s5649_s27 + $0xc8] sm:$0xff] %v4071_v49  ;;  %v4075_v51 = vld [vmem:[%s5653_s28 + $0xd8] sm:$0xff]  ;;  %v4077_v52 = vld [vmem:[%s5653_s28 + $0xe0] sm:$0xff] }
 0x2fd   : >> { %4074 = vst [vmem:[%s5649_s27 + $0xd0] sm:$0xff] %v4073_v50  ;;  %v4079_v53 = vld [vmem:[%s5653_s28 + $0xe8] sm:$0xff]  ;;  %4076 = vst [vmem:[%s5649_s27 + $0xd8] sm:$0xff] %v4075_v51  ;;  %v4081_v54 = vld [vmem:[%s5653_s28 + $0xf0] sm:$0xff] }
 0x2fe   : >> { %4078 = vst [vmem:[%s5649_s27 + $0xe0] sm:$0xff] %v4077_v52  ;;  %4080 = vst [vmem:[%s5649_s27 + $0xe8] sm:$0xff] %v4079_v53  ;;  %v4083_v55 = vld [vmem:[%s5653_s28 + $0xf8] sm:$0xff]  ;;  %v4093_v32 = vld [vmem:[%s5653_s28 + $0x100] sm:$0xff] }
 0x2ff   : >> { %4086 = vst [vmem:[%s5649_s27 + $0x510] sm:$0xff] %v4077_v52  ;;  %4088 = vst [vmem:[%s5649_s27 + $0x518] sm:$0xff] %v4079_v53  ;;  %v4095_v16 = vld [vmem:[%s5653_s28 + $0x108] sm:$0xff]  ;;  %v4097_v57 = vld [vmem:[%s5653_s28 + $0x110] sm:$0xff] }
 0x300   : >> { %4082 = vst [vmem:[%s5649_s27 + $0xf0] sm:$0xff] %v4081_v54  ;;  %4084 = vst [vmem:[%s5649_s27 + $0xf8] sm:$0xff] %v4083_v55  ;;  %v4099_v58 = vld [vmem:[%s5653_s28 + $0x118] sm:$0xff]  ;;  %v4101_v59 = vld [vmem:[%s5653_s28 + $0x120] sm:$0xff] }
 0x301   : >> { %4090 = vst [vmem:[%s5649_s27 + $0x520] sm:$0xff] %v4081_v54  ;;  %4092 = vst [vmem:[%s5649_s27 + $0x528] sm:$0xff] %v4083_v55  ;;  %v4103_v60 = vld [vmem:[%s5653_s28 + $0x128] sm:$0xff]  ;;  %v4105_v61 = vld [vmem:[%s5653_s28 + $0x130] sm:$0xff] }
 0x302   : >> { %4094 = vst [vmem:[%s5649_s27 + $0x530] sm:$0xff] %v4093_v32  ;;  %4096 = vst [vmem:[%s5649_s27 + $0x538] sm:$0xff] %v4095_v16  ;;  %v4107_v63 = vld [vmem:[%s5653_s28 + $0x138] sm:$0xff]  ;;  %v4109_v0 = vld [vmem:[%s5653_s28 + $0x140] sm:$0xff] }
 0x303   : >> { %4098 = vst [vmem:[%s5649_s27 + $0x540] sm:$0xff] %v4097_v57  ;;  %4100 = vst [vmem:[%s5649_s27 + $0x548] sm:$0xff] %v4099_v58  ;;  %v4111_v23 = vld [vmem:[%s5653_s28 + $0x148] sm:$0xff]  ;;  %v4113_v1 = vld [vmem:[%s5653_s28 + $0x150] sm:$0xff] }
 0x304   : >> { %4102 = vst [vmem:[%s5649_s27 + $0x550] sm:$0xff] %v4101_v59  ;;  %4104 = vst [vmem:[%s5649_s27 + $0x558] sm:$0xff] %v4103_v60  ;;  %v4115_v2 = vld [vmem:[%s5653_s28 + $0x158] sm:$0xff]  ;;  %v4117_v3 = vld [vmem:[%s5653_s28 + $0x160] sm:$0xff] }
 0x305   : >> { %4106 = vst [vmem:[%s5649_s27 + $0x560] sm:$0xff] %v4105_v61  ;;  %4108 = vst [vmem:[%s5649_s27 + $0x568] sm:$0xff] %v4107_v63  ;;  %v4119_v5 = vld [vmem:[%s5653_s28 + $0x168] sm:$0xff]  ;;  %v4121_v14 = vld [vmem:[%s5653_s28 + $0x170] sm:$0xff] }
 0x306   : >> { %4110 = vst [vmem:[%s5649_s27 + $0x570] sm:$0xff] %v4109_v0  ;;  %4112 = vst [vmem:[%s5649_s27 + $0x578] sm:$0xff] %v4111_v23  ;;  %v4123_v15 = vld [vmem:[%s5653_s28 + $0x178] sm:$0xff]  ;;  %v4125_v6 = vld [vmem:[%s5653_s28 + $0x180] sm:$0xff] }
 0x307   : >> { %4114 = vst [vmem:[%s5649_s27 + $0x580] sm:$0xff] %v4113_v1  ;;  %4116 = vst [vmem:[%s5649_s27 + $0x588] sm:$0xff] %v4115_v2  ;;  %v4127_v8 = vld [vmem:[%s5653_s28 + $0x188] sm:$0xff]  ;;  %v4129_v9 = vld [vmem:[%s5653_s28 + $0x190] sm:$0xff] }
 0x308   : >> { %4118 = vst [vmem:[%s5649_s27 + $0x590] sm:$0xff] %v4117_v3  ;;  %4120 = vst [vmem:[%s5649_s27 + $0x598] sm:$0xff] %v4119_v5  ;;  %v4131_v10 = vld [vmem:[%s5653_s28 + $0x198] sm:$0xff]  ;;  %v4133_v11 = vld [vmem:[%s5653_s28 + $0x1a0] sm:$0xff] }
 0x309   : >> { %4122 = vst [vmem:[%s5649_s27 + $0x5a0] sm:$0xff] %v4121_v14  ;;  %4124 = vst [vmem:[%s5649_s27 + $0x5a8] sm:$0xff] %v4123_v15  ;;  %v4135_v56 = vld [vmem:[%s5653_s28 + $0x1a8] sm:$0xff]  ;;  %v4137_v21 = vld [vmem:[%s5653_s28 + $0x1b0] sm:$0xff] }
 0x30a   : >> { %4126 = vst [vmem:[%s5649_s27 + $0x5b0] sm:$0xff] %v4125_v6  ;;  %4128 = vst [vmem:[%s5649_s27 + $0x5b8] sm:$0xff] %v4127_v8  ;;  %v4139_v22 = vld [vmem:[%s5653_s28 + $0x1b8] sm:$0xff]  ;;  %v4141_v12 = vld [vmem:[%s5653_s28 + $0x1c0] sm:$0xff] }
 0x30b   : >> { %4130 = vst [vmem:[%s5649_s27 + $0x5c0] sm:$0xff] %v4129_v9  ;;  %4132 = vst [vmem:[%s5649_s27 + $0x5c8] sm:$0xff] %v4131_v10  ;;  %v4143_v42 = vld [vmem:[%s5653_s28 + $0x1c8] sm:$0xff]  ;;  %v4145_v62 = vld [vmem:[%s5653_s28 + $0x1d0] sm:$0xff]  ;;  %4017 = sbr.rel (!%p4014_p4) target bundleno = 751 (0x2ef), region = 184 }
 0x30c   : >> { %4134 = vst [vmem:[%s5649_s27 + $0x5d0] sm:$0xff] %v4133_v11  ;;  %4136 = vst [vmem:[%s5649_s27 + $0x5d8] sm:$0xff] %v4135_v56  ;;  %v4147_v13 = vld [vmem:[%s5653_s28 + $0x1d8] sm:$0xff]  ;;  %s7143_s28 = smov %s6799_s5 }
 0x30d   : >> { %4138 = vst [vmem:[%s5649_s27 + $0x5e0] sm:$0xff] %v4137_v21  ;;  %4140 = vst [vmem:[%s5649_s27 + $0x5e8] sm:$0xff] %v4139_v22 }
 0x30e   : >> { %4142 = vst [vmem:[%s5649_s27 + $0x5f0] sm:$0xff] %v4141_v12  ;;  %4144 = vst [vmem:[%s5649_s27 + $0x5f8] sm:$0xff] %v4143_v42 }
 0x30f   : >> { %4146 = vst [vmem:[%s5649_s27 + $0x600] sm:$0xff] %v4145_v62  ;;  %4148 = vst [vmem:[%s5649_s27 + $0x608] sm:$0xff] %v4147_v13  ;;  %s7142_s27 = smov %s6802_s8 }
 0x310 PF: > { %s6904_s10 = sand.u32 31, %s4008_s18   ;;  %s4610_s11 = sshll.u32 %s6732_s20, 12 }
 0x311   : > { %s4160_s12 = sshra.s32 %s4610_s11, 4  ;;  %p4591_p5 = scmp.le.s32.totalorder %s6904_s10, 0 }
 0x312   : > { %s6908_s13 = scalar_lea.vmem %s6449_s15, %s4160_s12 [#allocation3]   ;;  %s4164_s9 = scalar_lea.vmem %s6719_s24, %s4160_s12  }
 0x313   : > { %4476 = sbr.rel (%p4591_p5) target bundleno = 800 (0x320), region = 189  ;;  %s5663_s14 = smov (!%p4591_p5), %s4164_s9  }
 0x314   : > { %s5667_s17 = smov (!%p4591_p5), %s6908_s13   ;;  %s5671_s21 = smov (!%p4591_p5), 0  }
 0x315   : > { %s5675_s25 = smov (!%p4591_p5), 0  }
 0x318 LB: >> { %v4176_v17 = vld [vmem:[%s5669_s17] sm:$0xff]  ;;  %s4180_s18 = sadd.s32 1, %s5673_s21  ;;  %s4170_s25 = sadd.s32 1, %s5677_s25   ;;  %s5677_s25 = sphi %s5675_s25, %s4170_s25   ;;  %s5673_s21 = sphi %s5671_s21, %s5672_s21   ;;  %s5669_s17 = sphi %s5667_s17, %s4185_s17   ;;  %s5665_s14 = sphi %s5663_s14, %s4186_s14  }
 0x319   : >> { %v4178_v18 = vld [vmem:[%s5669_s17 + $0xe0] sm:$0xff]  ;;  %4177 = vst [vmem:[%s5665_s14] sm:$0xff] %v4176_v17  ;;  %p4181_p6 = scmp.ge.s32.totalorder %s4180_s18, %s6904_s10  ;;  %p4169_p7 = scmp.ge.s32.totalorder %s4170_s25, %s6904_s10 }
 0x31a   : >> { %4179 = vst [vmem:[%s5665_s14 + $0x510] sm:$0xff] %v4178_v18 }
 0x31b   : >> { %s7158_s18 = smov (%p4181_p6, %s4180_s18), 0  ;;  %4172 = sbr.rel (!%p4169_p7) target bundleno = 792 (0x318), region = 195 }
 0x31c   : >> { %s4592_s20 = sshll.u32 %s7158_s18, 3  ;;  %s5672_s21 = smov %s7158_s18  }
 0x31d   : >> { %s4185_s17 = scalar_lea.vmem %s6908_s13, %s4592_s20 [#allocation3]   ;;  %s4186_s14 = scalar_lea.vmem %s4164_s9, %s4592_s20  }
 0x320 PF: > { %4189 = sbr.rel (%p4004_p0) target bundleno = 865 (0x361), region = 104  ;;  %s4191_s27 = ssub.s32 (!%p4004_p0), %s6721_s26, %s6725_s23 }
 0x321   : > { %s4195_s28 = sshrl.u32 (!%p4004_p0), %s6721_s26, 3  ;;  %s6922_s29 = scalar_lea.vmem (!%p4004_p0), %s6449_s15, %s4191_s27 [#allocation3] }
 0x322   : > { %s6925_s30 = scalar_lea.vmem (!%p4004_p0), %s6719_s24, %s4191_s27  ;;  %s6929_s6 = sshrl.u32 (!%p4004_p0), %s4195_s28, 5 }
 0x323   : > { %p4594_p8 = scmp.le.s32.totalorder (!%p4004_p0), %s6929_s6, 0 }
 0x325   : > { %4490 = sbr.rel (%p4594_p8) target bundleno = 843 (0x34b), region = 200  ;;  %s7145_s7 = smov (!%p4594_p8), %s6719_s24 }
 0x326   : > { %s7146_s5 = smov (!%p4594_p8), %s6449_s15  ;;  %s6938_s8 = smov (!%p4594_p8), 0  }
 0x327   : > { %s6940_s10 = smov (!%p4594_p8), 0  }
 0x32a LB: >> { %v4208_v19 = vld [vmem:[%s5685_s5] sm:$0xff]  ;;  %v4210_v20 = vld [vmem:[%s5685_s5 + $0x8] sm:$0xff]  ;;  %v4212_v24 = vld [vmem:[%s5685_s5 + $0x10] sm:$0xff]  ;;  %s4336_s11 = sadd.s32 1, %s5689_s8  ;;  %s4202_s10 = sadd.s32 1, %s5693_s10   ;;  %s5693_s10 = sphi %s6940_s10, %s4202_s10   ;;  %s5689_s8 = sphi %s6938_s8, %s7149_s8   ;;  %s5685_s5 = sphi %s7146_s5, %s7148_s5   ;;  %s5681_s7 = sphi %s7145_s7, %s7147_s7  }
 0x32b   : >> { %4209 = vst [vmem:[%s5681_s7] sm:$0xff] %v4208_v19  ;;  %4211 = vst [vmem:[%s5681_s7 + $0x8] sm:$0xff] %v4210_v20  ;;  %v4214_v25 = vld [vmem:[%s5685_s5 + $0x18] sm:$0xff]  ;;  %v4216_v26 = vld [vmem:[%s5685_s5 + $0x20] sm:$0xff]  ;;  %p4337_p9 = scmp.ge.s32.totalorder %s4336_s11, %s6929_s6  ;;  %p4201_p10 = scmp.ge.s32.totalorder %s4202_s10, %s6929_s6 }
 0x32c   : >> { %4213 = vst [vmem:[%s5681_s7 + $0x10] sm:$0xff] %v4212_v24  ;;  %v4218_v29 = vld [vmem:[%s5685_s5 + $0x28] sm:$0xff]  ;;  %4215 = vst [vmem:[%s5681_s7 + $0x18] sm:$0xff] %v4214_v25  ;;  %v4220_v30 = vld [vmem:[%s5685_s5 + $0x30] sm:$0xff] }
 0x32d   : >> { %4217 = vst [vmem:[%s5681_s7 + $0x20] sm:$0xff] %v4216_v26  ;;  %4219 = vst [vmem:[%s5681_s7 + $0x28] sm:$0xff] %v4218_v29  ;;  %v4222_v31 = vld [vmem:[%s5685_s5 + $0x38] sm:$0xff]  ;;  %v4224_v7 = vld [vmem:[%s5685_s5 + $0x40] sm:$0xff]  ;;  %s7160_s11 = smov (%p4337_p9, %s4336_s11), 0 }
 0x32e   : >> { %4221 = vst [vmem:[%s5681_s7 + $0x30] sm:$0xff] %v4220_v30  ;;  %4223 = vst [vmem:[%s5681_s7 + $0x38] sm:$0xff] %v4222_v31  ;;  %v4226_v33 = vld [vmem:[%s5685_s5 + $0x48] sm:$0xff]  ;;  %v4228_v36 = vld [vmem:[%s5685_s5 + $0x50] sm:$0xff]  ;;  %s4595_s12 = sshll.u32 %s7160_s11, 8  ;;  %s7149_s8 = smov %s7160_s11 }
 0x32f   : >> { %4225 = vst [vmem:[%s5681_s7 + $0x40] sm:$0xff] %v4224_v7  ;;  %v4230_v37 = vld [vmem:[%s5685_s5 + $0x58] sm:$0xff]  ;;  %4227 = vst [vmem:[%s5681_s7 + $0x48] sm:$0xff] %v4226_v33  ;;  %v4232_v39 = vld [vmem:[%s5685_s5 + $0x60] sm:$0xff]  ;;  %s6996_s13 = scalar_lea.vmem %s6449_s15, %s4595_s12 [#allocation3]   ;;  %s6999_s9 = scalar_lea.vmem %s6719_s24, %s4595_s12  }
 0x330   : >> { %4229 = vst [vmem:[%s5681_s7 + $0x50] sm:$0xff] %v4228_v36  ;;  %4231 = vst [vmem:[%s5681_s7 + $0x58] sm:$0xff] %v4230_v37  ;;  %v4234_v4 = vld [vmem:[%s5685_s5 + $0x68] sm:$0xff]  ;;  %v4236_v27 = vld [vmem:[%s5685_s5 + $0x70] sm:$0xff] }
 0x331   : >> { %4233 = vst [vmem:[%s5681_s7 + $0x60] sm:$0xff] %v4232_v39  ;;  %4235 = vst [vmem:[%s5681_s7 + $0x68] sm:$0xff] %v4234_v4  ;;  %v4238_v28 = vld [vmem:[%s5685_s5 + $0x78] sm:$0xff]  ;;  %v4240_v38 = vld [vmem:[%s5685_s5 + $0x80] sm:$0xff] }
 0x332   : >> { %4237 = vst [vmem:[%s5681_s7 + $0x70] sm:$0xff] %v4236_v27  ;;  %v4242_v40 = vld [vmem:[%s5685_s5 + $0x88] sm:$0xff]  ;;  %4239 = vst [vmem:[%s5681_s7 + $0x78] sm:$0xff] %v4238_v28  ;;  %v4244_v41 = vld [vmem:[%s5685_s5 + $0x90] sm:$0xff] }
 0x333   : >> { %4241 = vst [vmem:[%s5681_s7 + $0x80] sm:$0xff] %v4240_v38  ;;  %4243 = vst [vmem:[%s5681_s7 + $0x88] sm:$0xff] %v4242_v40  ;;  %v4246_v43 = vld [vmem:[%s5685_s5 + $0x98] sm:$0xff]  ;;  %v4248_v44 = vld [vmem:[%s5685_s5 + $0xa0] sm:$0xff] }
 0x334   : >> { %4245 = vst [vmem:[%s5681_s7 + $0x90] sm:$0xff] %v4244_v41  ;;  %4247 = vst [vmem:[%s5681_s7 + $0x98] sm:$0xff] %v4246_v43  ;;  %v4250_v45 = vld [vmem:[%s5685_s5 + $0xa8] sm:$0xff]  ;;  %v4252_v34 = vld [vmem:[%s5685_s5 + $0xb0] sm:$0xff] }
 0x335   : >> { %4249 = vst [vmem:[%s5681_s7 + $0xa0] sm:$0xff] %v4248_v44  ;;  %v4254_v35 = vld [vmem:[%s5685_s5 + $0xb8] sm:$0xff]  ;;  %4251 = vst [vmem:[%s5681_s7 + $0xa8] sm:$0xff] %v4250_v45  ;;  %v4256_v46 = vld [vmem:[%s5685_s5 + $0xc0] sm:$0xff] }
 0x336   : >> { %4253 = vst [vmem:[%s5681_s7 + $0xb0] sm:$0xff] %v4252_v34  ;;  %4255 = vst [vmem:[%s5681_s7 + $0xb8] sm:$0xff] %v4254_v35  ;;  %v4258_v47 = vld [vmem:[%s5685_s5 + $0xc8] sm:$0xff]  ;;  %v4260_v48 = vld [vmem:[%s5685_s5 + $0xd0] sm:$0xff] }
 0x337   : >> { %4257 = vst [vmem:[%s5681_s7 + $0xc0] sm:$0xff] %v4256_v46  ;;  %4259 = vst [vmem:[%s5681_s7 + $0xc8] sm:$0xff] %v4258_v47  ;;  %v4262_v49 = vld [vmem:[%s5685_s5 + $0xd8] sm:$0xff]  ;;  %v4264_v50 = vld [vmem:[%s5685_s5 + $0xe0] sm:$0xff] }
 0x338   : >> { %4261 = vst [vmem:[%s5681_s7 + $0xd0] sm:$0xff] %v4260_v48  ;;  %v4266_v51 = vld [vmem:[%s5685_s5 + $0xe8] sm:$0xff]  ;;  %4263 = vst [vmem:[%s5681_s7 + $0xd8] sm:$0xff] %v4262_v49  ;;  %v4268_v52 = vld [vmem:[%s5685_s5 + $0xf0] sm:$0xff] }
 0x339   : >> { %4265 = vst [vmem:[%s5681_s7 + $0xe0] sm:$0xff] %v4264_v50  ;;  %4267 = vst [vmem:[%s5681_s7 + $0xe8] sm:$0xff] %v4266_v51  ;;  %v4270_v53 = vld [vmem:[%s5685_s5 + $0xf8] sm:$0xff]  ;;  %v4280_v54 = vld [vmem:[%s5685_s5 + $0x100] sm:$0xff] }
 0x33a   : >> { %4273 = vst [vmem:[%s5681_s7 + $0x510] sm:$0xff] %v4264_v50  ;;  %4275 = vst [vmem:[%s5681_s7 + $0x518] sm:$0xff] %v4266_v51  ;;  %v4282_v55 = vld [vmem:[%s5685_s5 + $0x108] sm:$0xff]  ;;  %v4284_v32 = vld [vmem:[%s5685_s5 + $0x110] sm:$0xff] }
 0x33b   : >> { %4269 = vst [vmem:[%s5681_s7 + $0xf0] sm:$0xff] %v4268_v52  ;;  %4271 = vst [vmem:[%s5681_s7 + $0xf8] sm:$0xff] %v4270_v53  ;;  %v4286_v16 = vld [vmem:[%s5685_s5 + $0x118] sm:$0xff]  ;;  %v4288_v57 = vld [vmem:[%s5685_s5 + $0x120] sm:$0xff] }
 0x33c   : >> { %4277 = vst [vmem:[%s5681_s7 + $0x520] sm:$0xff] %v4268_v52  ;;  %4279 = vst [vmem:[%s5681_s7 + $0x528] sm:$0xff] %v4270_v53  ;;  %v4290_v58 = vld [vmem:[%s5685_s5 + $0x128] sm:$0xff]  ;;  %v4292_v59 = vld [vmem:[%s5685_s5 + $0x130] sm:$0xff] }
 0x33d   : >> { %4281 = vst [vmem:[%s5681_s7 + $0x530] sm:$0xff] %v4280_v54  ;;  %4283 = vst [vmem:[%s5681_s7 + $0x538] sm:$0xff] %v4282_v55  ;;  %v4294_v60 = vld [vmem:[%s5685_s5 + $0x138] sm:$0xff]  ;;  %v4296_v61 = vld [vmem:[%s5685_s5 + $0x140] sm:$0xff] }
 0x33e   : >> { %4285 = vst [vmem:[%s5681_s7 + $0x540] sm:$0xff] %v4284_v32  ;;  %4287 = vst [vmem:[%s5681_s7 + $0x548] sm:$0xff] %v4286_v16  ;;  %v4298_v63 = vld [vmem:[%s5685_s5 + $0x148] sm:$0xff]  ;;  %v4300_v0 = vld [vmem:[%s5685_s5 + $0x150] sm:$0xff] }
 0x33f   : >> { %4289 = vst [vmem:[%s5681_s7 + $0x550] sm:$0xff] %v4288_v57  ;;  %4291 = vst [vmem:[%s5681_s7 + $0x558] sm:$0xff] %v4290_v58  ;;  %v4302_v23 = vld [vmem:[%s5685_s5 + $0x158] sm:$0xff]  ;;  %v4304_v1 = vld [vmem:[%s5685_s5 + $0x160] sm:$0xff] }
 0x340   : >> { %4293 = vst [vmem:[%s5681_s7 + $0x560] sm:$0xff] %v4292_v59  ;;  %4295 = vst [vmem:[%s5681_s7 + $0x568] sm:$0xff] %v4294_v60  ;;  %v4306_v2 = vld [vmem:[%s5685_s5 + $0x168] sm:$0xff]  ;;  %v4308_v3 = vld [vmem:[%s5685_s5 + $0x170] sm:$0xff] }
 0x341   : >> { %4297 = vst [vmem:[%s5681_s7 + $0x570] sm:$0xff] %v4296_v61  ;;  %4299 = vst [vmem:[%s5681_s7 + $0x578] sm:$0xff] %v4298_v63  ;;  %v4310_v5 = vld [vmem:[%s5685_s5 + $0x178] sm:$0xff]  ;;  %v4312_v14 = vld [vmem:[%s5685_s5 + $0x180] sm:$0xff] }
 0x342   : >> { %4301 = vst [vmem:[%s5681_s7 + $0x580] sm:$0xff] %v4300_v0  ;;  %4303 = vst [vmem:[%s5681_s7 + $0x588] sm:$0xff] %v4302_v23  ;;  %v4314_v15 = vld [vmem:[%s5685_s5 + $0x188] sm:$0xff]  ;;  %v4316_v6 = vld [vmem:[%s5685_s5 + $0x190] sm:$0xff] }
 0x343   : >> { %4305 = vst [vmem:[%s5681_s7 + $0x590] sm:$0xff] %v4304_v1  ;;  %4307 = vst [vmem:[%s5681_s7 + $0x598] sm:$0xff] %v4306_v2  ;;  %v4318_v8 = vld [vmem:[%s5685_s5 + $0x198] sm:$0xff]  ;;  %v4320_v9 = vld [vmem:[%s5685_s5 + $0x1a0] sm:$0xff] }
 0x344   : >> { %4309 = vst [vmem:[%s5681_s7 + $0x5a0] sm:$0xff] %v4308_v3  ;;  %4311 = vst [vmem:[%s5681_s7 + $0x5a8] sm:$0xff] %v4310_v5  ;;  %v4322_v10 = vld [vmem:[%s5685_s5 + $0x1a8] sm:$0xff]  ;;  %v4324_v11 = vld [vmem:[%s5685_s5 + $0x1b0] sm:$0xff] }
 0x345   : >> { %4313 = vst [vmem:[%s5681_s7 + $0x5b0] sm:$0xff] %v4312_v14  ;;  %4315 = vst [vmem:[%s5681_s7 + $0x5b8] sm:$0xff] %v4314_v15  ;;  %v4326_v56 = vld [vmem:[%s5685_s5 + $0x1b8] sm:$0xff]  ;;  %v4328_v21 = vld [vmem:[%s5685_s5 + $0x1c0] sm:$0xff] }
 0x346   : >> { %4317 = vst [vmem:[%s5681_s7 + $0x5c0] sm:$0xff] %v4316_v6  ;;  %4319 = vst [vmem:[%s5681_s7 + $0x5c8] sm:$0xff] %v4318_v8  ;;  %v4330_v22 = vld [vmem:[%s5685_s5 + $0x1c8] sm:$0xff]  ;;  %v4332_v12 = vld [vmem:[%s5685_s5 + $0x1d0] sm:$0xff]  ;;  %4204 = sbr.rel (!%p4201_p10) target bundleno = 810 (0x32a), region = 206 }
 0x347   : >> { %4321 = vst [vmem:[%s5681_s7 + $0x5d0] sm:$0xff] %v4320_v9  ;;  %4323 = vst [vmem:[%s5681_s7 + $0x5d8] sm:$0xff] %v4322_v10  ;;  %v4334_v42 = vld [vmem:[%s5685_s5 + $0x1d8] sm:$0xff]  ;;  %s7148_s5 = smov %s6996_s13 }
 0x348   : >> { %4325 = vst [vmem:[%s5681_s7 + $0x5e0] sm:$0xff] %v4324_v11  ;;  %4327 = vst [vmem:[%s5681_s7 + $0x5e8] sm:$0xff] %v4326_v56 }
 0x349   : >> { %4329 = vst [vmem:[%s5681_s7 + $0x5f0] sm:$0xff] %v4328_v21  ;;  %4331 = vst [vmem:[%s5681_s7 + $0x5f8] sm:$0xff] %v4330_v22 }
 0x34a   : >> { %4333 = vst [vmem:[%s5681_s7 + $0x600] sm:$0xff] %v4332_v12  ;;  %4335 = vst [vmem:[%s5681_s7 + $0x608] sm:$0xff] %v4334_v42  ;;  %s7147_s7 = smov %s6999_s9 }
 0x34b PF: > { %s7101_s14 = sand.u32 31, %s4195_s28   ;;  %s4612_s17 = sshll.u32 %s6929_s6, 12 }
 0x34c   : > { %s4347_s21 = sshra.s32 %s4612_s17, 4  ;;  %p4600_p11 = scmp.le.s32.totalorder %s7101_s14, 0 }
 0x34d   : > { %s7105_s25 = scalar_lea.vmem %s6449_s15, %s4347_s21 [#allocation3]   ;;  %s4351_s18 = scalar_lea.vmem %s6719_s24, %s4347_s21  }
 0x34e   : > { %4504 = sbr.rel (%p4600_p11) target bundleno = 859 (0x35b), region = 211  ;;  %s5695_s20 = smov (!%p4600_p11), %s4351_s18  }
 0x34f   : > { %s5699_s27 = smov (!%p4600_p11), %s7105_s25   ;;  %s5703_s10 = smov (!%p4600_p11), 0  }
 0x350   : > { %s5707_s7 = smov (!%p4600_p11), 0  }
 0x353 LB: >> { %v4363_v62 = vld [vmem:[%s5701_s27] sm:$0xff]  ;;  %s4367_s28 = sadd.s32 1, %s5705_s10  ;;  %s4357_s7 = sadd.s32 1, %s5709_s7   ;;  %s5709_s7 = sphi %s5707_s7, %s4357_s7   ;;  %s5705_s10 = sphi %s5703_s10, %s5704_s10   ;;  %s5701_s27 = sphi %s5699_s27, %s4372_s27   ;;  %s5697_s20 = sphi %s5695_s20, %s4373_s20  }
 0x354   : >> { %v4365_v13 = vld [vmem:[%s5701_s27 + $0xe0] sm:$0xff]  ;;  %4364 = vst [vmem:[%s5697_s20] sm:$0xff] %v4363_v62  ;;  %p4368_p12 = scmp.ge.s32.totalorder %s4367_s28, %s7101_s14  ;;  %p4356_p13 = scmp.ge.s32.totalorder %s4357_s7, %s7101_s14 }
 0x355   : >> { %4366 = vst [vmem:[%s5697_s20 + $0x510] sm:$0xff] %v4365_v13 }
 0x356   : >> { %s7162_s28 = smov (%p4368_p12, %s4367_s28), 0  ;;  %4359 = sbr.rel (!%p4356_p13) target bundleno = 851 (0x353), region = 217 }
 0x357   : >> { %s4601_s6 = sshll.u32 %s7162_s28, 3  ;;  %s5704_s10 = smov %s7162_s28  }
 0x358   : >> { %s4372_s27 = scalar_lea.vmem %s7105_s25, %s4601_s6 [#allocation3]   ;;  %s4373_s20 = scalar_lea.vmem %s4351_s18, %s4601_s6  }
 0x35b PF: > { %s5711_s5 = smov 1  }
 0x35c   : > { %s4374_s8 = sshll.u32 %s5711_s5, %s6725_s23 }
 0x35d   : > { %s4603_s11 = sadd.s32 4294967295, %s4374_s8 }
 0x35e   : > { %v4384_v17 = vld [vmem:[%s6922_s29] sm:%s4603_s11] }
 0x35f   : > { %v4386_v18 = vld [vmem:[%s6922_s29 + $0xe0] sm:%s4603_s11]  ;;  %4385 = vst [vmem:[%s6925_s30] sm:%s4603_s11] %v4384_v17 }
 0x360   : > { %4387 = vst [vmem:[%s6925_s30 + $0x510] sm:%s4603_s11] %v4386_v18 }
 0x361 PF: > { %p4604_p0 = scmp.ge.u32.totalorder %s6721_s26, 8 }
 0x362   : > { %s5712_s12 = smov (!%p4604_p0), 1  }
 0x363   : > { %3988 = sbr.rel (%p4604_p0) target bundleno = 875 (0x36b), region = 75  ;;  %s3989_s13 = sshll.u32 (!%p4604_p0), %s5712_s12, %s6721_s26 }
 0x364   : > { %s4605_s9 = sadd.s32 (!%p4604_p0), 4294967295, %s3989_s13 }
 0x368   : > { %v3999_v19 = vld [vmem:[%s6449_s15] sm:%s4605_s9] }
 0x369   : > { %v4001_v20 = vld [vmem:[%s6449_s15 + $0xe0] sm:%s4605_s9]  ;;  %4000 = vst [vmem:[%s6719_s24] sm:%s4605_s9] %v3999_v19 }
 0x36a   : > { %4002 = vst [vmem:[%s6719_s24 + $0x510] sm:%s4605_s9] %v4001_v20 }
 0x36b PF: > { %p11_p1 = scmp.ge.s32.totalorder %s5757_s19, 8   ;;  %s7150_s15 = smov %s5641_s16 }
 0x36c   : > { %s7151_s16 = smov %s5767_s22  ;;  %s7152_s17 = smov %s5757_s19 }
 0x36d   :  { %13 = sbr.rel (!%p11_p1) target bundleno = 2 (0x2), region = 228 }

</bundles_post_ra>
